<compile_context>
chip_gen: v6e
topology: v6e:2x2x1
jax: 0.10.0
libtpu: 0.0.40
codegen_flags: <defaults>
</compile_context>

<pallas_src>
import math
import functools

import jax
import jax.numpy as jnp
from jax.experimental import pallas as pl
from jax.experimental.pallas import tpu as pltpu

# ----------------------------- model sizes -----------------------------------
BATCH = 2
SEQ = 8
VOCAB = 16
D_MODEL = 32
N_HEADS = 4
D_HEAD = D_MODEL // N_HEADS
D_FF = 64
NEG_INF = -1e9
LANES = 128

VMEM_SPEC = pl.BlockSpec(memory_space=pltpu.MemorySpace.VMEM)


# ----------------------- in-kernel building blocks ----------------------------
def _bf16(x):
    return x.astype(jnp.bfloat16)


def _linear(x, w, b, act=None):
    y = jnp.dot(_bf16(x), _bf16(w), preferred_element_type=jnp.float32) + b
    if act == "relu":
        y = jnp.maximum(y, 0.0)
    return y


def _layer_norm(x, g, b):
    mu = jnp.mean(x, axis=-1, keepdims=True)
    d = x - mu
    var = jnp.mean(d * d, axis=-1, keepdims=True)
    return d * jax.lax.rsqrt(var + 1e-5) * g + b


def _mha(xq, xkv, p, mask):
    """Multi-head attention on (B*S, D) f32 slabs.

    Heads are a short static loop; batch rides one 3-D einsum per head and the
    output projection is folded per head, so there are no concatenations.
    """
    D = D_MODEL
    Sq = xq.shape[0] // BATCH
    Sk = xkv.shape[0] // BATCH

    wqkv, bqkv = p["wqkv"], p["bqkv"]
    # 1/sqrt(d_head) is pre-folded into the Q columns of wqkv/bqkv at init.
    q = jnp.dot(_bf16(xq), _bf16(wqkv[:, 0:D]),
                preferred_element_type=jnp.float32) + bqkv[:, 0:D]
    kv = jnp.dot(_bf16(xkv), _bf16(wqkv[:, D:3 * D]),
                 preferred_element_type=jnp.float32) + bqkv[:, D:3 * D]
    k = kv[:, 0:D]
    v = kv[:, D:2 * D]

    # leading-dim-only reshapes (minor dim untouched -> no lane relayout)
    q3 = q.reshape(BATCH, Sq, D)
    k3 = k.reshape(BATCH, Sk, D)
    v3 = v.reshape(BATCH, Sk, D)

    wo = p["wo"]
    out = None
    for h in range(N_HEADS):
        c = slice(h * D_HEAD, (h + 1) * D_HEAD)
        qh = _bf16(q3[:, :, c])                                   # (B, Sq, Dh)
        kh = _bf16(k3[:, :, c])                                   # (B, Sk, Dh)
        vh = _bf16(v3[:, :, c])                                   # (B, Sk, Dh)
        s = jnp.einsum("bqd,bkd->bqk", qh, kh,
                       preferred_element_type=jnp.float32)        # (B, Sq, Sk)
        if mask is not None:
            s = s + mask
        s = s - jnp.max(s, axis=-1, keepdims=True)
        e = jnp.exp(s)
        pa = e / jnp.sum(e, axis=-1, keepdims=True)               # exact softmax (f32)
        oh = jnp.einsum("bqk,bkd->bqd", _bf16(pa), vh,
                        preferred_element_type=jnp.float32)        # (B, Sq, Dh)
        # output projection folded per head: concat_h(o_h) @ Wo == sum_h o_h @ Wo[h]
        contrib = jnp.dot(_bf16(oh.reshape(BATCH * Sq, D_HEAD)),
                          _bf16(wo[c, :]),
                          preferred_element_type=jnp.float32)      # (B*Sq, D)
        out = contrib if out is None else out + contrib
    return out + p["bo"]


def _ffn(x, p):
    h = _linear(x, p["w1"], p["b1"], act="relu")
    return _linear(h, p["w2"], p["b2"])


def _encoder_layer(x, p):
    a = _mha(x, x, p["sa"], None)
    x = _layer_norm(x + a, *p["ln1"])
    f = _ffn(x, p["ff"])
    x = _layer_norm(x + f, *p["ln2"])
    return x


def _decoder_layer(z, c, p, causal_mask):
    a = _mha(z, z, p["sa"], causal_mask)
    z = _layer_norm(z + a, *p["ln1"])
    a = _mha(z, c, p["xa"], None)
    z = _layer_norm(z + a, *p["ln2"])
    f = _ffn(z, p["ff"])
    z = _layer_norm(z + f, *p["ln3"])
    return z


# ----------------------------- fused kernel -----------------------------------
def _transformer_kernel(meta, tok_ref, slab_ref, out_ref):
    B, S, D, V = BATCH, SEQ, D_MODEL, VOCAB

    # static unpacking of the single packed-parameter slab (zero-cost ref slices)
    def get(name):
        r, nr, nc = meta[name]
        return slab_ref[r:r + nr, 0:nc]

    def attn_p(pfx):
        return dict(wqkv=get(pfx + "_wqkv"), bqkv=get(pfx + "_bqkv"),
                    wo=get(pfx + "_wo"), bo=get(pfx + "_bo"))

    def ln_p(pfx):
        return (get(pfx + "_g"), get(pfx + "_b"))

    def ff_p(pfx):
        return dict(w1=get(pfx + "_w1"), b1=get(pfx + "_b1"),
                    w2=get(pfx + "_w2"), b2=get(pfx + "_b2"))

    enc = dict(sa=attn_p("enc_sa"), ln1=ln_p("enc_ln1"),
               ff=ff_p("enc_ff"), ln2=ln_p("enc_ln2"))
    dec = dict(sa=attn_p("dec_sa"), ln1=ln_p("dec_ln1"),
               xa=attn_p("dec_xa"), ln2=ln_p("dec_ln2"),
               ff=ff_p("dec_ff"), ln3=ln_p("dec_ln3"))

    # ---- input embedding: in-kernel one-hot @ table (sqrt(d_model) pre-folded) ----
    tok = tok_ref[...]                                             # (B*S, 1) int32
    vid = jax.lax.broadcasted_iota(jnp.int32, (B * S, V), 1)
    onehot = (vid == tok).astype(jnp.float32)
    x = jnp.dot(_bf16(onehot), _bf16(get("embed_w")),
                preferred_element_type=jnp.float32) + get("embed_b")

    # ---- positional encoding: broadcast add over batch (no concat copy) ----
    pe = get("pos_enc")                                            # (S, D)
    x = (x.reshape(B, S, D) + pe[None, :, :]).reshape(B * S, D)

    # ---- causal mask (built once, shared by stacked decoder layers) ----
    ri = jax.lax.broadcasted_iota(jnp.int32, (S, S), 0)
    ci = jax.lax.broadcasted_iota(jnp.int32, (S, S), 1)
    causal = jnp.where(ri >= ci, 0.0, NEG_INF).astype(jnp.float32)

    # ---- encoder / decoder ----
    c = _encoder_layer(x, enc)
    y = _decoder_layer(x, c, dec, causal)                          # (B*S, D)

    # ---- F.log_softmax(y): legacy implicit dim -> dim=0 for 3-D tensors ----
    rows = [y[b * S:(b + 1) * S, :] for b in range(B)]
    m = rows[0]
    for r in rows[1:]:
        m = jnp.maximum(m, r)
    shifted = [r - m for r in rows]
    tot = jnp.exp(shifted[0])
    for sh in shifted[1:]:
        tot = tot + jnp.exp(sh)
    lse = jnp.log(tot)
    for b in range(B):
        out_ref[b, :, :] = shifted[b] - lse


def make_forward(meta):
    kernel = functools.partial(_transformer_kernel, meta)

    @jax.jit
    def fwd(slab, tokens):
        tok2d = tokens.reshape(BATCH * SEQ, 1).astype(jnp.int32)
        return pl.pallas_call(
            kernel,
            out_shape=jax.ShapeDtypeStruct((BATCH, SEQ, D_MODEL), jnp.float32),
            in_specs=[VMEM_SPEC, VMEM_SPEC],
            out_specs=VMEM_SPEC,
        )(tok2d, slab)

    return fwd


# ----------------------------- parameter init ---------------------------------
def sinusoidal_pe(max_len, d):
    pos = jnp.arange(max_len, dtype=jnp.float32)[:, None]
    i = jnp.arange(0, d, 2, dtype=jnp.float32)
    div = jnp.exp(-math.log(10000.0) * i / d)
    pe = jnp.zeros((max_len, d), jnp.float32)
    pe = pe.at[:, 0::2].set(jnp.sin(pos * div))
    pe = pe.at[:, 1::2].set(jnp.cos(pos * div))
    return pe


def init_params(key):
    """Create all parameters and pack them into ONE lane-padded f32 slab + offset meta."""
    keys = iter(jax.random.split(key, 64))

    def lin(fan_in, fan_out):
        kw, kb = jax.random.split(next(keys))
        w = jax.random.normal(kw, (fan_in, fan_out), jnp.float32) / math.sqrt(fan_in)
        b = jax.random.normal(kb, (1, fan_out), jnp.float32) * 0.02
        return w, b

    named = []

    def add(name, arr):
        named.append((name, arr))

    # input embedding: sqrt(d_model) folded in once at init
    ew = jax.random.normal(next(keys), (VOCAB, D_MODEL), jnp.float32)
    eb = jnp.zeros((1, D_MODEL), jnp.float32)
    add("embed_w", ew * math.sqrt(D_MODEL))
    add("embed_b", eb * math.sqrt(D_MODEL))
    add("pos_enc", sinusoidal_pe(SEQ, D_MODEL))

    def add_attn(pfx):
        wqkv, bqkv = lin(D_MODEL, 3 * D_MODEL)      # fused Q|K|V projection
        scale = 1.0 / math.sqrt(D_HEAD)             # fold 1/sqrt(d_head) into Q columns
        wqkv = wqkv.at[:, 0:D_MODEL].multiply(scale)
        bqkv = bqkv.at[:, 0:D_MODEL].multiply(scale)
        wo, bo = lin(D_MODEL, D_MODEL)
        add(pfx + "_wqkv", wqkv)
        add(pfx + "_bqkv", bqkv)
        add(pfx + "_wo", wo)
        add(pfx + "_bo", bo)

    def add_ln(pfx):
        add(pfx + "_g", jnp.ones((1, D_MODEL), jnp.float32))
        add(pfx + "_b", jnp.zeros((1, D_MODEL), jnp.float32))

    def add_ff(pfx):
        w1, b1 = lin(D_MODEL, D_FF)
        w2, b2 = lin(D_FF, D_MODEL)
        add(pfx + "_w1", w1)
        add(pfx + "_b1", b1)
        add(pfx + "_w2", w2)
        add(pfx + "_b2", b2)

    # encoder layer
    add_attn("enc_sa"); add_ln("enc_ln1"); add_ff("enc_ff"); add_ln("enc_ln2")
    # decoder layer
    add_attn("dec_sa"); add_ln("dec_ln1")
    add_attn("dec_xa"); add_ln("dec_ln2")
    add_ff("dec_ff");  add_ln("dec_ln3")

    # ---- pack every leaf into one (R, 128) f32 slab: a single HBM->VMEM DMA ----
    meta = {}
    blocks = []
    off = 0
    for name, a in named:
        nr, nc = a.shape
        meta[name] = (off, nr, nc)
        if nc < LANES:
            a = jnp.pad(a, ((0, 0), (0, LANES - nc)))
        blocks.append(a)
        off += nr
    slab = jnp.concatenate(blocks, axis=0)
    pad_r = (-slab.shape[0]) % 8
    if pad_r:
        slab = jnp.pad(slab, ((0, pad_r), (0, 0)))
    return slab, meta


# ----------------------------- main --------------------------------------------
if __name__ == "__main__":
    root = jax.random.PRNGKey(0)
    pkey, tkey = jax.random.split(root)
    slab, meta = init_params(pkey)
    tokens = jax.random.randint(tkey, (BATCH, SEQ), 0, VOCAB, dtype=jnp.int32)

    fwd = make_forward(meta)
    out = jax.block_until_ready(fwd(slab, tokens))

    assert out.shape == (BATCH, SEQ, D_MODEL)
    assert bool(jnp.all(jnp.isfinite(out)))
    # log_softmax over dim 0 => exp sums to 1 along the batch axis
    assert bool(jnp.allclose(jnp.sum(jnp.exp(out), axis=0), 1.0, atol=1e-4))
    print("KERNEL_OK")
</pallas_src>

<mosaic_0001>
module attributes {stable_mosaic.version = 11 : i64} {
  func.func @_transformer_kernel(%arg0: memref<16x1xi32, #tpu.memory_space<vmem>>, %arg1: memref<432x128xf32, #tpu.memory_space<vmem>>, %arg2: memref<2x8x32xf32, #tpu.memory_space<vmem>>) attributes {dimension_semantics = [], scalar_prefetch = 0 : i64, scratch_operands = 0 : i64, tpu.core_type = #tpu.core_type<tc>} {
    %c25 = arith.constant 25 : index
    %c0 = arith.constant 0 : index
    %0 = vector.load %arg1[%c25, %c0] : memref<432x128xf32, #tpu.memory_space<vmem>>, vector<32x96xf32>
    %c57 = arith.constant 57 : index
    %c0_0 = arith.constant 0 : index
    %1 = vector.load %arg1[%c57, %c0_0] : memref<432x128xf32, #tpu.memory_space<vmem>>, vector<1x96xf32>
    %c58 = arith.constant 58 : index
    %c0_1 = arith.constant 0 : index
    %2 = vector.load %arg1[%c58, %c0_1] : memref<432x128xf32, #tpu.memory_space<vmem>>, vector<32x32xf32>
    %c90 = arith.constant 90 : index
    %c0_2 = arith.constant 0 : index
    %3 = vector.load %arg1[%c90, %c0_2] : memref<432x128xf32, #tpu.memory_space<vmem>>, vector<1x32xf32>
    %c91 = arith.constant 91 : index
    %c0_3 = arith.constant 0 : index
    %4 = vector.load %arg1[%c91, %c0_3] : memref<432x128xf32, #tpu.memory_space<vmem>>, vector<1x32xf32>
    %c92 = arith.constant 92 : index
    %c0_4 = arith.constant 0 : index
    %5 = vector.load %arg1[%c92, %c0_4] : memref<432x128xf32, #tpu.memory_space<vmem>>, vector<1x32xf32>
    %c93 = arith.constant 93 : index
    %c0_5 = arith.constant 0 : index
    %6 = vector.load %arg1[%c93, %c0_5] : memref<432x128xf32, #tpu.memory_space<vmem>>, vector<32x64xf32>
    %c125 = arith.constant 125 : index
    %c0_6 = arith.constant 0 : index
    %7 = vector.load %arg1[%c125, %c0_6] : memref<432x128xf32, #tpu.memory_space<vmem>>, vector<1x64xf32>
    %c126 = arith.constant 126 : index
    %c0_7 = arith.constant 0 : index
    %8 = vector.load %arg1[%c126, %c0_7] : memref<432x128xf32, #tpu.memory_space<vmem>>, vector<64x32xf32>
    %c190 = arith.constant 190 : index
    %c0_8 = arith.constant 0 : index
    %9 = vector.load %arg1[%c190, %c0_8] : memref<432x128xf32, #tpu.memory_space<vmem>>, vector<1x32xf32>
    %c191 = arith.constant 191 : index
    %c0_9 = arith.constant 0 : index
    %10 = vector.load %arg1[%c191, %c0_9] : memref<432x128xf32, #tpu.memory_space<vmem>>, vector<1x32xf32>
    %c192 = arith.constant 192 : index
    %c0_10 = arith.constant 0 : index
    %11 = vector.load %arg1[%c192, %c0_10] : memref<432x128xf32, #tpu.memory_space<vmem>>, vector<1x32xf32>
    %c193 = arith.constant 193 : index
    %c0_11 = arith.constant 0 : index
    %12 = vector.load %arg1[%c193, %c0_11] : memref<432x128xf32, #tpu.memory_space<vmem>>, vector<32x96xf32>
    %c225 = arith.constant 225 : index
    %c0_12 = arith.constant 0 : index
    %13 = vector.load %arg1[%c225, %c0_12] : memref<432x128xf32, #tpu.memory_space<vmem>>, vector<1x96xf32>
    %c226 = arith.constant 226 : index
    %c0_13 = arith.constant 0 : index
    %14 = vector.load %arg1[%c226, %c0_13] : memref<432x128xf32, #tpu.memory_space<vmem>>, vector<32x32xf32>
    %c258 = arith.constant 258 : index
    %c0_14 = arith.constant 0 : index
    %15 = vector.load %arg1[%c258, %c0_14] : memref<432x128xf32, #tpu.memory_space<vmem>>, vector<1x32xf32>
    %c259 = arith.constant 259 : index
    %c0_15 = arith.constant 0 : index
    %16 = vector.load %arg1[%c259, %c0_15] : memref<432x128xf32, #tpu.memory_space<vmem>>, vector<1x32xf32>
    %c260 = arith.constant 260 : index
    %c0_16 = arith.constant 0 : index
    %17 = vector.load %arg1[%c260, %c0_16] : memref<432x128xf32, #tpu.memory_space<vmem>>, vector<1x32xf32>
    %c261 = arith.constant 261 : index
    %c0_17 = arith.constant 0 : index
    %18 = vector.load %arg1[%c261, %c0_17] : memref<432x128xf32, #tpu.memory_space<vmem>>, vector<32x96xf32>
    %c293 = arith.constant 293 : index
    %c0_18 = arith.constant 0 : index
    %19 = vector.load %arg1[%c293, %c0_18] : memref<432x128xf32, #tpu.memory_space<vmem>>, vector<1x96xf32>
    %c294 = arith.constant 294 : index
    %c0_19 = arith.constant 0 : index
    %20 = vector.load %arg1[%c294, %c0_19] : memref<432x128xf32, #tpu.memory_space<vmem>>, vector<32x32xf32>
    %c326 = arith.constant 326 : index
    %c0_20 = arith.constant 0 : index
    %21 = vector.load %arg1[%c326, %c0_20] : memref<432x128xf32, #tpu.memory_space<vmem>>, vector<1x32xf32>
    %c327 = arith.constant 327 : index
    %c0_21 = arith.constant 0 : index
    %22 = vector.load %arg1[%c327, %c0_21] : memref<432x128xf32, #tpu.memory_space<vmem>>, vector<1x32xf32>
    %c328 = arith.constant 328 : index
    %c0_22 = arith.constant 0 : index
    %23 = vector.load %arg1[%c328, %c0_22] : memref<432x128xf32, #tpu.memory_space<vmem>>, vector<1x32xf32>
    %c329 = arith.constant 329 : index
    %c0_23 = arith.constant 0 : index
    %24 = vector.load %arg1[%c329, %c0_23] : memref<432x128xf32, #tpu.memory_space<vmem>>, vector<32x64xf32>
    %c361 = arith.constant 361 : index
    %c0_24 = arith.constant 0 : index
    %25 = vector.load %arg1[%c361, %c0_24] : memref<432x128xf32, #tpu.memory_space<vmem>>, vector<1x64xf32>
    %c362 = arith.constant 362 : index
    %c0_25 = arith.constant 0 : index
    %26 = vector.load %arg1[%c362, %c0_25] : memref<432x128xf32, #tpu.memory_space<vmem>>, vector<64x32xf32>
    %c426 = arith.constant 426 : index
    %c0_26 = arith.constant 0 : index
    %27 = vector.load %arg1[%c426, %c0_26] : memref<432x128xf32, #tpu.memory_space<vmem>>, vector<1x32xf32>
    %c427 = arith.constant 427 : index
    %c0_27 = arith.constant 0 : index
    %28 = vector.load %arg1[%c427, %c0_27] : memref<432x128xf32, #tpu.memory_space<vmem>>, vector<1x32xf32>
    %c428 = arith.constant 428 : index
    %c0_28 = arith.constant 0 : index
    %29 = vector.load %arg1[%c428, %c0_28] : memref<432x128xf32, #tpu.memory_space<vmem>>, vector<1x32xf32>
    %c0_29 = arith.constant 0 : index
    %c0_30 = arith.constant 0 : index
    %30 = vector.load %arg0[%c0_29, %c0_30] : memref<16x1xi32, #tpu.memory_space<vmem>>, vector<16x1xi32>
    %31 = tpu.iota {dimensions = array<i32: 1>} : vector<16x16xi32>
    %32 = vector.broadcast %30 : vector<16x1xi32> to vector<16x16xi32>
    %33 = arith.cmpi eq, %31, %32 : vector<16x16xi32>
    %34 = arith.extui %33 : vector<16x16xi1> to vector<16x16xi32>
    %35 = arith.sitofp %34 : vector<16x16xi32> to vector<16x16xf32>
    %36 = arith.truncf %35 : vector<16x16xf32> to vector<16x16xbf16>
    %c0_31 = arith.constant 0 : index
    %c0_32 = arith.constant 0 : index
    %37 = vector.load %arg1[%c0_31, %c0_32] : memref<432x128xf32, #tpu.memory_space<vmem>>, vector<16x32xf32>
    %38 = arith.truncf %37 : vector<16x32xf32> to vector<16x32xbf16>
    %cst = arith.constant dense<0.000000e+00> : vector<16x32xf32>
    %39 = tpu.matmul %36, %38, %cst {dimension_numbers = #tpu.dot_dimension_numbers<[1], [0], [0], [1], [0, 0, 1, 1], [], []>} : vector<16x16xbf16>, vector<16x32xbf16>, vector<16x32xf32> -> vector<16x32xf32>
    %c16 = arith.constant 16 : index
    %c0_33 = arith.constant 0 : index
    %40 = vector.load %arg1[%c16, %c0_33] : memref<432x128xf32, #tpu.memory_space<vmem>>, vector<1x32xf32>
    %41 = vector.broadcast %40 : vector<1x32xf32> to vector<16x32xf32>
    %42 = arith.addf %39, %41 : vector<16x32xf32>
    %c17 = arith.constant 17 : index
    %c0_34 = arith.constant 0 : index
    %43 = vector.load %arg1[%c17, %c0_34] : memref<432x128xf32, #tpu.memory_space<vmem>>, vector<8x32xf32>
    %44 = vector.shape_cast %42 : vector<16x32xf32> to vector<2x8x32xf32>
    %45 = vector.shape_cast %43 : vector<8x32xf32> to vector<1x8x32xf32>
    %46 = vector.broadcast %45 : vector<1x8x32xf32> to vector<2x8x32xf32>
    %47 = arith.addf %44, %46 : vector<2x8x32xf32>
    %48 = vector.shape_cast %47 : vector<2x8x32xf32> to vector<16x32xf32>
    %49 = tpu.iota {dimensions = array<i32: 0>} : vector<8x8xi32>
    %50 = tpu.iota {dimensions = array<i32: 1>} : vector<8x8xi32>
    %51 = arith.cmpi sge, %49, %50 : vector<8x8xi32>
    %cst_35 = arith.constant 0.000000e+00 : f32
    %cst_36 = arith.constant -1.000000e+09 : f32
    %52 = vector.broadcast %cst_35 : f32 to vector<8x8xf32>
    %53 = vector.broadcast %cst_36 : f32 to vector<8x8xf32>
    %54 = arith.select %51, %52, %53 : vector<8x8xi1>, vector<8x8xf32>
    %55 = arith.truncf %48 : vector<16x32xf32> to vector<16x32xbf16>
    %56 = vector.extract_strided_slice %0 {offsets = [0, 0], sizes = [32, 32], strides = [1, 1]} : vector<32x96xf32> to vector<32x32xf32>
    %57 = arith.truncf %56 : vector<32x32xf32> to vector<32x32xbf16>
    %cst_37 = arith.constant dense<0.000000e+00> : vector<16x32xf32>
    %58 = tpu.matmul %55, %57, %cst_37 {dimension_numbers = #tpu.dot_dimension_numbers<[1], [0], [0], [1], [0, 0, 1, 1], [], []>} : vector<16x32xbf16>, vector<32x32xbf16>, vector<16x32xf32> -> vector<16x32xf32>
    %59 = vector.extract_strided_slice %1 {offsets = [0, 0], sizes = [1, 32], strides = [1, 1]} : vector<1x96xf32> to vector<1x32xf32>
    %60 = vector.broadcast %59 : vector<1x32xf32> to vector<16x32xf32>
    %61 = arith.addf %58, %60 : vector<16x32xf32>
    %62 = arith.truncf %48 : vector<16x32xf32> to vector<16x32xbf16>
    %63 = vector.extract_strided_slice %0 {offsets = [0, 32], sizes = [32, 64], strides = [1, 1]} : vector<32x96xf32> to vector<32x64xf32>
    %64 = arith.truncf %63 : vector<32x64xf32> to vector<32x64xbf16>
    %cst_38 = arith.constant dense<0.000000e+00> : vector<16x64xf32>
    %65 = tpu.matmul %62, %64, %cst_38 {dimension_numbers = #tpu.dot_dimension_numbers<[1], [0], [0], [1], [0, 0, 1, 1], [], []>} : vector<16x32xbf16>, vector<32x64xbf16>, vector<16x64xf32> -> vector<16x64xf32>
    %66 = vector.extract_strided_slice %1 {offsets = [0, 32], sizes = [1, 64], strides = [1, 1]} : vector<1x96xf32> to vector<1x64xf32>
    %67 = vector.broadcast %66 : vector<1x64xf32> to vector<16x64xf32>
    %68 = arith.addf %65, %67 : vector<16x64xf32>
    %69 = vector.extract_strided_slice %68 {offsets = [0, 0], sizes = [16, 32], strides = [1, 1]} : vector<16x64xf32> to vector<16x32xf32>
    %70 = vector.extract_strided_slice %68 {offsets = [0, 32], sizes = [16, 32], strides = [1, 1]} : vector<16x64xf32> to vector<16x32xf32>
    %71 = vector.shape_cast %61 : vector<16x32xf32> to vector<2x8x32xf32>
    %72 = vector.shape_cast %69 : vector<16x32xf32> to vector<2x8x32xf32>
    %73 = vector.shape_cast %70 : vector<16x32xf32> to vector<2x8x32xf32>
    %74 = vector.extract_strided_slice %71 {offsets = [0, 0, 0], sizes = [2, 8, 8], strides = [1, 1, 1]} : vector<2x8x32xf32> to vector<2x8x8xf32>
    %75 = arith.truncf %74 : vector<2x8x8xf32> to vector<2x8x8xbf16>
    %76 = vector.extract_strided_slice %72 {offsets = [0, 0, 0], sizes = [2, 8, 8], strides = [1, 1, 1]} : vector<2x8x32xf32> to vector<2x8x8xf32>
    %77 = arith.truncf %76 : vector<2x8x8xf32> to vector<2x8x8xbf16>
    %78 = vector.extract_strided_slice %73 {offsets = [0, 0, 0], sizes = [2, 8, 8], strides = [1, 1, 1]} : vector<2x8x32xf32> to vector<2x8x8xf32>
    %79 = arith.truncf %78 : vector<2x8x8xf32> to vector<2x8x8xbf16>
    "tpu.trace_start"() <{level = 10 : i32, message = "bqd,bkd->bqk"}> : () -> ()
    %cst_39 = arith.constant dense<0.000000e+00> : vector<2x8x8xf32>
    %80 = tpu.matmul %75, %77, %cst_39 {dimension_numbers = #tpu.dot_dimension_numbers<[2], [2], [1], [1], [0, 0, 0, 1, 1, 1], [0], [0]>} : vector<2x8x8xbf16>, vector<2x8x8xbf16>, vector<2x8x8xf32> -> vector<2x8x8xf32>
    "tpu.trace_stop"() : () -> ()
    %cst_40 = arith.constant dense<0xFF800000> : vector<2x8xf32>
    %81 = vector.multi_reduction <maximumf>, %80, %cst_40 [2] : vector<2x8x8xf32> to vector<2x8xf32>
    %82 = vector.shape_cast %81 : vector<2x8xf32> to vector<2x8x1xf32>
    %83 = vector.broadcast %82 : vector<2x8x1xf32> to vector<2x8x8xf32>
    %84 = arith.subf %80, %83 : vector<2x8x8xf32>
    %85 = math.exp %84 : vector<2x8x8xf32>
    %cst_41 = arith.constant dense<0.000000e+00> : vector<2x8xf32>
    %86 = vector.multi_reduction <add>, %85, %cst_41 [2] : vector<2x8x8xf32> to vector<2x8xf32>
    %87 = vector.shape_cast %86 : vector<2x8xf32> to vector<2x8x1xf32>
    %88 = vector.broadcast %87 : vector<2x8x1xf32> to vector<2x8x8xf32>
    %89 = arith.divf %85, %88 : vector<2x8x8xf32>
    %90 = arith.truncf %89 : vector<2x8x8xf32> to vector<2x8x8xbf16>
    "tpu.trace_start"() <{level = 10 : i32, message = "bqk,bkd->bqd"}> : () -> ()
    %cst_42 = arith.constant dense<0.000000e+00> : vector<2x8x8xf32>
    %91 = tpu.matmul %90, %79, %cst_42 {dimension_numbers = #tpu.dot_dimension_numbers<[2], [1], [1], [2], [0, 0, 0, 1, 1, 2], [0], [0]>} : vector<2x8x8xbf16>, vector<2x8x8xbf16>, vector<2x8x8xf32> -> vector<2x8x8xf32>
    "tpu.trace_stop"() : () -> ()
    %92 = vector.shape_cast %91 : vector<2x8x8xf32> to vector<16x8xf32>
    %93 = arith.truncf %92 : vector<16x8xf32> to vector<16x8xbf16>
    %94 = vector.extract_strided_slice %2 {offsets = [0, 0], sizes = [8, 32], strides = [1, 1]} : vector<32x32xf32> to vector<8x32xf32>
    %95 = arith.truncf %94 : vector<8x32xf32> to vector<8x32xbf16>
    %cst_43 = arith.constant dense<0.000000e+00> : vector<16x32xf32>
    %96 = tpu.matmul %93, %95, %cst_43 {dimension_numbers = #tpu.dot_dimension_numbers<[1], [0], [0], [1], [0, 0, 1, 1], [], []>} : vector<16x8xbf16>, vector<8x32xbf16>, vector<16x32xf32> -> vector<16x32xf32>
    %97 = vector.extract_strided_slice %71 {offsets = [0, 0, 8], sizes = [2, 8, 8], strides = [1, 1, 1]} : vector<2x8x32xf32> to vector<2x8x8xf32>
    %98 = arith.truncf %97 : vector<2x8x8xf32> to vector<2x8x8xbf16>
    %99 = vector.extract_strided_slice %72 {offsets = [0, 0, 8], sizes = [2, 8, 8], strides = [1, 1, 1]} : vector<2x8x32xf32> to vector<2x8x8xf32>
    %100 = arith.truncf %99 : vector<2x8x8xf32> to vector<2x8x8xbf16>
    %101 = vector.extract_strided_slice %73 {offsets = [0, 0, 8], sizes = [2, 8, 8], strides = [1, 1, 1]} : vector<2x8x32xf32> to vector<2x8x8xf32>
    %102 = arith.truncf %101 : vector<2x8x8xf32> to vector<2x8x8xbf16>
    "tpu.trace_start"() <{level = 10 : i32, message = "bqd,bkd->bqk"}> : () -> ()
    %cst_44 = arith.constant dense<0.000000e+00> : vector<2x8x8xf32>
    %103 = tpu.matmul %98, %100, %cst_44 {dimension_numbers = #tpu.dot_dimension_numbers<[2], [2], [1], [1], [0, 0, 0, 1, 1, 1], [0], [0]>} : vector<2x8x8xbf16>, vector<2x8x8xbf16>, vector<2x8x8xf32> -> vector<2x8x8xf32>
    "tpu.trace_stop"() : () -> ()
    %cst_45 = arith.constant dense<0xFF800000> : vector<2x8xf32>
    %104 = vector.multi_reduction <maximumf>, %103, %cst_45 [2] : vector<2x8x8xf32> to vector<2x8xf32>
    %105 = vector.shape_cast %104 : vector<2x8xf32> to vector<2x8x1xf32>
    %106 = vector.broadcast %105 : vector<2x8x1xf32> to vector<2x8x8xf32>
    %107 = arith.subf %103, %106 : vector<2x8x8xf32>
    %108 = math.exp %107 : vector<2x8x8xf32>
    %cst_46 = arith.constant dense<0.000000e+00> : vector<2x8xf32>
    %109 = vector.multi_reduction <add>, %108, %cst_46 [2] : vector<2x8x8xf32> to vector<2x8xf32>
    %110 = vector.shape_cast %109 : vector<2x8xf32> to vector<2x8x1xf32>
    %111 = vector.broadcast %110 : vector<2x8x1xf32> to vector<2x8x8xf32>
    %112 = arith.divf %108, %111 : vector<2x8x8xf32>
    %113 = arith.truncf %112 : vector<2x8x8xf32> to vector<2x8x8xbf16>
    "tpu.trace_start"() <{level = 10 : i32, message = "bqk,bkd->bqd"}> : () -> ()
    %cst_47 = arith.constant dense<0.000000e+00> : vector<2x8x8xf32>
    %114 = tpu.matmul %113, %102, %cst_47 {dimension_numbers = #tpu.dot_dimension_numbers<[2], [1], [1], [2], [0, 0, 0, 1, 1, 2], [0], [0]>} : vector<2x8x8xbf16>, vector<2x8x8xbf16>, vector<2x8x8xf32> -> vector<2x8x8xf32>
    "tpu.trace_stop"() : () -> ()
    %115 = vector.shape_cast %114 : vector<2x8x8xf32> to vector<16x8xf32>
    %116 = arith.truncf %115 : vector<16x8xf32> to vector<16x8xbf16>
    %117 = vector.extract_strided_slice %2 {offsets = [8, 0], sizes = [8, 32], strides = [1, 1]} : vector<32x32xf32> to vector<8x32xf32>
    %118 = arith.truncf %117 : vector<8x32xf32> to vector<8x32xbf16>
    %cst_48 = arith.constant dense<0.000000e+00> : vector<16x32xf32>
    %119 = tpu.matmul %116, %118, %cst_48 {dimension_numbers = #tpu.dot_dimension_numbers<[1], [0], [0], [1], [0, 0, 1, 1], [], []>} : vector<16x8xbf16>, vector<8x32xbf16>, vector<16x32xf32> -> vector<16x32xf32>
    %120 = arith.addf %96, %119 : vector<16x32xf32>
    %121 = vector.extract_strided_slice %71 {offsets = [0, 0, 16], sizes = [2, 8, 8], strides = [1, 1, 1]} : vector<2x8x32xf32> to vector<2x8x8xf32>
    %122 = arith.truncf %121 : vector<2x8x8xf32> to vector<2x8x8xbf16>
    %123 = vector.extract_strided_slice %72 {offsets = [0, 0, 16], sizes = [2, 8, 8], strides = [1, 1, 1]} : vector<2x8x32xf32> to vector<2x8x8xf32>
    %124 = arith.truncf %123 : vector<2x8x8xf32> to vector<2x8x8xbf16>
    %125 = vector.extract_strided_slice %73 {offsets = [0, 0, 16], sizes = [2, 8, 8], strides = [1, 1, 1]} : vector<2x8x32xf32> to vector<2x8x8xf32>
    %126 = arith.truncf %125 : vector<2x8x8xf32> to vector<2x8x8xbf16>
    "tpu.trace_start"() <{level = 10 : i32, message = "bqd,bkd->bqk"}> : () -> ()
    %cst_49 = arith.constant dense<0.000000e+00> : vector<2x8x8xf32>
    %127 = tpu.matmul %122, %124, %cst_49 {dimension_numbers = #tpu.dot_dimension_numbers<[2], [2], [1], [1], [0, 0, 0, 1, 1, 1], [0], [0]>} : vector<2x8x8xbf16>, vector<2x8x8xbf16>, vector<2x8x8xf32> -> vector<2x8x8xf32>
    "tpu.trace_stop"() : () -> ()
    %cst_50 = arith.constant dense<0xFF800000> : vector<2x8xf32>
    %128 = vector.multi_reduction <maximumf>, %127, %cst_50 [2] : vector<2x8x8xf32> to vector<2x8xf32>
    %129 = vector.shape_cast %128 : vector<2x8xf32> to vector<2x8x1xf32>
    %130 = vector.broadcast %129 : vector<2x8x1xf32> to vector<2x8x8xf32>
    %131 = arith.subf %127, %130 : vector<2x8x8xf32>
    %132 = math.exp %131 : vector<2x8x8xf32>
    %cst_51 = arith.constant dense<0.000000e+00> : vector<2x8xf32>
    %133 = vector.multi_reduction <add>, %132, %cst_51 [2] : vector<2x8x8xf32> to vector<2x8xf32>
    %134 = vector.shape_cast %133 : vector<2x8xf32> to vector<2x8x1xf32>
    %135 = vector.broadcast %134 : vector<2x8x1xf32> to vector<2x8x8xf32>
    %136 = arith.divf %132, %135 : vector<2x8x8xf32>
    %137 = arith.truncf %136 : vector<2x8x8xf32> to vector<2x8x8xbf16>
    "tpu.trace_start"() <{level = 10 : i32, message = "bqk,bkd->bqd"}> : () -> ()
    %cst_52 = arith.constant dense<0.000000e+00> : vector<2x8x8xf32>
    %138 = tpu.matmul %137, %126, %cst_52 {dimension_numbers = #tpu.dot_dimension_numbers<[2], [1], [1], [2], [0, 0, 0, 1, 1, 2], [0], [0]>} : vector<2x8x8xbf16>, vector<2x8x8xbf16>, vector<2x8x8xf32> -> vector<2x8x8xf32>
    "tpu.trace_stop"() : () -> ()
    %139 = vector.shape_cast %138 : vector<2x8x8xf32> to vector<16x8xf32>
    %140 = arith.truncf %139 : vector<16x8xf32> to vector<16x8xbf16>
    %141 = vector.extract_strided_slice %2 {offsets = [16, 0], sizes = [8, 32], strides = [1, 1]} : vector<32x32xf32> to vector<8x32xf32>
    %142 = arith.truncf %141 : vector<8x32xf32> to vector<8x32xbf16>
    %cst_53 = arith.constant dense<0.000000e+00> : vector<16x32xf32>
    %143 = tpu.matmul %140, %142, %cst_53 {dimension_numbers = #tpu.dot_dimension_numbers<[1], [0], [0], [1], [0, 0, 1, 1], [], []>} : vector<16x8xbf16>, vector<8x32xbf16>, vector<16x32xf32> -> vector<16x32xf32>
    %144 = arith.addf %120, %143 : vector<16x32xf32>
    %145 = vector.extract_strided_slice %71 {offsets = [0, 0, 24], sizes = [2, 8, 8], strides = [1, 1, 1]} : vector<2x8x32xf32> to vector<2x8x8xf32>
    %146 = arith.truncf %145 : vector<2x8x8xf32> to vector<2x8x8xbf16>
    %147 = vector.extract_strided_slice %72 {offsets = [0, 0, 24], sizes = [2, 8, 8], strides = [1, 1, 1]} : vector<2x8x32xf32> to vector<2x8x8xf32>
    %148 = arith.truncf %147 : vector<2x8x8xf32> to vector<2x8x8xbf16>
    %149 = vector.extract_strided_slice %73 {offsets = [0, 0, 24], sizes = [2, 8, 8], strides = [1, 1, 1]} : vector<2x8x32xf32> to vector<2x8x8xf32>
    %150 = arith.truncf %149 : vector<2x8x8xf32> to vector<2x8x8xbf16>
    "tpu.trace_start"() <{level = 10 : i32, message = "bqd,bkd->bqk"}> : () -> ()
    %cst_54 = arith.constant dense<0.000000e+00> : vector<2x8x8xf32>
    %151 = tpu.matmul %146, %148, %cst_54 {dimension_numbers = #tpu.dot_dimension_numbers<[2], [2], [1], [1], [0, 0, 0, 1, 1, 1], [0], [0]>} : vector<2x8x8xbf16>, vector<2x8x8xbf16>, vector<2x8x8xf32> -> vector<2x8x8xf32>
    "tpu.trace_stop"() : () -> ()
    %cst_55 = arith.constant dense<0xFF800000> : vector<2x8xf32>
    %152 = vector.multi_reduction <maximumf>, %151, %cst_55 [2] : vector<2x8x8xf32> to vector<2x8xf32>
    %153 = vector.shape_cast %152 : vector<2x8xf32> to vector<2x8x1xf32>
    %154 = vector.broadcast %153 : vector<2x8x1xf32> to vector<2x8x8xf32>
    %155 = arith.subf %151, %154 : vector<2x8x8xf32>
    %156 = math.exp %155 : vector<2x8x8xf32>
    %cst_56 = arith.constant dense<0.000000e+00> : vector<2x8xf32>
    %157 = vector.multi_reduction <add>, %156, %cst_56 [2] : vector<2x8x8xf32> to vector<2x8xf32>
    %158 = vector.shape_cast %157 : vector<2x8xf32> to vector<2x8x1xf32>
    %159 = vector.broadcast %158 : vector<2x8x1xf32> to vector<2x8x8xf32>
    %160 = arith.divf %156, %159 : vector<2x8x8xf32>
    %161 = arith.truncf %160 : vector<2x8x8xf32> to vector<2x8x8xbf16>
    "tpu.trace_start"() <{level = 10 : i32, message = "bqk,bkd->bqd"}> : () -> ()
    %cst_57 = arith.constant dense<0.000000e+00> : vector<2x8x8xf32>
    %162 = tpu.matmul %161, %150, %cst_57 {dimension_numbers = #tpu.dot_dimension_numbers<[2], [1], [1], [2], [0, 0, 0, 1, 1, 2], [0], [0]>} : vector<2x8x8xbf16>, vector<2x8x8xbf16>, vector<2x8x8xf32> -> vector<2x8x8xf32>
    "tpu.trace_stop"() : () -> ()
    %163 = vector.shape_cast %162 : vector<2x8x8xf32> to vector<16x8xf32>
    %164 = arith.truncf %163 : vector<16x8xf32> to vector<16x8xbf16>
    %165 = vector.extract_strided_slice %2 {offsets = [24, 0], sizes = [8, 32], strides = [1, 1]} : vector<32x32xf32> to vector<8x32xf32>
    %166 = arith.truncf %165 : vector<8x32xf32> to vector<8x32xbf16>
    %cst_58 = arith.constant dense<0.000000e+00> : vector<16x32xf32>
    %167 = tpu.matmul %164, %166, %cst_58 {dimension_numbers = #tpu.dot_dimension_numbers<[1], [0], [0], [1], [0, 0, 1, 1], [], []>} : vector<16x8xbf16>, vector<8x32xbf16>, vector<16x32xf32> -> vector<16x32xf32>
    %168 = arith.addf %144, %167 : vector<16x32xf32>
    %169 = vector.broadcast %3 : vector<1x32xf32> to vector<16x32xf32>
    %170 = arith.addf %168, %169 : vector<16x32xf32>
    %171 = arith.addf %48, %170 : vector<16x32xf32>
    %cst_59 = arith.constant dense<0.000000e+00> : vector<16xf32>
    %172 = vector.multi_reduction <add>, %171, %cst_59 [1] : vector<16x32xf32> to vector<16xf32>
    %173 = vector.shape_cast %172 : vector<16xf32> to vector<16x1xf32>
    %cst_60 = arith.constant 3.200000e+01 : f32
    %174 = vector.broadcast %cst_60 : f32 to vector<16x1xf32>
    %175 = arith.divf %173, %174 : vector<16x1xf32>
    %176 = vector.broadcast %175 : vector<16x1xf32> to vector<16x32xf32>
    %177 = arith.subf %171, %176 : vector<16x32xf32>
    %178 = arith.mulf %177, %177 : vector<16x32xf32>
    %cst_61 = arith.constant dense<0.000000e+00> : vector<16xf32>
    %179 = vector.multi_reduction <add>, %178, %cst_61 [1] : vector<16x32xf32> to vector<16xf32>
    %180 = vector.shape_cast %179 : vector<16xf32> to vector<16x1xf32>
    %cst_62 = arith.constant 3.200000e+01 : f32
    %181 = vector.broadcast %cst_62 : f32 to vector<16x1xf32>
    %182 = arith.divf %180, %181 : vector<16x1xf32>
    %cst_63 = arith.constant 9.99999974E-6 : f32
    %183 = vector.broadcast %cst_63 : f32 to vector<16x1xf32>
    %184 = arith.addf %182, %183 : vector<16x1xf32>
    %185 = math.rsqrt %184 : vector<16x1xf32>
    %186 = vector.broadcast %185 : vector<16x1xf32> to vector<16x32xf32>
    %187 = arith.mulf %177, %186 : vector<16x32xf32>
    %188 = vector.broadcast %4 : vector<1x32xf32> to vector<16x32xf32>
    %189 = arith.mulf %187, %188 : vector<16x32xf32>
    %190 = vector.broadcast %5 : vector<1x32xf32> to vector<16x32xf32>
    %191 = arith.addf %189, %190 : vector<16x32xf32>
    %192 = arith.truncf %191 : vector<16x32xf32> to vector<16x32xbf16>
    %193 = arith.truncf %6 : vector<32x64xf32> to vector<32x64xbf16>
    %cst_64 = arith.constant dense<0.000000e+00> : vector<16x64xf32>
    %194 = tpu.matmul %192, %193, %cst_64 {dimension_numbers = #tpu.dot_dimension_numbers<[1], [0], [0], [1], [0, 0, 1, 1], [], []>} : vector<16x32xbf16>, vector<32x64xbf16>, vector<16x64xf32> -> vector<16x64xf32>
    %195 = vector.broadcast %7 : vector<1x64xf32> to vector<16x64xf32>
    %196 = arith.addf %194, %195 : vector<16x64xf32>
    %cst_65 = arith.constant 0.000000e+00 : f32
    %197 = vector.broadcast %cst_65 : f32 to vector<16x64xf32>
    %198 = arith.maximumf %196, %197 : vector<16x64xf32>
    %199 = arith.truncf %198 : vector<16x64xf32> to vector<16x64xbf16>
    %200 = arith.truncf %8 : vector<64x32xf32> to vector<64x32xbf16>
    %cst_66 = arith.constant dense<0.000000e+00> : vector<16x32xf32>
    %201 = tpu.matmul %199, %200, %cst_66 {dimension_numbers = #tpu.dot_dimension_numbers<[1], [0], [0], [1], [0, 0, 1, 1], [], []>} : vector<16x64xbf16>, vector<64x32xbf16>, vector<16x32xf32> -> vector<16x32xf32>
    %202 = vector.broadcast %9 : vector<1x32xf32> to vector<16x32xf32>
    %203 = arith.addf %201, %202 : vector<16x32xf32>
    %204 = arith.addf %191, %203 : vector<16x32xf32>
    %cst_67 = arith.constant dense<0.000000e+00> : vector<16xf32>
    %205 = vector.multi_reduction <add>, %204, %cst_67 [1] : vector<16x32xf32> to vector<16xf32>
    %206 = vector.shape_cast %205 : vector<16xf32> to vector<16x1xf32>
    %cst_68 = arith.constant 3.200000e+01 : f32
    %207 = vector.broadcast %cst_68 : f32 to vector<16x1xf32>
    %208 = arith.divf %206, %207 : vector<16x1xf32>
    %209 = vector.broadcast %208 : vector<16x1xf32> to vector<16x32xf32>
    %210 = arith.subf %204, %209 : vector<16x32xf32>
    %211 = arith.mulf %210, %210 : vector<16x32xf32>
    %cst_69 = arith.constant dense<0.000000e+00> : vector<16xf32>
    %212 = vector.multi_reduction <add>, %211, %cst_69 [1] : vector<16x32xf32> to vector<16xf32>
    %213 = vector.shape_cast %212 : vector<16xf32> to vector<16x1xf32>
    %cst_70 = arith.constant 3.200000e+01 : f32
    %214 = vector.broadcast %cst_70 : f32 to vector<16x1xf32>
    %215 = arith.divf %213, %214 : vector<16x1xf32>
    %cst_71 = arith.constant 9.99999974E-6 : f32
    %216 = vector.broadcast %cst_71 : f32 to vector<16x1xf32>
    %217 = arith.addf %215, %216 : vector<16x1xf32>
    %218 = math.rsqrt %217 : vector<16x1xf32>
    %219 = vector.broadcast %218 : vector<16x1xf32> to vector<16x32xf32>
    %220 = arith.mulf %210, %219 : vector<16x32xf32>
    %221 = vector.broadcast %10 : vector<1x32xf32> to vector<16x32xf32>
    %222 = arith.mulf %220, %221 : vector<16x32xf32>
    %223 = vector.broadcast %11 : vector<1x32xf32> to vector<16x32xf32>
    %224 = arith.addf %222, %223 : vector<16x32xf32>
    %225 = arith.truncf %48 : vector<16x32xf32> to vector<16x32xbf16>
    %226 = vector.extract_strided_slice %12 {offsets = [0, 0], sizes = [32, 32], strides = [1, 1]} : vector<32x96xf32> to vector<32x32xf32>
    %227 = arith.truncf %226 : vector<32x32xf32> to vector<32x32xbf16>
    %cst_72 = arith.constant dense<0.000000e+00> : vector<16x32xf32>
    %228 = tpu.matmul %225, %227, %cst_72 {dimension_numbers = #tpu.dot_dimension_numbers<[1], [0], [0], [1], [0, 0, 1, 1], [], []>} : vector<16x32xbf16>, vector<32x32xbf16>, vector<16x32xf32> -> vector<16x32xf32>
    %229 = vector.extract_strided_slice %13 {offsets = [0, 0], sizes = [1, 32], strides = [1, 1]} : vector<1x96xf32> to vector<1x32xf32>
    %230 = vector.broadcast %229 : vector<1x32xf32> to vector<16x32xf32>
    %231 = arith.addf %228, %230 : vector<16x32xf32>
    %232 = arith.truncf %48 : vector<16x32xf32> to vector<16x32xbf16>
    %233 = vector.extract_strided_slice %12 {offsets = [0, 32], sizes = [32, 64], strides = [1, 1]} : vector<32x96xf32> to vector<32x64xf32>
    %234 = arith.truncf %233 : vector<32x64xf32> to vector<32x64xbf16>
    %cst_73 = arith.constant dense<0.000000e+00> : vector<16x64xf32>
    %235 = tpu.matmul %232, %234, %cst_73 {dimension_numbers = #tpu.dot_dimension_numbers<[1], [0], [0], [1], [0, 0, 1, 1], [], []>} : vector<16x32xbf16>, vector<32x64xbf16>, vector<16x64xf32> -> vector<16x64xf32>
    %236 = vector.extract_strided_slice %13 {offsets = [0, 32], sizes = [1, 64], strides = [1, 1]} : vector<1x96xf32> to vector<1x64xf32>
    %237 = vector.broadcast %236 : vector<1x64xf32> to vector<16x64xf32>
    %238 = arith.addf %235, %237 : vector<16x64xf32>
    %239 = vector.extract_strided_slice %238 {offsets = [0, 0], sizes = [16, 32], strides = [1, 1]} : vector<16x64xf32> to vector<16x32xf32>
    %240 = vector.extract_strided_slice %238 {offsets = [0, 32], sizes = [16, 32], strides = [1, 1]} : vector<16x64xf32> to vector<16x32xf32>
    %241 = vector.shape_cast %231 : vector<16x32xf32> to vector<2x8x32xf32>
    %242 = vector.shape_cast %239 : vector<16x32xf32> to vector<2x8x32xf32>
    %243 = vector.shape_cast %240 : vector<16x32xf32> to vector<2x8x32xf32>
    %244 = vector.extract_strided_slice %241 {offsets = [0, 0, 0], sizes = [2, 8, 8], strides = [1, 1, 1]} : vector<2x8x32xf32> to vector<2x8x8xf32>
    %245 = arith.truncf %244 : vector<2x8x8xf32> to vector<2x8x8xbf16>
    %246 = vector.extract_strided_slice %242 {offsets = [0, 0, 0], sizes = [2, 8, 8], strides = [1, 1, 1]} : vector<2x8x32xf32> to vector<2x8x8xf32>
    %247 = arith.truncf %246 : vector<2x8x8xf32> to vector<2x8x8xbf16>
    %248 = vector.extract_strided_slice %243 {offsets = [0, 0, 0], sizes = [2, 8, 8], strides = [1, 1, 1]} : vector<2x8x32xf32> to vector<2x8x8xf32>
    %249 = arith.truncf %248 : vector<2x8x8xf32> to vector<2x8x8xbf16>
    "tpu.trace_start"() <{level = 10 : i32, message = "bqd,bkd->bqk"}> : () -> ()
    %cst_74 = arith.constant dense<0.000000e+00> : vector<2x8x8xf32>
    %250 = tpu.matmul %245, %247, %cst_74 {dimension_numbers = #tpu.dot_dimension_numbers<[2], [2], [1], [1], [0, 0, 0, 1, 1, 1], [0], [0]>} : vector<2x8x8xbf16>, vector<2x8x8xbf16>, vector<2x8x8xf32> -> vector<2x8x8xf32>
    "tpu.trace_stop"() : () -> ()
    %251 = vector.shape_cast %54 : vector<8x8xf32> to vector<1x8x8xf32>
    %252 = vector.broadcast %251 : vector<1x8x8xf32> to vector<2x8x8xf32>
    %253 = arith.addf %250, %252 : vector<2x8x8xf32>
    %cst_75 = arith.constant dense<0xFF800000> : vector<2x8xf32>
    %254 = vector.multi_reduction <maximumf>, %253, %cst_75 [2] : vector<2x8x8xf32> to vector<2x8xf32>
    %255 = vector.shape_cast %254 : vector<2x8xf32> to vector<2x8x1xf32>
    %256 = vector.broadcast %255 : vector<2x8x1xf32> to vector<2x8x8xf32>
    %257 = arith.subf %253, %256 : vector<2x8x8xf32>
    %258 = math.exp %257 : vector<2x8x8xf32>
    %cst_76 = arith.constant dense<0.000000e+00> : vector<2x8xf32>
    %259 = vector.multi_reduction <add>, %258, %cst_76 [2] : vector<2x8x8xf32> to vector<2x8xf32>
    %260 = vector.shape_cast %259 : vector<2x8xf32> to vector<2x8x1xf32>
    %261 = vector.broadcast %260 : vector<2x8x1xf32> to vector<2x8x8xf32>
    %262 = arith.divf %258, %261 : vector<2x8x8xf32>
    %263 = arith.truncf %262 : vector<2x8x8xf32> to vector<2x8x8xbf16>
    "tpu.trace_start"() <{level = 10 : i32, message = "bqk,bkd->bqd"}> : () -> ()
    %cst_77 = arith.constant dense<0.000000e+00> : vector<2x8x8xf32>
    %264 = tpu.matmul %263, %249, %cst_77 {dimension_numbers = #tpu.dot_dimension_numbers<[2], [1], [1], [2], [0, 0, 0, 1, 1, 2], [0], [0]>} : vector<2x8x8xbf16>, vector<2x8x8xbf16>, vector<2x8x8xf32> -> vector<2x8x8xf32>
    "tpu.trace_stop"() : () -> ()
    %265 = vector.shape_cast %264 : vector<2x8x8xf32> to vector<16x8xf32>
    %266 = arith.truncf %265 : vector<16x8xf32> to vector<16x8xbf16>
    %267 = vector.extract_strided_slice %14 {offsets = [0, 0], sizes = [8, 32], strides = [1, 1]} : vector<32x32xf32> to vector<8x32xf32>
    %268 = arith.truncf %267 : vector<8x32xf32> to vector<8x32xbf16>
    %cst_78 = arith.constant dense<0.000000e+00> : vector<16x32xf32>
    %269 = tpu.matmul %266, %268, %cst_78 {dimension_numbers = #tpu.dot_dimension_numbers<[1], [0], [0], [1], [0, 0, 1, 1], [], []>} : vector<16x8xbf16>, vector<8x32xbf16>, vector<16x32xf32> -> vector<16x32xf32>
    %270 = vector.extract_strided_slice %241 {offsets = [0, 0, 8], sizes = [2, 8, 8], strides = [1, 1, 1]} : vector<2x8x32xf32> to vector<2x8x8xf32>
    %271 = arith.truncf %270 : vector<2x8x8xf32> to vector<2x8x8xbf16>
    %272 = vector.extract_strided_slice %242 {offsets = [0, 0, 8], sizes = [2, 8, 8], strides = [1, 1, 1]} : vector<2x8x32xf32> to vector<2x8x8xf32>
    %273 = arith.truncf %272 : vector<2x8x8xf32> to vector<2x8x8xbf16>
    %274 = vector.extract_strided_slice %243 {offsets = [0, 0, 8], sizes = [2, 8, 8], strides = [1, 1, 1]} : vector<2x8x32xf32> to vector<2x8x8xf32>
    %275 = arith.truncf %274 : vector<2x8x8xf32> to vector<2x8x8xbf16>
    "tpu.trace_start"() <{level = 10 : i32, message = "bqd,bkd->bqk"}> : () -> ()
    %cst_79 = arith.constant dense<0.000000e+00> : vector<2x8x8xf32>
    %276 = tpu.matmul %271, %273, %cst_79 {dimension_numbers = #tpu.dot_dimension_numbers<[2], [2], [1], [1], [0, 0, 0, 1, 1, 1], [0], [0]>} : vector<2x8x8xbf16>, vector<2x8x8xbf16>, vector<2x8x8xf32> -> vector<2x8x8xf32>
    "tpu.trace_stop"() : () -> ()
    %277 = vector.shape_cast %54 : vector<8x8xf32> to vector<1x8x8xf32>
    %278 = vector.broadcast %277 : vector<1x8x8xf32> to vector<2x8x8xf32>
    %279 = arith.addf %276, %278 : vector<2x8x8xf32>
    %cst_80 = arith.constant dense<0xFF800000> : vector<2x8xf32>
    %280 = vector.multi_reduction <maximumf>, %279, %cst_80 [2] : vector<2x8x8xf32> to vector<2x8xf32>
    %281 = vector.shape_cast %280 : vector<2x8xf32> to vector<2x8x1xf32>
    %282 = vector.broadcast %281 : vector<2x8x1xf32> to vector<2x8x8xf32>
    %283 = arith.subf %279, %282 : vector<2x8x8xf32>
    %284 = math.exp %283 : vector<2x8x8xf32>
    %cst_81 = arith.constant dense<0.000000e+00> : vector<2x8xf32>
    %285 = vector.multi_reduction <add>, %284, %cst_81 [2] : vector<2x8x8xf32> to vector<2x8xf32>
    %286 = vector.shape_cast %285 : vector<2x8xf32> to vector<2x8x1xf32>
    %287 = vector.broadcast %286 : vector<2x8x1xf32> to vector<2x8x8xf32>
    %288 = arith.divf %284, %287 : vector<2x8x8xf32>
    %289 = arith.truncf %288 : vector<2x8x8xf32> to vector<2x8x8xbf16>
    "tpu.trace_start"() <{level = 10 : i32, message = "bqk,bkd->bqd"}> : () -> ()
    %cst_82 = arith.constant dense<0.000000e+00> : vector<2x8x8xf32>
    %290 = tpu.matmul %289, %275, %cst_82 {dimension_numbers = #tpu.dot_dimension_numbers<[2], [1], [1], [2], [0, 0, 0, 1, 1, 2], [0], [0]>} : vector<2x8x8xbf16>, vector<2x8x8xbf16>, vector<2x8x8xf32> -> vector<2x8x8xf32>
    "tpu.trace_stop"() : () -> ()
    %291 = vector.shape_cast %290 : vector<2x8x8xf32> to vector<16x8xf32>
    %292 = arith.truncf %291 : vector<16x8xf32> to vector<16x8xbf16>
    %293 = vector.extract_strided_slice %14 {offsets = [8, 0], sizes = [8, 32], strides = [1, 1]} : vector<32x32xf32> to vector<8x32xf32>
    %294 = arith.truncf %293 : vector<8x32xf32> to vector<8x32xbf16>
    %cst_83 = arith.constant dense<0.000000e+00> : vector<16x32xf32>
    %295 = tpu.matmul %292, %294, %cst_83 {dimension_numbers = #tpu.dot_dimension_numbers<[1], [0], [0], [1], [0, 0, 1, 1], [], []>} : vector<16x8xbf16>, vector<8x32xbf16>, vector<16x32xf32> -> vector<16x32xf32>
    %296 = arith.addf %269, %295 : vector<16x32xf32>
    %297 = vector.extract_strided_slice %241 {offsets = [0, 0, 16], sizes = [2, 8, 8], strides = [1, 1, 1]} : vector<2x8x32xf32> to vector<2x8x8xf32>
    %298 = arith.truncf %297 : vector<2x8x8xf32> to vector<2x8x8xbf16>
    %299 = vector.extract_strided_slice %242 {offsets = [0, 0, 16], sizes = [2, 8, 8], strides = [1, 1, 1]} : vector<2x8x32xf32> to vector<2x8x8xf32>
    %300 = arith.truncf %299 : vector<2x8x8xf32> to vector<2x8x8xbf16>
    %301 = vector.extract_strided_slice %243 {offsets = [0, 0, 16], sizes = [2, 8, 8], strides = [1, 1, 1]} : vector<2x8x32xf32> to vector<2x8x8xf32>
    %302 = arith.truncf %301 : vector<2x8x8xf32> to vector<2x8x8xbf16>
    "tpu.trace_start"() <{level = 10 : i32, message = "bqd,bkd->bqk"}> : () -> ()
    %cst_84 = arith.constant dense<0.000000e+00> : vector<2x8x8xf32>
    %303 = tpu.matmul %298, %300, %cst_84 {dimension_numbers = #tpu.dot_dimension_numbers<[2], [2], [1], [1], [0, 0, 0, 1, 1, 1], [0], [0]>} : vector<2x8x8xbf16>, vector<2x8x8xbf16>, vector<2x8x8xf32> -> vector<2x8x8xf32>
    "tpu.trace_stop"() : () -> ()
    %304 = vector.shape_cast %54 : vector<8x8xf32> to vector<1x8x8xf32>
    %305 = vector.broadcast %304 : vector<1x8x8xf32> to vector<2x8x8xf32>
    %306 = arith.addf %303, %305 : vector<2x8x8xf32>
    %cst_85 = arith.constant dense<0xFF800000> : vector<2x8xf32>
    %307 = vector.multi_reduction <maximumf>, %306, %cst_85 [2] : vector<2x8x8xf32> to vector<2x8xf32>
    %308 = vector.shape_cast %307 : vector<2x8xf32> to vector<2x8x1xf32>
    %309 = vector.broadcast %308 : vector<2x8x1xf32> to vector<2x8x8xf32>
    %310 = arith.subf %306, %309 : vector<2x8x8xf32>
    %311 = math.exp %310 : vector<2x8x8xf32>
    %cst_86 = arith.constant dense<0.000000e+00> : vector<2x8xf32>
    %312 = vector.multi_reduction <add>, %311, %cst_86 [2] : vector<2x8x8xf32> to vector<2x8xf32>
    %313 = vector.shape_cast %312 : vector<2x8xf32> to vector<2x8x1xf32>
    %314 = vector.broadcast %313 : vector<2x8x1xf32> to vector<2x8x8xf32>
    %315 = arith.divf %311, %314 : vector<2x8x8xf32>
    %316 = arith.truncf %315 : vector<2x8x8xf32> to vector<2x8x8xbf16>
    "tpu.trace_start"() <{level = 10 : i32, message = "bqk,bkd->bqd"}> : () -> ()
    %cst_87 = arith.constant dense<0.000000e+00> : vector<2x8x8xf32>
    %317 = tpu.matmul %316, %302, %cst_87 {dimension_numbers = #tpu.dot_dimension_numbers<[2], [1], [1], [2], [0, 0, 0, 1, 1, 2], [0], [0]>} : vector<2x8x8xbf16>, vector<2x8x8xbf16>, vector<2x8x8xf32> -> vector<2x8x8xf32>
    "tpu.trace_stop"() : () -> ()
    %318 = vector.shape_cast %317 : vector<2x8x8xf32> to vector<16x8xf32>
    %319 = arith.truncf %318 : vector<16x8xf32> to vector<16x8xbf16>
    %320 = vector.extract_strided_slice %14 {offsets = [16, 0], sizes = [8, 32], strides = [1, 1]} : vector<32x32xf32> to vector<8x32xf32>
    %321 = arith.truncf %320 : vector<8x32xf32> to vector<8x32xbf16>
    %cst_88 = arith.constant dense<0.000000e+00> : vector<16x32xf32>
    %322 = tpu.matmul %319, %321, %cst_88 {dimension_numbers = #tpu.dot_dimension_numbers<[1], [0], [0], [1], [0, 0, 1, 1], [], []>} : vector<16x8xbf16>, vector<8x32xbf16>, vector<16x32xf32> -> vector<16x32xf32>
    %323 = arith.addf %296, %322 : vector<16x32xf32>
    %324 = vector.extract_strided_slice %241 {offsets = [0, 0, 24], sizes = [2, 8, 8], strides = [1, 1, 1]} : vector<2x8x32xf32> to vector<2x8x8xf32>
    %325 = arith.truncf %324 : vector<2x8x8xf32> to vector<2x8x8xbf16>
    %326 = vector.extract_strided_slice %242 {offsets = [0, 0, 24], sizes = [2, 8, 8], strides = [1, 1, 1]} : vector<2x8x32xf32> to vector<2x8x8xf32>
    %327 = arith.truncf %326 : vector<2x8x8xf32> to vector<2x8x8xbf16>
    %328 = vector.extract_strided_slice %243 {offsets = [0, 0, 24], sizes = [2, 8, 8], strides = [1, 1, 1]} : vector<2x8x32xf32> to vector<2x8x8xf32>
    %329 = arith.truncf %328 : vector<2x8x8xf32> to vector<2x8x8xbf16>
    "tpu.trace_start"() <{level = 10 : i32, message = "bqd,bkd->bqk"}> : () -> ()
    %cst_89 = arith.constant dense<0.000000e+00> : vector<2x8x8xf32>
    %330 = tpu.matmul %325, %327, %cst_89 {dimension_numbers = #tpu.dot_dimension_numbers<[2], [2], [1], [1], [0, 0, 0, 1, 1, 1], [0], [0]>} : vector<2x8x8xbf16>, vector<2x8x8xbf16>, vector<2x8x8xf32> -> vector<2x8x8xf32>
    "tpu.trace_stop"() : () -> ()
    %331 = vector.shape_cast %54 : vector<8x8xf32> to vector<1x8x8xf32>
    %332 = vector.broadcast %331 : vector<1x8x8xf32> to vector<2x8x8xf32>
    %333 = arith.addf %330, %332 : vector<2x8x8xf32>
    %cst_90 = arith.constant dense<0xFF800000> : vector<2x8xf32>
    %334 = vector.multi_reduction <maximumf>, %333, %cst_90 [2] : vector<2x8x8xf32> to vector<2x8xf32>
    %335 = vector.shape_cast %334 : vector<2x8xf32> to vector<2x8x1xf32>
    %336 = vector.broadcast %335 : vector<2x8x1xf32> to vector<2x8x8xf32>
    %337 = arith.subf %333, %336 : vector<2x8x8xf32>
    %338 = math.exp %337 : vector<2x8x8xf32>
    %cst_91 = arith.constant dense<0.000000e+00> : vector<2x8xf32>
    %339 = vector.multi_reduction <add>, %338, %cst_91 [2] : vector<2x8x8xf32> to vector<2x8xf32>
    %340 = vector.shape_cast %339 : vector<2x8xf32> to vector<2x8x1xf32>
    %341 = vector.broadcast %340 : vector<2x8x1xf32> to vector<2x8x8xf32>
    %342 = arith.divf %338, %341 : vector<2x8x8xf32>
    %343 = arith.truncf %342 : vector<2x8x8xf32> to vector<2x8x8xbf16>
    "tpu.trace_start"() <{level = 10 : i32, message = "bqk,bkd->bqd"}> : () -> ()
    %cst_92 = arith.constant dense<0.000000e+00> : vector<2x8x8xf32>
    %344 = tpu.matmul %343, %329, %cst_92 {dimension_numbers = #tpu.dot_dimension_numbers<[2], [1], [1], [2], [0, 0, 0, 1, 1, 2], [0], [0]>} : vector<2x8x8xbf16>, vector<2x8x8xbf16>, vector<2x8x8xf32> -> vector<2x8x8xf32>
    "tpu.trace_stop"() : () -> ()
    %345 = vector.shape_cast %344 : vector<2x8x8xf32> to vector<16x8xf32>
    %346 = arith.truncf %345 : vector<16x8xf32> to vector<16x8xbf16>
    %347 = vector.extract_strided_slice %14 {offsets = [24, 0], sizes = [8, 32], strides = [1, 1]} : vector<32x32xf32> to vector<8x32xf32>
    %348 = arith.truncf %347 : vector<8x32xf32> to vector<8x32xbf16>
    %cst_93 = arith.constant dense<0.000000e+00> : vector<16x32xf32>
    %349 = tpu.matmul %346, %348, %cst_93 {dimension_numbers = #tpu.dot_dimension_numbers<[1], [0], [0], [1], [0, 0, 1, 1], [], []>} : vector<16x8xbf16>, vector<8x32xbf16>, vector<16x32xf32> -> vector<16x32xf32>
    %350 = arith.addf %323, %349 : vector<16x32xf32>
    %351 = vector.broadcast %15 : vector<1x32xf32> to vector<16x32xf32>
    %352 = arith.addf %350, %351 : vector<16x32xf32>
    %353 = arith.addf %48, %352 : vector<16x32xf32>
    %cst_94 = arith.constant dense<0.000000e+00> : vector<16xf32>
    %354 = vector.multi_reduction <add>, %353, %cst_94 [1] : vector<16x32xf32> to vector<16xf32>
    %355 = vector.shape_cast %354 : vector<16xf32> to vector<16x1xf32>
    %cst_95 = arith.constant 3.200000e+01 : f32
    %356 = vector.broadcast %cst_95 : f32 to vector<16x1xf32>
    %357 = arith.divf %355, %356 : vector<16x1xf32>
    %358 = vector.broadcast %357 : vector<16x1xf32> to vector<16x32xf32>
    %359 = arith.subf %353, %358 : vector<16x32xf32>
    %360 = arith.mulf %359, %359 : vector<16x32xf32>
    %cst_96 = arith.constant dense<0.000000e+00> : vector<16xf32>
    %361 = vector.multi_reduction <add>, %360, %cst_96 [1] : vector<16x32xf32> to vector<16xf32>
    %362 = vector.shape_cast %361 : vector<16xf32> to vector<16x1xf32>
    %cst_97 = arith.constant 3.200000e+01 : f32
    %363 = vector.broadcast %cst_97 : f32 to vector<16x1xf32>
    %364 = arith.divf %362, %363 : vector<16x1xf32>
    %cst_98 = arith.constant 9.99999974E-6 : f32
    %365 = vector.broadcast %cst_98 : f32 to vector<16x1xf32>
    %366 = arith.addf %364, %365 : vector<16x1xf32>
    %367 = math.rsqrt %366 : vector<16x1xf32>
    %368 = vector.broadcast %367 : vector<16x1xf32> to vector<16x32xf32>
    %369 = arith.mulf %359, %368 : vector<16x32xf32>
    %370 = vector.broadcast %16 : vector<1x32xf32> to vector<16x32xf32>
    %371 = arith.mulf %369, %370 : vector<16x32xf32>
    %372 = vector.broadcast %17 : vector<1x32xf32> to vector<16x32xf32>
    %373 = arith.addf %371, %372 : vector<16x32xf32>
    %374 = arith.truncf %373 : vector<16x32xf32> to vector<16x32xbf16>
    %375 = vector.extract_strided_slice %18 {offsets = [0, 0], sizes = [32, 32], strides = [1, 1]} : vector<32x96xf32> to vector<32x32xf32>
    %376 = arith.truncf %375 : vector<32x32xf32> to vector<32x32xbf16>
    %cst_99 = arith.constant dense<0.000000e+00> : vector<16x32xf32>
    %377 = tpu.matmul %374, %376, %cst_99 {dimension_numbers = #tpu.dot_dimension_numbers<[1], [0], [0], [1], [0, 0, 1, 1], [], []>} : vector<16x32xbf16>, vector<32x32xbf16>, vector<16x32xf32> -> vector<16x32xf32>
    %378 = vector.extract_strided_slice %19 {offsets = [0, 0], sizes = [1, 32], strides = [1, 1]} : vector<1x96xf32> to vector<1x32xf32>
    %379 = vector.broadcast %378 : vector<1x32xf32> to vector<16x32xf32>
    %380 = arith.addf %377, %379 : vector<16x32xf32>
    %381 = arith.truncf %224 : vector<16x32xf32> to vector<16x32xbf16>
    %382 = vector.extract_strided_slice %18 {offsets = [0, 32], sizes = [32, 64], strides = [1, 1]} : vector<32x96xf32> to vector<32x64xf32>
    %383 = arith.truncf %382 : vector<32x64xf32> to vector<32x64xbf16>
    %cst_100 = arith.constant dense<0.000000e+00> : vector<16x64xf32>
    %384 = tpu.matmul %381, %383, %cst_100 {dimension_numbers = #tpu.dot_dimension_numbers<[1], [0], [0], [1], [0, 0, 1, 1], [], []>} : vector<16x32xbf16>, vector<32x64xbf16>, vector<16x64xf32> -> vector<16x64xf32>
    %385 = vector.extract_strided_slice %19 {offsets = [0, 32], sizes = [1, 64], strides = [1, 1]} : vector<1x96xf32> to vector<1x64xf32>
    %386 = vector.broadcast %385 : vector<1x64xf32> to vector<16x64xf32>
    %387 = arith.addf %384, %386 : vector<16x64xf32>
    %388 = vector.extract_strided_slice %387 {offsets = [0, 0], sizes = [16, 32], strides = [1, 1]} : vector<16x64xf32> to vector<16x32xf32>
    %389 = vector.extract_strided_slice %387 {offsets = [0, 32], sizes = [16, 32], strides = [1, 1]} : vector<16x64xf32> to vector<16x32xf32>
    %390 = vector.shape_cast %380 : vector<16x32xf32> to vector<2x8x32xf32>
    %391 = vector.shape_cast %388 : vector<16x32xf32> to vector<2x8x32xf32>
    %392 = vector.shape_cast %389 : vector<16x32xf32> to vector<2x8x32xf32>
    %393 = vector.extract_strided_slice %390 {offsets = [0, 0, 0], sizes = [2, 8, 8], strides = [1, 1, 1]} : vector<2x8x32xf32> to vector<2x8x8xf32>
    %394 = arith.truncf %393 : vector<2x8x8xf32> to vector<2x8x8xbf16>
    %395 = vector.extract_strided_slice %391 {offsets = [0, 0, 0], sizes = [2, 8, 8], strides = [1, 1, 1]} : vector<2x8x32xf32> to vector<2x8x8xf32>
    %396 = arith.truncf %395 : vector<2x8x8xf32> to vector<2x8x8xbf16>
    %397 = vector.extract_strided_slice %392 {offsets = [0, 0, 0], sizes = [2, 8, 8], strides = [1, 1, 1]} : vector<2x8x32xf32> to vector<2x8x8xf32>
    %398 = arith.truncf %397 : vector<2x8x8xf32> to vector<2x8x8xbf16>
    "tpu.trace_start"() <{level = 10 : i32, message = "bqd,bkd->bqk"}> : () -> ()
    %cst_101 = arith.constant dense<0.000000e+00> : vector<2x8x8xf32>
    %399 = tpu.matmul %394, %396, %cst_101 {dimension_numbers = #tpu.dot_dimension_numbers<[2], [2], [1], [1], [0, 0, 0, 1, 1, 1], [0], [0]>} : vector<2x8x8xbf16>, vector<2x8x8xbf16>, vector<2x8x8xf32> -> vector<2x8x8xf32>
    "tpu.trace_stop"() : () -> ()
    %cst_102 = arith.constant dense<0xFF800000> : vector<2x8xf32>
    %400 = vector.multi_reduction <maximumf>, %399, %cst_102 [2] : vector<2x8x8xf32> to vector<2x8xf32>
    %401 = vector.shape_cast %400 : vector<2x8xf32> to vector<2x8x1xf32>
    %402 = vector.broadcast %401 : vector<2x8x1xf32> to vector<2x8x8xf32>
    %403 = arith.subf %399, %402 : vector<2x8x8xf32>
    %404 = math.exp %403 : vector<2x8x8xf32>
    %cst_103 = arith.constant dense<0.000000e+00> : vector<2x8xf32>
    %405 = vector.multi_reduction <add>, %404, %cst_103 [2] : vector<2x8x8xf32> to vector<2x8xf32>
    %406 = vector.shape_cast %405 : vector<2x8xf32> to vector<2x8x1xf32>
    %407 = vector.broadcast %406 : vector<2x8x1xf32> to vector<2x8x8xf32>
    %408 = arith.divf %404, %407 : vector<2x8x8xf32>
    %409 = arith.truncf %408 : vector<2x8x8xf32> to vector<2x8x8xbf16>
    "tpu.trace_start"() <{level = 10 : i32, message = "bqk,bkd->bqd"}> : () -> ()
    %cst_104 = arith.constant dense<0.000000e+00> : vector<2x8x8xf32>
    %410 = tpu.matmul %409, %398, %cst_104 {dimension_numbers = #tpu.dot_dimension_numbers<[2], [1], [1], [2], [0, 0, 0, 1, 1, 2], [0], [0]>} : vector<2x8x8xbf16>, vector<2x8x8xbf16>, vector<2x8x8xf32> -> vector<2x8x8xf32>
    "tpu.trace_stop"() : () -> ()
    %411 = vector.shape_cast %410 : vector<2x8x8xf32> to vector<16x8xf32>
    %412 = arith.truncf %411 : vector<16x8xf32> to vector<16x8xbf16>
    %413 = vector.extract_strided_slice %20 {offsets = [0, 0], sizes = [8, 32], strides = [1, 1]} : vector<32x32xf32> to vector<8x32xf32>
    %414 = arith.truncf %413 : vector<8x32xf32> to vector<8x32xbf16>
    %cst_105 = arith.constant dense<0.000000e+00> : vector<16x32xf32>
    %415 = tpu.matmul %412, %414, %cst_105 {dimension_numbers = #tpu.dot_dimension_numbers<[1], [0], [0], [1], [0, 0, 1, 1], [], []>} : vector<16x8xbf16>, vector<8x32xbf16>, vector<16x32xf32> -> vector<16x32xf32>
    %416 = vector.extract_strided_slice %390 {offsets = [0, 0, 8], sizes = [2, 8, 8], strides = [1, 1, 1]} : vector<2x8x32xf32> to vector<2x8x8xf32>
    %417 = arith.truncf %416 : vector<2x8x8xf32> to vector<2x8x8xbf16>
    %418 = vector.extract_strided_slice %391 {offsets = [0, 0, 8], sizes = [2, 8, 8], strides = [1, 1, 1]} : vector<2x8x32xf32> to vector<2x8x8xf32>
    %419 = arith.truncf %418 : vector<2x8x8xf32> to vector<2x8x8xbf16>
    %420 = vector.extract_strided_slice %392 {offsets = [0, 0, 8], sizes = [2, 8, 8], strides = [1, 1, 1]} : vector<2x8x32xf32> to vector<2x8x8xf32>
    %421 = arith.truncf %420 : vector<2x8x8xf32> to vector<2x8x8xbf16>
    "tpu.trace_start"() <{level = 10 : i32, message = "bqd,bkd->bqk"}> : () -> ()
    %cst_106 = arith.constant dense<0.000000e+00> : vector<2x8x8xf32>
    %422 = tpu.matmul %417, %419, %cst_106 {dimension_numbers = #tpu.dot_dimension_numbers<[2], [2], [1], [1], [0, 0, 0, 1, 1, 1], [0], [0]>} : vector<2x8x8xbf16>, vector<2x8x8xbf16>, vector<2x8x8xf32> -> vector<2x8x8xf32>
    "tpu.trace_stop"() : () -> ()
    %cst_107 = arith.constant dense<0xFF800000> : vector<2x8xf32>
    %423 = vector.multi_reduction <maximumf>, %422, %cst_107 [2] : vector<2x8x8xf32> to vector<2x8xf32>
    %424 = vector.shape_cast %423 : vector<2x8xf32> to vector<2x8x1xf32>
    %425 = vector.broadcast %424 : vector<2x8x1xf32> to vector<2x8x8xf32>
    %426 = arith.subf %422, %425 : vector<2x8x8xf32>
    %427 = math.exp %426 : vector<2x8x8xf32>
    %cst_108 = arith.constant dense<0.000000e+00> : vector<2x8xf32>
    %428 = vector.multi_reduction <add>, %427, %cst_108 [2] : vector<2x8x8xf32> to vector<2x8xf32>
    %429 = vector.shape_cast %428 : vector<2x8xf32> to vector<2x8x1xf32>
    %430 = vector.broadcast %429 : vector<2x8x1xf32> to vector<2x8x8xf32>
    %431 = arith.divf %427, %430 : vector<2x8x8xf32>
    %432 = arith.truncf %431 : vector<2x8x8xf32> to vector<2x8x8xbf16>
    "tpu.trace_start"() <{level = 10 : i32, message = "bqk,bkd->bqd"}> : () -> ()
    %cst_109 = arith.constant dense<0.000000e+00> : vector<2x8x8xf32>
    %433 = tpu.matmul %432, %421, %cst_109 {dimension_numbers = #tpu.dot_dimension_numbers<[2], [1], [1], [2], [0, 0, 0, 1, 1, 2], [0], [0]>} : vector<2x8x8xbf16>, vector<2x8x8xbf16>, vector<2x8x8xf32> -> vector<2x8x8xf32>
    "tpu.trace_stop"() : () -> ()
    %434 = vector.shape_cast %433 : vector<2x8x8xf32> to vector<16x8xf32>
    %435 = arith.truncf %434 : vector<16x8xf32> to vector<16x8xbf16>
    %436 = vector.extract_strided_slice %20 {offsets = [8, 0], sizes = [8, 32], strides = [1, 1]} : vector<32x32xf32> to vector<8x32xf32>
    %437 = arith.truncf %436 : vector<8x32xf32> to vector<8x32xbf16>
    %cst_110 = arith.constant dense<0.000000e+00> : vector<16x32xf32>
    %438 = tpu.matmul %435, %437, %cst_110 {dimension_numbers = #tpu.dot_dimension_numbers<[1], [0], [0], [1], [0, 0, 1, 1], [], []>} : vector<16x8xbf16>, vector<8x32xbf16>, vector<16x32xf32> -> vector<16x32xf32>
    %439 = arith.addf %415, %438 : vector<16x32xf32>
    %440 = vector.extract_strided_slice %390 {offsets = [0, 0, 16], sizes = [2, 8, 8], strides = [1, 1, 1]} : vector<2x8x32xf32> to vector<2x8x8xf32>
    %441 = arith.truncf %440 : vector<2x8x8xf32> to vector<2x8x8xbf16>
    %442 = vector.extract_strided_slice %391 {offsets = [0, 0, 16], sizes = [2, 8, 8], strides = [1, 1, 1]} : vector<2x8x32xf32> to vector<2x8x8xf32>
    %443 = arith.truncf %442 : vector<2x8x8xf32> to vector<2x8x8xbf16>
    %444 = vector.extract_strided_slice %392 {offsets = [0, 0, 16], sizes = [2, 8, 8], strides = [1, 1, 1]} : vector<2x8x32xf32> to vector<2x8x8xf32>
    %445 = arith.truncf %444 : vector<2x8x8xf32> to vector<2x8x8xbf16>
    "tpu.trace_start"() <{level = 10 : i32, message = "bqd,bkd->bqk"}> : () -> ()
    %cst_111 = arith.constant dense<0.000000e+00> : vector<2x8x8xf32>
    %446 = tpu.matmul %441, %443, %cst_111 {dimension_numbers = #tpu.dot_dimension_numbers<[2], [2], [1], [1], [0, 0, 0, 1, 1, 1], [0], [0]>} : vector<2x8x8xbf16>, vector<2x8x8xbf16>, vector<2x8x8xf32> -> vector<2x8x8xf32>
    "tpu.trace_stop"() : () -> ()
    %cst_112 = arith.constant dense<0xFF800000> : vector<2x8xf32>
    %447 = vector.multi_reduction <maximumf>, %446, %cst_112 [2] : vector<2x8x8xf32> to vector<2x8xf32>
    %448 = vector.shape_cast %447 : vector<2x8xf32> to vector<2x8x1xf32>
    %449 = vector.broadcast %448 : vector<2x8x1xf32> to vector<2x8x8xf32>
    %450 = arith.subf %446, %449 : vector<2x8x8xf32>
    %451 = math.exp %450 : vector<2x8x8xf32>
    %cst_113 = arith.constant dense<0.000000e+00> : vector<2x8xf32>
    %452 = vector.multi_reduction <add>, %451, %cst_113 [2] : vector<2x8x8xf32> to vector<2x8xf32>
    %453 = vector.shape_cast %452 : vector<2x8xf32> to vector<2x8x1xf32>
    %454 = vector.broadcast %453 : vector<2x8x1xf32> to vector<2x8x8xf32>
    %455 = arith.divf %451, %454 : vector<2x8x8xf32>
    %456 = arith.truncf %455 : vector<2x8x8xf32> to vector<2x8x8xbf16>
    "tpu.trace_start"() <{level = 10 : i32, message = "bqk,bkd->bqd"}> : () -> ()
    %cst_114 = arith.constant dense<0.000000e+00> : vector<2x8x8xf32>
    %457 = tpu.matmul %456, %445, %cst_114 {dimension_numbers = #tpu.dot_dimension_numbers<[2], [1], [1], [2], [0, 0, 0, 1, 1, 2], [0], [0]>} : vector<2x8x8xbf16>, vector<2x8x8xbf16>, vector<2x8x8xf32> -> vector<2x8x8xf32>
    "tpu.trace_stop"() : () -> ()
    %458 = vector.shape_cast %457 : vector<2x8x8xf32> to vector<16x8xf32>
    %459 = arith.truncf %458 : vector<16x8xf32> to vector<16x8xbf16>
    %460 = vector.extract_strided_slice %20 {offsets = [16, 0], sizes = [8, 32], strides = [1, 1]} : vector<32x32xf32> to vector<8x32xf32>
    %461 = arith.truncf %460 : vector<8x32xf32> to vector<8x32xbf16>
    %cst_115 = arith.constant dense<0.000000e+00> : vector<16x32xf32>
    %462 = tpu.matmul %459, %461, %cst_115 {dimension_numbers = #tpu.dot_dimension_numbers<[1], [0], [0], [1], [0, 0, 1, 1], [], []>} : vector<16x8xbf16>, vector<8x32xbf16>, vector<16x32xf32> -> vector<16x32xf32>
    %463 = arith.addf %439, %462 : vector<16x32xf32>
    %464 = vector.extract_strided_slice %390 {offsets = [0, 0, 24], sizes = [2, 8, 8], strides = [1, 1, 1]} : vector<2x8x32xf32> to vector<2x8x8xf32>
    %465 = arith.truncf %464 : vector<2x8x8xf32> to vector<2x8x8xbf16>
    %466 = vector.extract_strided_slice %391 {offsets = [0, 0, 24], sizes = [2, 8, 8], strides = [1, 1, 1]} : vector<2x8x32xf32> to vector<2x8x8xf32>
    %467 = arith.truncf %466 : vector<2x8x8xf32> to vector<2x8x8xbf16>
    %468 = vector.extract_strided_slice %392 {offsets = [0, 0, 24], sizes = [2, 8, 8], strides = [1, 1, 1]} : vector<2x8x32xf32> to vector<2x8x8xf32>
    %469 = arith.truncf %468 : vector<2x8x8xf32> to vector<2x8x8xbf16>
    "tpu.trace_start"() <{level = 10 : i32, message = "bqd,bkd->bqk"}> : () -> ()
    %cst_116 = arith.constant dense<0.000000e+00> : vector<2x8x8xf32>
    %470 = tpu.matmul %465, %467, %cst_116 {dimension_numbers = #tpu.dot_dimension_numbers<[2], [2], [1], [1], [0, 0, 0, 1, 1, 1], [0], [0]>} : vector<2x8x8xbf16>, vector<2x8x8xbf16>, vector<2x8x8xf32> -> vector<2x8x8xf32>
    "tpu.trace_stop"() : () -> ()
    %cst_117 = arith.constant dense<0xFF800000> : vector<2x8xf32>
    %471 = vector.multi_reduction <maximumf>, %470, %cst_117 [2] : vector<2x8x8xf32> to vector<2x8xf32>
    %472 = vector.shape_cast %471 : vector<2x8xf32> to vector<2x8x1xf32>
    %473 = vector.broadcast %472 : vector<2x8x1xf32> to vector<2x8x8xf32>
    %474 = arith.subf %470, %473 : vector<2x8x8xf32>
    %475 = math.exp %474 : vector<2x8x8xf32>
    %cst_118 = arith.constant dense<0.000000e+00> : vector<2x8xf32>
    %476 = vector.multi_reduction <add>, %475, %cst_118 [2] : vector<2x8x8xf32> to vector<2x8xf32>
    %477 = vector.shape_cast %476 : vector<2x8xf32> to vector<2x8x1xf32>
    %478 = vector.broadcast %477 : vector<2x8x1xf32> to vector<2x8x8xf32>
    %479 = arith.divf %475, %478 : vector<2x8x8xf32>
    %480 = arith.truncf %479 : vector<2x8x8xf32> to vector<2x8x8xbf16>
    "tpu.trace_start"() <{level = 10 : i32, message = "bqk,bkd->bqd"}> : () -> ()
    %cst_119 = arith.constant dense<0.000000e+00> : vector<2x8x8xf32>
    %481 = tpu.matmul %480, %469, %cst_119 {dimension_numbers = #tpu.dot_dimension_numbers<[2], [1], [1], [2], [0, 0, 0, 1, 1, 2], [0], [0]>} : vector<2x8x8xbf16>, vector<2x8x8xbf16>, vector<2x8x8xf32> -> vector<2x8x8xf32>
    "tpu.trace_stop"() : () -> ()
    %482 = vector.shape_cast %481 : vector<2x8x8xf32> to vector<16x8xf32>
    %483 = arith.truncf %482 : vector<16x8xf32> to vector<16x8xbf16>
    %484 = vector.extract_strided_slice %20 {offsets = [24, 0], sizes = [8, 32], strides = [1, 1]} : vector<32x32xf32> to vector<8x32xf32>
    %485 = arith.truncf %484 : vector<8x32xf32> to vector<8x32xbf16>
    %cst_120 = arith.constant dense<0.000000e+00> : vector<16x32xf32>
    %486 = tpu.matmul %483, %485, %cst_120 {dimension_numbers = #tpu.dot_dimension_numbers<[1], [0], [0], [1], [0, 0, 1, 1], [], []>} : vector<16x8xbf16>, vector<8x32xbf16>, vector<16x32xf32> -> vector<16x32xf32>
    %487 = arith.addf %463, %486 : vector<16x32xf32>
    %488 = vector.broadcast %21 : vector<1x32xf32> to vector<16x32xf32>
    %489 = arith.addf %487, %488 : vector<16x32xf32>
    %490 = arith.addf %373, %489 : vector<16x32xf32>
    %cst_121 = arith.constant dense<0.000000e+00> : vector<16xf32>
    %491 = vector.multi_reduction <add>, %490, %cst_121 [1] : vector<16x32xf32> to vector<16xf32>
    %492 = vector.shape_cast %491 : vector<16xf32> to vector<16x1xf32>
    %cst_122 = arith.constant 3.200000e+01 : f32
    %493 = vector.broadcast %cst_122 : f32 to vector<16x1xf32>
    %494 = arith.divf %492, %493 : vector<16x1xf32>
    %495 = vector.broadcast %494 : vector<16x1xf32> to vector<16x32xf32>
    %496 = arith.subf %490, %495 : vector<16x32xf32>
    %497 = arith.mulf %496, %496 : vector<16x32xf32>
    %cst_123 = arith.constant dense<0.000000e+00> : vector<16xf32>
    %498 = vector.multi_reduction <add>, %497, %cst_123 [1] : vector<16x32xf32> to vector<16xf32>
    %499 = vector.shape_cast %498 : vector<16xf32> to vector<16x1xf32>
    %cst_124 = arith.constant 3.200000e+01 : f32
    %500 = vector.broadcast %cst_124 : f32 to vector<16x1xf32>
    %501 = arith.divf %499, %500 : vector<16x1xf32>
    %cst_125 = arith.constant 9.99999974E-6 : f32
    %502 = vector.broadcast %cst_125 : f32 to vector<16x1xf32>
    %503 = arith.addf %501, %502 : vector<16x1xf32>
    %504 = math.rsqrt %503 : vector<16x1xf32>
    %505 = vector.broadcast %504 : vector<16x1xf32> to vector<16x32xf32>
    %506 = arith.mulf %496, %505 : vector<16x32xf32>
    %507 = vector.broadcast %22 : vector<1x32xf32> to vector<16x32xf32>
    %508 = arith.mulf %506, %507 : vector<16x32xf32>
    %509 = vector.broadcast %23 : vector<1x32xf32> to vector<16x32xf32>
    %510 = arith.addf %508, %509 : vector<16x32xf32>
    %511 = arith.truncf %510 : vector<16x32xf32> to vector<16x32xbf16>
    %512 = arith.truncf %24 : vector<32x64xf32> to vector<32x64xbf16>
    %cst_126 = arith.constant dense<0.000000e+00> : vector<16x64xf32>
    %513 = tpu.matmul %511, %512, %cst_126 {dimension_numbers = #tpu.dot_dimension_numbers<[1], [0], [0], [1], [0, 0, 1, 1], [], []>} : vector<16x32xbf16>, vector<32x64xbf16>, vector<16x64xf32> -> vector<16x64xf32>
    %514 = vector.broadcast %25 : vector<1x64xf32> to vector<16x64xf32>
    %515 = arith.addf %513, %514 : vector<16x64xf32>
    %cst_127 = arith.constant 0.000000e+00 : f32
    %516 = vector.broadcast %cst_127 : f32 to vector<16x64xf32>
    %517 = arith.maximumf %515, %516 : vector<16x64xf32>
    %518 = arith.truncf %517 : vector<16x64xf32> to vector<16x64xbf16>
    %519 = arith.truncf %26 : vector<64x32xf32> to vector<64x32xbf16>
    %cst_128 = arith.constant dense<0.000000e+00> : vector<16x32xf32>
    %520 = tpu.matmul %518, %519, %cst_128 {dimension_numbers = #tpu.dot_dimension_numbers<[1], [0], [0], [1], [0, 0, 1, 1], [], []>} : vector<16x64xbf16>, vector<64x32xbf16>, vector<16x32xf32> -> vector<16x32xf32>
    %521 = vector.broadcast %27 : vector<1x32xf32> to vector<16x32xf32>
    %522 = arith.addf %520, %521 : vector<16x32xf32>
    %523 = arith.addf %510, %522 : vector<16x32xf32>
    %cst_129 = arith.constant dense<0.000000e+00> : vector<16xf32>
    %524 = vector.multi_reduction <add>, %523, %cst_129 [1] : vector<16x32xf32> to vector<16xf32>
    %525 = vector.shape_cast %524 : vector<16xf32> to vector<16x1xf32>
    %cst_130 = arith.constant 3.200000e+01 : f32
    %526 = vector.broadcast %cst_130 : f32 to vector<16x1xf32>
    %527 = arith.divf %525, %526 : vector<16x1xf32>
    %528 = vector.broadcast %527 : vector<16x1xf32> to vector<16x32xf32>
    %529 = arith.subf %523, %528 : vector<16x32xf32>
    %530 = arith.mulf %529, %529 : vector<16x32xf32>
    %cst_131 = arith.constant dense<0.000000e+00> : vector<16xf32>
    %531 = vector.multi_reduction <add>, %530, %cst_131 [1] : vector<16x32xf32> to vector<16xf32>
    %532 = vector.shape_cast %531 : vector<16xf32> to vector<16x1xf32>
    %cst_132 = arith.constant 3.200000e+01 : f32
    %533 = vector.broadcast %cst_132 : f32 to vector<16x1xf32>
    %534 = arith.divf %532, %533 : vector<16x1xf32>
    %cst_133 = arith.constant 9.99999974E-6 : f32
    %535 = vector.broadcast %cst_133 : f32 to vector<16x1xf32>
    %536 = arith.addf %534, %535 : vector<16x1xf32>
    %537 = math.rsqrt %536 : vector<16x1xf32>
    %538 = vector.broadcast %537 : vector<16x1xf32> to vector<16x32xf32>
    %539 = arith.mulf %529, %538 : vector<16x32xf32>
    %540 = vector.broadcast %28 : vector<1x32xf32> to vector<16x32xf32>
    %541 = arith.mulf %539, %540 : vector<16x32xf32>
    %542 = vector.broadcast %29 : vector<1x32xf32> to vector<16x32xf32>
    %543 = arith.addf %541, %542 : vector<16x32xf32>
    %544 = vector.extract_strided_slice %543 {offsets = [0, 0], sizes = [8, 32], strides = [1, 1]} : vector<16x32xf32> to vector<8x32xf32>
    %545 = vector.extract_strided_slice %543 {offsets = [8, 0], sizes = [8, 32], strides = [1, 1]} : vector<16x32xf32> to vector<8x32xf32>
    %546 = arith.maximumf %544, %545 : vector<8x32xf32>
    %547 = arith.subf %544, %546 : vector<8x32xf32>
    %548 = arith.subf %545, %546 : vector<8x32xf32>
    %549 = math.exp %547 : vector<8x32xf32>
    %550 = math.exp %548 : vector<8x32xf32>
    %551 = arith.addf %549, %550 : vector<8x32xf32>
    %552 = math.log %551 : vector<8x32xf32>
    %553 = arith.subf %547, %552 : vector<8x32xf32>
    %c0_134 = arith.constant 0 : index
    %c0_135 = arith.constant 0 : index
    %c0_136 = arith.constant 0 : index
    %554 = vector.load %arg2[%c0_134, %c0_135, %c0_136] : memref<2x8x32xf32, #tpu.memory_space<vmem>>, vector<1x8x32xf32>
    %555 = vector.shape_cast %554 : vector<1x8x32xf32> to vector<8x32xf32>
    %556 = vector.shape_cast %553 : vector<8x32xf32> to vector<1x8x32xf32>
    tpu.vector_store %arg2[%c0_134, %c0_135, %c0_136], %556 {strides = array<i32>} : memref<2x8x32xf32, #tpu.memory_space<vmem>>, vector<1x8x32xf32>,
    %557 = arith.subf %548, %552 : vector<8x32xf32>
    %c1 = arith.constant 1 : index
    %c0_137 = arith.constant 0 : index
    %c0_138 = arith.constant 0 : index
    %558 = vector.load %arg2[%c1, %c0_137, %c0_138] : memref<2x8x32xf32, #tpu.memory_space<vmem>>, vector<1x8x32xf32>
    %559 = vector.shape_cast %558 : vector<1x8x32xf32> to vector<8x32xf32>
    %560 = vector.shape_cast %557 : vector<8x32xf32> to vector<1x8x32xf32>
    tpu.vector_store %arg2[%c1, %c0_137, %c0_138], %560 {strides = array<i32>} : memref<2x8x32xf32, #tpu.memory_space<vmem>>, vector<1x8x32xf32>,
    return
  }
}

</mosaic_0001>

<bundles_post_ra>
// kernel: fwd.1
= control target key start
LH: loop header
LB: loop body
LE: loop exit
PB: predicated region body
PF: predicated region fallthrough
CT: control target
= control target key end

     0   :  { %7 = vsyncpa [#allocation3], 0  ;;  %s5869_s0 = inlined_call_operand.vmem [shape: s32[16,1], index: 0, kind: input, shape index: {}]   ;;  %s5870_s1 = inlined_call_operand.hbm [shape: f32[432,128], index: 1, kind: input, shape index: {}]   ;;  %s5871_s2 = inlined_call_operand.hbm [shape: f32[2,8,32], index: 2, kind: output, shape index: {}]  }
   0x1   :  { %8 = vsyncpa [#allocation4], 0  ;;  %s5077_s9 = smov [#allocation2]  }
   0x2   :  { %s16_s10 = sshll.u32 %s5077_s9, 4  ;;  %s17_s10 = int_to_ptr.vmem [resolvable:$true] %s16_s10 }
   0x3   :  { %s5041_s11 = scalar_lea.vmem %s17_s10, 6912  ;;  %p5046_p1 = scmp.lt.s32.totalorder %s17_s10, %s17_s10 }
   0x4   :  { %p5042_p0 = scmp.ne.s32.totalorder %s17_s10, %s5041_s11  ;;  %p5047_p2 = scmp.lt.s32.totalorder %s5041_s11, %s5041_s11 }
   0x6   :  { %p5048_p3 = por %p5047_p2, %p5046_p1 }
   0x8   :  { %p5049_p4 = pnand %p5048_p3, %p5042_p0 }
   0xa   :  { %5052 = shalt.err (!%p5049_p4)
}
   0xb   :  { %s5078_s12 = smov 128   ;;  %s5079_s13 = smov 8  }
   0xc   :  { %22 = dma.hbm_to_vmem [thread:$0]  %s5870_s1, 6912, %s17_s10, [#allocation3], %s5078_s12, %s5078_s12, %s5079_s13  }
   0xd   :  { %5073 = dma.done.wait [#allocation3], 6912  }
   0xe   :  { %5074 = vsyncadd [#allocation3], 4294960384  ;;  %v5080_v0 = vmov 0   ;;  %v5081_v1 = vmov 0.0   ;;  %v95_v2 = vld [vmem:[%s5869_s0] sm:$0xff]  ;;  %v113_v4 = vld [vmem:[#allocation2 + $0x8] sm:$0xff]  ;;  %v97_v13 = vlaneseq }
   0xf   :  { %4910 = vset.pattern.permute.xlu0 %v5080_v0  ;;  %4441 = vmatprep.subr.bf16.mxu0 %v5081_v1  ;;  %v112_v3 = vld [vmem:[#allocation2] sm:$0xff]  ;;  %v96_v5 = vld [vmem:[%s5869_s0 + $0x8] sm:$0xff]  ;;  %vm5082_vm0 = vmmov 0   ;;  %v30_v8 = vld [vmem:[#allocation2 + $0x31] sm:$0xff]  ;;  %s5083_s1 = smov 96   ;;  %vm120_vm3 = vcmask 130048  }
  0x10   :  { %4463 = vmatprep.subr.bf16.mxu1 %v5081_v1  ;;  %100 = vperm.xlu0 %4910, %v95_v2   ;;  %v114_v6 = vpack.c.bf16 %v113_v4, %v112_v3  ;;  %v29_v7 = vld [vmem:[#allocation2 + $0x29] sm:$0xff]  ;;  %v27_v9 = vld [vmem:[#allocation2 + $0x19] sm:$0xff]  ;;  %v28_v11 = vld [vmem:[#allocation2 + $0x21] sm:$0xff]  ;;  %v5129_v14 = vand.u32 127, %v97_v13  ;;  %vm179_vm4 = vcmask 261120   ;;  %vm281_vm5 = vcmask 64512  }
  0x11   :  { %4443 = vmatprep.mubr.msk.bf16.mxu0 %vm5082_vm0, %v5081_v1  ;;  %v174_v10 = vpack.c.bf16 %v30_v8, %v29_v7  ;;  %4465 = vmatprep.mubr.msk.bf16.mxu1 %vm5082_vm0, %v5081_v1  ;;  %v173_v12 = vpack.c.bf16 %v28_v11, %v27_v9  ;;  %v4195_v20 = vld [vmem:[#allocation2 + $0x39] ss:$0 sm:$0xff]  ;;  %v4193_v21 = vld [vmem:[#allocation2 + $0x10] ss:$0 sm:$0xff]  ;;  %v165_v25 = vld [vmem:[#allocation2 + $0x11] sm:$0xff]  ;;  %vm404_vm6 = vcmask 1043456  }
  0x12   :  { %4442 = vmatpush3.bf16.msra.mxu0 %v114_v6  ;;  %s5084_s0 = smov 120   ;;  %s5085_s20 = smov 88   ;;  %vm1468_vm7 = vcmask 523264  }
  0x13   :  { %4447 = vmatprep.subr.bf16.mxu0 %v5081_v1  ;;  %228 = vrot.lane.b32.xlu1 %v174_v10, %s5083_s1  ;;  %s5086_s21 = smov 112   ;;  %s5087_s22 = smov 80  }
  0x14   :  { %103 = vperm.xlu0 %4910, %v96_v5   ;;  %s5088_s23 = smov 104   ;;  %s5089_s24 = smov 72  }
  0x15   :  { %s5091_s25 = smov [#allocation5]  }
  0x16   :  { %s4179_s26 = sshll.u32 %s5091_s25, 4  ;;  %s4180_s26 = int_to_ptr.vmem [resolvable:$true] %s4179_s26 }
  0x17   :  { %226 = vrot.lane.b32.xlu1 %v173_v12, %s5083_s1  ;;  %s5053_s27 = scalar_lea.vmem %s4180_s26, 256  ;;  %p5058_p6 = scmp.lt.s32.totalorder %s4180_s26, %s4180_s26 }
  0x18   :  { %233 = vrot.lane.b32.xlu0 %v4195_v20, %s5083_s1  ;;  %p5054_p5 = scmp.ne.s32.totalorder %s4180_s26, %s5053_s27  ;;  %p5059_p7 = scmp.lt.s32.totalorder %s5053_s27, %s5053_s27 }
  0x1a   :  { %p5060_p8 = por %p5059_p7, %p5058_p6 }
  0x1c   :  { %p5061_p9 = pnand %p5060_p8, %p5054_p5 }
  0x85   :  { %v229_v31 = vpop.permute.xlu1 %228 }
  0x89   :  { %v227_v33 = vpop.permute.xlu1 %226 }
  0x8b   :  { %v101_v15 = vpop.permute.xlu0 %100 }
  0x8c   :  { %vm105_vm1 = vcmp.eq.s32.totalorder %v5129_v14, %v101_v15 }
  0x8d   :  { %v4191_v17 = vsel %vm105_vm1, 1.0, %v5081_v1 }
  0x8f   :  { %v104_v16 = vpop.permute.xlu0 %103 }
  0x90   :  { %vm106_vm2 = vcmp.eq.s32.totalorder %v5129_v14, %v104_v16 }
  0x91   :  { %v4192_v18 = vsel %vm106_vm2, 1.0, %v5081_v1 }
  0x92   :  { %v111_v19 = vpack.c.bf16 %v4192_v18, %v4191_v17 }
  0x93   :  { %v234_v38 = vpop.permute.xlu0 %233 }
  0x94   :  { %4444 = vmatmul.mubr.msk.bf16.vlgmr.msra.gmra.mxu0 %vm120_vm3, %v111_v19 }
  0x95   :  { %4448 = vmatpush3.bf16.msra.mxu0 %v174_v10  ;;  %4451 = vmatprep.mubr.msk.bf16.mxu0 %vm5082_vm0, %v5081_v1 }
  0x96   :  { %4449 = vmatprep.subr.bf16.mxu0 %v5081_v1 }
  0x99   :  { %4450 = vmatpush3.bf16.msra.mxu0 %v173_v12 }
  0x9a   :  { %4455 = vmatprep.subr.bf16.mxu0 %v5081_v1 }
 0x154   :  { %v158_v22 = vpop.f32.mrf.mxu0 }
 0x155   :  { %v159_v24 = vadd.f32 %v4193_v21, %v158_v22 }
 0x156   :  { %v4445_v23 = vpop.f32.mrf.mxu0 }
 0x157   :  { %v5140_v29 = vadd.f32 %v165_v25, %v159_v24 }
 0x158   :  { %v161_v26 = vpop.f32.mrf.mxu0 }
 0x159   :  { %v162_v27 = vadd.f32 %v4193_v21, %v161_v26 }
 0x15a   :  { %v4446_v28 = vpop.f32.mrf.mxu0 }
 0x15b   :  { %v5142_v30 = vadd.f32 %v165_v25, %v162_v27 }
 0x15d   :  { %v5146_v32 = vpack.c.bf16 %v5142_v30, %v5140_v29 }
 0x15f   :  { %4452 = vmatmul.mubr.msk.bf16.vlgmr.msra.gmra.mxu0 %vm179_vm4, %v5146_v32 }
 0x160   :  { %4456 = vmatpush3.bf16.msra.mxu0 %v229_v31  ;;  %4459 = vmatprep.mubr.msk.bf16.mxu0 %vm5082_vm0, %v5081_v1 }
 0x161   :  { %4457 = vmatprep.subr.bf16.mxu0 %v5081_v1 }
 0x164   :  { %4458 = vmatpush3.bf16.msra.mxu0 %v227_v33 }
 0x165   :  { %4469 = vmatprep.subr.bf16.mxu0 %v5081_v1 }
 0x167   :  { %4460 = vmatmul.mubr.msk.bf16.vlgmr.msra.gmra.mxu0 %vm179_vm4, %v5146_v32 }
 0x168   :  { %4471 = vmatprep.mubr.msk.bf16.mxu0 %vm5082_vm0, %v5081_v1 }
 0x21f   :  { %v217_v34 = vpop.f32.mrf.mxu0 }
 0x220   :  { %v218_v47 = vadd.f32 %v4195_v20, %v217_v34 }
 0x221   :  { %v4453_v35 = vpop.f32.mrf.mxu0 }
 0x222   :  { %v5167_v50 = vpack.c.bf16 %v218_v47, %v218_v47 }
 0x223   :  { %v220_v36 = vpop.f32.mrf.mxu0 }
 0x224   :  { %v221_v51 = vadd.f32 %v4195_v20, %v220_v36 }
 0x225   :  { %v4454_v37 = vpop.f32.mrf.mxu0 }
 0x226   :  { %v5174_v52 = vpack.c.bf16 %v221_v51, %v221_v51 }
 0x227   :  { %v270_v39 = vpop.f32.mrf.mxu0 }
 0x228   :  { %v271_v40 = vadd.f32 %v270_v39, %v234_v38 }
 0x229   :  { %v4461_v41 = vpop.f32.mrf.mxu0 }
 0x22a   :  { %v5158_v42 = vpack.c.bf16 %v271_v40, %v271_v40 }
 0x22b   :  { %v273_v43 = vpop.f32.mrf.mxu0 }
 0x22c   :  { %v274_v44 = vadd.f32 %v273_v43, %v234_v38  ;;  %v286_v45 = vsel %vm281_vm5, %v5158_v42, 0 }
 0x22d   :  { %v4462_v46 = vpop.f32.mrf.mxu0  ;;  %4464 = vmatpush3.bf16.xpose.msra.mxu1 %v286_v45 }
 0x22e   :  { %v5162_v48 = vpack.c.bf16 %v274_v44, %v274_v44  ;;  %4475 = vmatprep.subr.bf16.mxu1 %v5081_v1 }
 0x230   :  { %v332_v49 = vsel %vm281_vm5, %v5162_v48, 0 }
 0x231   :  { %4470 = vmatpush3.bf16.xpose.msra.mxu0 %v332_v49 }
 0x232   :  { %4481 = vmatprep.subr.bf16.mxu0 %v5081_v1 }
 0x234   :  { %4466 = vmatmul.mubr.msk.bf16.vlgmr.msra.gmra.mxu1 %vm281_vm5, %v5167_v50 }
 0x235   :  { %4477 = vmatprep.mubr.msk.bf16.mxu1 %vm5082_vm0, %v5081_v1 }
 0x238   :  { %4472 = vmatmul.mubr.msk.bf16.vlgmr.msra.gmra.mxu0 %vm281_vm5, %v5174_v52 }
 0x239   :  { %4483 = vmatprep.mubr.msk.bf16.mxu0 %vm5082_vm0, %v5081_v1 }
 0x2f4   :  { %v322_v53 = vpop.f32.mrf.mxu1 }
 0x2f5   :  { %v374_v54 = vsel %vm281_vm5, %v322_v53, -inf }
 0x2f6   :  { %375 = vmax.xlane.f32.xlu1 %v374_v54  ;;  %v4467_v55 = vpop.f32.mrf.mxu1 }
 0x2f8   :  { %v325_v56 = vpop.f32.mrf.mxu1  ;;  %v368_v57 = vpop.f32.mrf.mxu0 }
 0x2f9   :  { %v377_v58 = vsel %vm281_vm5, %v368_v57, -inf }
 0x2fa   :  { %v4468_v59 = vpop.f32.mrf.mxu1  ;;  %378 = vmax.xlane.f32.xlu0 %v377_v58  ;;  %v4473_v60 = vpop.f32.mrf.mxu0 }
 0x2fc   :  { %v371_v61 = vpop.f32.mrf.mxu0 }
 0x2fe   :  { %v4474_v62 = vpop.f32.mrf.mxu0 }
 0x307   :  { %449 = vrot.lane.b32.xlu1 %v5162_v48, %s5083_s1 }
 0x310   :  { %399 = vrot.lane.b32.xlu0 %v5158_v42, %s5083_s1 }
 0x37f   :  { %v376_v63 = vpop.xlane.xlu1 %375 }
 0x380   :  { %v380_v0 = vsub.f32 %v322_v53, %v376_v63 }
 0x382   :  { %v382_v2 = vmul.f32 1.442695, %v380_v0 }
 0x383   :  { %v450_v3 = vpop.permute.xlu1 %449  ;;  %v379_v4 = vpop.xlane.xlu0 %378 }
 0x384   :  { %4911 = vpow2.f32 %v382_v2  ;;  %v455_v5 = vsel %vm404_vm6, %v450_v3, 0  ;;  %v381_v6 = vsub.f32 %v368_v57, %v379_v4 }
 0x385   :  { %4482 = vmatpush3.bf16.msra.mxu0 %v455_v5 }
 0x386   :  { %v384_v7 = vmul.f32 1.442695, %v381_v6  ;;  %4493 = vmatprep.subr.bf16.mxu0 %v5081_v1 }
 0x387   :  { %v400_v8 = vpop.permute.xlu0 %399 }
 0x388   :  { %4913 = vpow2.f32 %v384_v7  ;;  %v406_v9 = vsel %vm404_vm6, %v400_v8, 0 }
 0x389   :  { %4476 = vmatpush3.bf16.msra.mxu1 %v406_v9 }
 0x38a   :  { %4487 = vmatprep.subr.bf16.mxu1 %v5081_v1 }
 0x391   :  { %v4912_v10 = vpop.eup %4911 }
 0x392   :  { %v386_v11 = vsel %vm281_vm5, %v4912_v10, 0.0 }
 0x393   :  { %387 = vadd.xlane.f32.xlu0 %v386_v11 }
 0x395   :  { %v4914_v12 = vpop.eup %4913 }
 0x396   :  { %v389_v15 = vsel %vm281_vm5, %v4914_v12, 0.0 }
 0x397   :  { %390 = vadd.xlane.f32.xlu1 %v389_v15 }
 0x3a8   :  { %502 = vrot.lane.b32.xlu1 %v5158_v42, %s5084_s0 }
 0x3a9   :  { %553 = vrot.lane.b32.xlu0 %v5162_v48, %s5084_s0 }
 0x3ac   :  { %500 = vrot.lane.b32.xlu1 %v5167_v50, %s5084_s0 }
 0x3ad   :  { %551 = vrot.lane.b32.xlu0 %v5174_v52, %s5084_s0 }
 0x41c   :  { %v388_v16 = vpop.xlane.xlu0 %387 }
 0x41d   :  { %4915 = vrcp.f32 %v388_v16 }
 0x420   :  { %v391_v17 = vpop.xlane.xlu1 %390  ;;  %v554_v25 = vpop.permute.xlu0 %553 }
 0x421   :  { %4917 = vrcp.f32 %v391_v17  ;;  %v559_v27 = vsel %vm281_vm5, %v554_v25, 0 }
 0x424   :  { %v503_v20 = vpop.permute.xlu1 %502  ;;  %v552_v31 = vpop.permute.xlu0 %551 }
 0x425   :  { %v508_v23 = vsel %vm281_vm5, %v503_v20, 0 }
 0x428   :  { %v501_v28 = vpop.permute.xlu1 %500 }
 0x42a   :  { %v4916_v18 = vpop.eup %4915 }
 0x42b   :  { %v393_v19 = vmul.f32 %v4916_v18, %v4912_v10  ;;  %v32_v10 = vld [vmem:[#allocation2 + $0x3a] sm:$0xff] }
 0x42c   :  { %v498_v15 = vpack.c.bf16 %v32_v10, %v32_v10 }
 0x42d   :  { %v396_v21 = vpack.c.bf16 %v393_v19, %v393_v19 }
 0x42e   :  { %v4918_v22 = vpop.eup %4917  ;;  %v774_v19 = vsel %vm404_vm6, %v498_v15, 0 }
 0x42f   :  { %4478 = vmatmul.mubr.msk.bf16.vlgmr.msra.gmra.mxu1 %vm281_vm5, %v396_v21  ;;  %v395_v24 = vmul.f32 %v4918_v22, %v4914_v12 }
 0x430   :  { %4488 = vmatpush3.bf16.xpose.msra.mxu1 %v508_v23  ;;  %4489 = vmatprep.mubr.msk.bf16.mxu1 %vm5082_vm0, %v5081_v1  ;;  %v33_v23 = vld [vmem:[#allocation2 + $0x42] sm:$0xff] }
 0x431   :  { %v397_v26 = vpack.c.bf16 %v395_v24, %v395_v24  ;;  %4499 = vmatprep.subr.bf16.mxu1 %v5081_v1  ;;  %v722_v24 = vpack.c.bf16 %v33_v23, %v33_v23 }
 0x433   :  { %4484 = vmatmul.mubr.msk.bf16.vlgmr.msra.gmra.mxu0 %vm281_vm5, %v397_v26  ;;  %v727_v25 = vsel %vm404_vm6, %v722_v24, 0 }
 0x434   :  { %4494 = vmatpush3.bf16.xpose.msra.mxu0 %v559_v27  ;;  %4495 = vmatprep.mubr.msk.bf16.mxu0 %vm5082_vm0, %v5081_v1 }
 0x435   :  { %4505 = vmatprep.subr.bf16.mxu0 %v5081_v1 }
 0x437   :  { %4490 = vmatmul.mubr.msk.bf16.vlgmr.msra.gmra.mxu1 %vm281_vm5, %v501_v28 }
 0x438   :  { %4501 = vmatprep.mubr.msk.bf16.mxu1 %vm5082_vm0, %v5081_v1 }
 0x43b   :  { %4496 = vmatmul.mubr.msk.bf16.vlgmr.msra.gmra.mxu0 %vm281_vm5, %v552_v31 }
 0x43c   :  { %4507 = vmatprep.mubr.msk.bf16.mxu0 %vm5082_vm0, %v5081_v1 }
 0x4ef   :  { %v5216_v33 = vpop.f32.mrf.mxu1 }
 0x4f1   :  { %v4479_v34 = vpop.f32.mrf.mxu1 }
 0x4f3   :  { %v445_v35 = vpop.f32.mrf.mxu1  ;;  %v5218_v36 = vpop.f32.mrf.mxu0 }
 0x4f4   :  { %v497_v37 = vpack.c.bf16 %v5218_v36, %v5216_v33 }
 0x4f5   :  { %v4480_v38 = vpop.f32.mrf.mxu1  ;;  %v4485_v39 = vpop.f32.mrf.mxu0 }
 0x4f7   :  { %v494_v40 = vpop.f32.mrf.mxu0  ;;  %v544_v41 = vpop.f32.mrf.mxu1 }
 0x4f8   :  { %v601_v43 = vsel %vm281_vm5, %v544_v41, -inf }
 0x4f9   :  { %602 = vmax.xlane.f32.xlu1 %v601_v43  ;;  %v4486_v44 = vpop.f32.mrf.mxu0  ;;  %v4491_v45 = vpop.f32.mrf.mxu1 }
 0x4fb   :  { %v547_v46 = vpop.f32.mrf.mxu1  ;;  %v595_v47 = vpop.f32.mrf.mxu0 }
 0x4fc   :  { %v604_v49 = vsel %vm281_vm5, %v595_v47, -inf }
 0x4fd   :  { %v4492_v51 = vpop.f32.mrf.mxu1  ;;  %605 = vmax.xlane.f32.xlu0 %v604_v49  ;;  %v4497_v53 = vpop.f32.mrf.mxu0 }
 0x4ff   :  { %v598_v54 = vpop.f32.mrf.mxu0 }
 0x501   :  { %v4498_v55 = vpop.f32.mrf.mxu0 }
 0x582   :  { %v603_v56 = vpop.xlane.xlu1 %602 }
 0x583   :  { %v607_v57 = vsub.f32 %v544_v41, %v603_v56 }
 0x585   :  { %v609_v58 = vmul.f32 1.442695, %v607_v57 }
 0x586   :  { %v606_v59 = vpop.xlane.xlu0 %605 }
 0x587   :  { %4919 = vpow2.f32 %v609_v58  ;;  %v608_v60 = vsub.f32 %v595_v47, %v606_v59 }
 0x589   :  { %v611_v61 = vmul.f32 1.442695, %v608_v60 }
 0x58b   :  { %4921 = vpow2.f32 %v611_v61 }
 0x594   :  { %v4920_v62 = vpop.eup %4919 }
 0x595   :  { %v613_v63 = vsel %vm281_vm5, %v4920_v62, 0.0 }
 0x596   :  { %614 = vadd.xlane.f32.xlu0 %v613_v63 }
 0x598   :  { %v4922_v0 = vpop.eup %4921 }
 0x599   :  { %v616_v2 = vsel %vm281_vm5, %v4922_v0, 0.0 }
 0x59a   :  { %617 = vadd.xlane.f32.xlu1 %v616_v2 }
 0x5ab   :  { %673 = vrot.lane.b32.xlu1 %v5162_v48, %s5085_s20 }
 0x5ac   :  { %625 = vrot.lane.b32.xlu0 %v5158_v42, %s5085_s20 }
 0x5af   :  { %819 = vrot.lane.b32.xlu1 %v5158_v42, %s5086_s21 }
 0x5b0   :  { %869 = vrot.lane.b32.xlu0 %v5162_v48, %s5086_s21 }
 0x5b3   :  { %817 = vrot.lane.b32.xlu1 %v5167_v50, %s5086_s21 }
 0x5b4   :  { %867 = vrot.lane.b32.xlu0 %v5174_v52, %s5086_s21 }
 0x61f   :  { %v615_v3 = vpop.xlane.xlu0 %614 }
 0x620   :  { %4923 = vrcp.f32 %v615_v3 }
 0x623   :  { %v618_v4 = vpop.xlane.xlu1 %617  ;;  %v626_v5 = vpop.permute.xlu0 %625 }
 0x624   :  { %4925 = vrcp.f32 %v618_v4  ;;  %v631_v6 = vsel %vm404_vm6, %v626_v5, 0 }
 0x625   :  { %4500 = vmatpush3.bf16.msra.mxu1 %v631_v6 }
 0x626   :  { %4511 = vmatprep.subr.bf16.mxu1 %v5081_v1 }
 0x627   :  { %v674_v7 = vpop.permute.xlu1 %673  ;;  %v870_v20 = vpop.permute.xlu0 %869 }
 0x628   :  { %v679_v8 = vsel %vm404_vm6, %v674_v7, 0  ;;  %v875_v21 = vsel %vm281_vm5, %v870_v20, 0 }
 0x629   :  { %4506 = vmatpush3.bf16.msra.mxu0 %v679_v8 }
 0x62a   :  { %4517 = vmatprep.subr.bf16.mxu0 %v5081_v1 }
 0x62b   :  { %v868_v22 = vpop.permute.xlu0 %867  ;;  %v820_v28 = vpop.permute.xlu1 %819 }
 0x62d   :  { %v4924_v9 = vpop.eup %4923 }
 0x62e   :  { %v620_v11 = vmul.f32 %v4924_v9, %v4920_v62 }
 0x62f   :  { %v818_v41 = vpop.permute.xlu1 %817 }
 0x630   :  { %v623_v12 = vpack.c.bf16 %v620_v11, %v620_v11 }
 0x631   :  { %v4926_v16 = vpop.eup %4925 }
 0x632   :  { %4502 = vmatmul.mubr.msk.bf16.vlgmr.msra.gmra.mxu1 %vm281_vm5, %v623_v12  ;;  %v622_v17 = vmul.f32 %v4926_v16, %v4922_v0 }
 0x633   :  { %4513 = vmatprep.mubr.msk.bf16.mxu1 %vm5082_vm0, %v5081_v1  ;;  %4512 = vmatpush3.bf16.msra.mxu1 %v727_v25 }
 0x634   :  { %v624_v18 = vpack.c.bf16 %v622_v17, %v622_v17  ;;  %4523 = vmatprep.subr.bf16.mxu1 %v5081_v1 }
 0x636   :  { %4508 = vmatmul.mubr.msk.bf16.vlgmr.msra.gmra.mxu0 %vm281_vm5, %v624_v18 }
 0x637   :  { %4518 = vmatpush3.bf16.msra.mxu0 %v774_v19  ;;  %4519 = vmatprep.mubr.msk.bf16.mxu0 %vm5082_vm0, %v5081_v1 }
 0x638   :  { %4529 = vmatprep.subr.bf16.mxu0 %v5081_v1 }
 0x63e   :  { %4520 = vmatmul.mubr.msk.bf16.vlgmr.msra.gmra.mxu0 %vm281_vm5, %v497_v37  ;;  %v825_v37 = vsel %vm281_vm5, %v820_v28, 0 }
 0x63f   :  { %4530 = vmatpush3.bf16.xpose.msra.mxu0 %v875_v21  ;;  %4531 = vmatprep.mubr.msk.bf16.mxu0 %vm5082_vm0, %v5081_v1 }
 0x640   :  { %4541 = vmatprep.subr.bf16.mxu0 %v5081_v1 }
 0x646   :  { %4532 = vmatmul.mubr.msk.bf16.vlgmr.msra.gmra.mxu0 %vm281_vm5, %v868_v22 }
 0x647   :  { %4543 = vmatprep.mubr.msk.bf16.mxu0 %vm5082_vm0, %v5081_v1 }
 0x6f2   :  { %v667_v26 = vpop.f32.mrf.mxu1 }
 0x6f4   :  { %v4503_v27 = vpop.f32.mrf.mxu1 }
 0x6f6   :  { %v670_v31 = vpop.f32.mrf.mxu1  ;;  %v715_v33 = vpop.f32.mrf.mxu0 }
 0x6f7   :  { %v721_v34 = vpack.c.bf16 %v715_v33, %v667_v26 }
 0x6f8   :  { %v4504_v35 = vpop.f32.mrf.mxu1  ;;  %v4509_v36 = vpop.f32.mrf.mxu0 }
 0x6f9   :  { %4514 = vmatmul.mubr.msk.bf16.vlgmr.msra.gmra.mxu1 %vm281_vm5, %v721_v34 }
 0x6fa   :  { %4524 = vmatpush3.bf16.xpose.msra.mxu1 %v825_v37  ;;  %v718_v38 = vpop.f32.mrf.mxu0  ;;  %4525 = vmatprep.mubr.msk.bf16.mxu1 %vm5082_vm0, %v5081_v1  ;;  %v34_v37 = vld [vmem:[#allocation2 + $0x4a] sm:$0xff] }
 0x6fb   :  { %4535 = vmatprep.subr.bf16.mxu1 %v5081_v1  ;;  %v1038_v38 = vpack.c.bf16 %v34_v37, %v34_v37  ;;  %v4218_v37 = vld [vmem:[#allocation2 + $0x5a] ss:$0 sm:$0xff] }
 0x6fc   :  { %v4510_v39 = vpop.f32.mrf.mxu0 }
 0x6fd   :  { %v1043_v39 = vsel %vm404_vm6, %v1038_v38, 0 }
 0x6fe   :  { %v5268_v40 = vpop.f32.mrf.mxu0 }
 0x700   :  { %v4521_v43 = vpop.f32.mrf.mxu0 }
 0x701   :  { %4526 = vmatmul.mubr.msk.bf16.vlgmr.msra.gmra.mxu1 %vm281_vm5, %v818_v41 }
 0x702   :  { %v5271_v44 = vpop.f32.mrf.mxu0  ;;  %4537 = vmatprep.mubr.msk.bf16.mxu1 %vm5082_vm0, %v5081_v1 }
 0x704   :  { %v4522_v45 = vpop.f32.mrf.mxu0 }
 0x706   :  { %v911_v46 = vpop.f32.mrf.mxu0 }
 0x707   :  { %v920_v47 = vsel %vm281_vm5, %v911_v46, -inf }
 0x708   :  { %921 = vmax.xlane.f32.xlu0 %v920_v47  ;;  %v4533_v49 = vpop.f32.mrf.mxu0 }
 0x70a   :  { %v914_v51 = vpop.f32.mrf.mxu0 }
 0x70c   :  { %v4534_v53 = vpop.f32.mrf.mxu0 }
 0x791   :  { %v922_v54 = vpop.xlane.xlu0 %921 }
 0x792   :  { %v924_v55 = vsub.f32 %v911_v46, %v922_v54 }
 0x794   :  { %v927_v56 = vmul.f32 1.442695, %v924_v55 }
 0x796   :  { %4927 = vpow2.f32 %v927_v56 }
 0x7a3   :  { %v4928_v63 = vpop.eup %4927 }
 0x7a4   :  { %v932_v3 = vsel %vm281_vm5, %v4928_v63, 0.0 }
 0x7b9   :  { %v5276_v57 = vpop.f32.mrf.mxu1 }
 0x7bb   :  { %v4515_v58 = vpop.f32.mrf.mxu1 }
 0x7bc   :  { %v811_v58 = vadd.f32 %v5268_v40, %v5276_v57 }
 0x7bd   :  { %v5278_v59 = vpop.f32.mrf.mxu1 }
 0x7bf   :  { %v4516_v60 = vpop.f32.mrf.mxu1 }
 0x7c1   :  { %v861_v61 = vpop.f32.mrf.mxu1 }
 0x7c2   :  { %v917_v62 = vsel %vm281_vm5, %v861_v61, -inf }
 0x7c3   :  { %918 = vmax.xlane.f32.xlu1 %v917_v62  ;;  %v4527_v0 = vpop.f32.mrf.mxu1 }
 0x7c5   :  { %v864_v2 = vpop.f32.mrf.mxu1 }
 0x7c7   :  { %v4528_v4 = vpop.f32.mrf.mxu1  ;;  %933 = vadd.xlane.f32.xlu1 %v932_v3 }
 0x7d8   :  { %989 = vrot.lane.b32.xlu1 %v5162_v48, %s5087_s22 }
 0x7dc   :  { %1090 = vrot.lane.b32.xlu1 %v5158_v42, %s5088_s23 }
 0x7e0   :  { %1088 = vrot.lane.b32.xlu1 %v5167_v50, %s5088_s23 }
 0x84c   :  { %v919_v5 = vpop.xlane.xlu1 %918 }
 0x84d   :  { %v923_v6 = vsub.f32 %v861_v61, %v919_v5 }
 0x84f   :  { %v925_v7 = vmul.f32 1.442695, %v923_v6 }
 0x850   :  { %v934_v8 = vpop.xlane.xlu1 %933 }
 0x851   :  { %4929 = vpow2.f32 %v925_v7 }
 0x852   :  { %4931 = vrcp.f32 %v934_v8 }
 0x854   :  { %v990_v9 = vpop.permute.xlu1 %989 }
 0x855   :  { %v995_v10 = vsel %vm404_vm6, %v990_v9, 0 }
 0x856   :  { %4542 = vmatpush3.bf16.msra.mxu0 %v995_v10 }
 0x857   :  { %4553 = vmatprep.subr.bf16.mxu0 %v5081_v1 }
 0x858   :  { %v1091_v17 = vpop.permute.xlu1 %1090 }
 0x859   :  { %v1096_v18 = vsel %vm281_vm5, %v1091_v17, 0 }
 0x85c   :  { %v1089_v19 = vpop.permute.xlu1 %1088 }
 0x85e   :  { %v4930_v11 = vpop.eup %4929 }
 0x85f   :  { %v4932_v12 = vpop.eup %4931  ;;  %v929_v15 = vsel %vm281_vm5, %v4930_v11, 0.0 }
 0x860   :  { %930 = vadd.xlane.f32.xlu0 %v929_v15  ;;  %v938_v16 = vmul.f32 %v4932_v12, %v4928_v63  ;;  %v814_v63 = vadd.f32 %v5271_v44, %v5278_v59 }
 0x862   :  { %v940_v50 = vpack.c.bf16 %v938_v16, %v938_v16 }
 0x864   :  { %4544 = vmatmul.mubr.msk.bf16.vlgmr.msra.gmra.mxu0 %vm281_vm5, %v940_v50 }
 0x865   :  { %4554 = vmatpush3.bf16.xpose.msra.mxu0 %v1096_v18  ;;  %4555 = vmatprep.mubr.msk.bf16.mxu0 %vm5082_vm0, %v5081_v1 }
 0x866   :  { %4565 = vmatprep.subr.bf16.mxu0 %v5081_v1 }
 0x86c   :  { %4556 = vmatmul.mubr.msk.bf16.vlgmr.msra.gmra.mxu0 %vm281_vm5, %v1089_v19 }
 0x86d   :  { %4567 = vmatprep.mubr.msk.bf16.mxu0 %vm5082_vm0, %v5081_v1 }
 0x876   :  { %941 = vrot.lane.b32.xlu0 %v5158_v42, %s5087_s22 }
 0x87a   :  { %1140 = vrot.lane.b32.xlu0 %v5162_v48, %s5088_s23 }
 0x87e   :  { %1138 = vrot.lane.b32.xlu0 %v5174_v52, %s5088_s23 }
 0x8e9   :  { %v931_v20 = vpop.xlane.xlu0 %930 }
 0x8ea   :  { %4933 = vrcp.f32 %v931_v20 }
 0x8ed   :  { %v942_v21 = vpop.permute.xlu0 %941 }
 0x8ee   :  { %v947_v22 = vsel %vm404_vm6, %v942_v21, 0 }
 0x8ef   :  { %4536 = vmatpush3.bf16.msra.mxu1 %v947_v22 }
 0x8f0   :  { %4547 = vmatprep.subr.bf16.mxu1 %v5081_v1 }
 0x8f1   :  { %v1141_v41 = vpop.permute.xlu0 %1140 }
 0x8f2   :  { %v1146_v47 = vsel %vm281_vm5, %v1141_v41, 0 }
 0x8f5   :  { %v1139_v53 = vpop.permute.xlu0 %1138 }
 0x8f7   :  { %v4934_v23 = vpop.eup %4933 }
 0x8f8   :  { %v936_v24 = vmul.f32 %v4934_v23, %v4930_v11 }
 0x8fa   :  { %v939_v25 = vpack.c.bf16 %v936_v24, %v936_v24 }
 0x8fc   :  { %4538 = vmatmul.mubr.msk.bf16.vlgmr.msra.gmra.mxu1 %vm281_vm5, %v939_v25 }
 0x8fd   :  { %4549 = vmatprep.mubr.msk.bf16.mxu1 %vm5082_vm0, %v5081_v1  ;;  %4548 = vmatpush3.bf16.msra.mxu1 %v1043_v39 }
 0x8fe   :  { %4559 = vmatprep.subr.bf16.mxu1 %v5081_v1 }
 0x924   :  { %v1031_v26 = vpop.f32.mrf.mxu0 }
 0x926   :  { %v4545_v27 = vpop.f32.mrf.mxu0 }
 0x928   :  { %v1034_v28 = vpop.f32.mrf.mxu0 }
 0x92a   :  { %v4546_v52 = vpop.f32.mrf.mxu0 }
 0x92c   :  { %v1132_v31 = vpop.f32.mrf.mxu0 }
 0x92d   :  { %v1188_v33 = vsel %vm281_vm5, %v1132_v31, -inf }
 0x92e   :  { %1189 = vmax.xlane.f32.xlu1 %v1188_v33  ;;  %v4557_v34 = vpop.f32.mrf.mxu0 }
 0x930   :  { %v1135_v35 = vpop.f32.mrf.mxu0 }
 0x932   :  { %v4558_v36 = vpop.f32.mrf.mxu0 }
 0x9b7   :  { %v1190_v54 = vpop.xlane.xlu1 %1189 }
 0x9b8   :  { %v1194_v55 = vsub.f32 %v1132_v31, %v1190_v54 }
 0x9ba   :  { %v1196_v56 = vmul.f32 1.442695, %v1194_v55 }
 0x9bc   :  { %v983_v43 = vpop.f32.mrf.mxu1  ;;  %4935 = vpow2.f32 %v1196_v56 }
 0x9bd   :  { %v1037_v45 = vpack.c.bf16 %v1031_v26, %v983_v43 }
 0x9be   :  { %v4539_v46 = vpop.f32.mrf.mxu1 }
 0x9bf   :  { %4550 = vmatmul.mubr.msk.bf16.vlgmr.msra.gmra.mxu1 %vm281_vm5, %v1037_v45 }
 0x9c0   :  { %4560 = vmatpush3.bf16.xpose.msra.mxu1 %v1146_v47  ;;  %v986_v49 = vpop.f32.mrf.mxu1  ;;  %4561 = vmatprep.mubr.msk.bf16.mxu1 %vm5082_vm0, %v5081_v1 }
 0x9c1   :  { %4571 = vmatprep.subr.bf16.mxu1 %v5081_v1 }
 0x9c2   :  { %v4540_v51 = vpop.f32.mrf.mxu1 }
 0x9c7   :  { %4562 = vmatmul.mubr.msk.bf16.vlgmr.msra.gmra.mxu1 %vm281_vm5, %v1139_v53 }
 0x9c8   :  { %4573 = vmatprep.mubr.msk.bf16.mxu1 %vm5082_vm0, %v5081_v1 }
 0x9c9   :  { %v4936_v6 = vpop.eup %4935 }
 0x9ca   :  { %v1200_v40 = vsel %vm281_vm5, %v4936_v6, 0.0 }
 0xa7f   :  { %v1079_v60 = vpop.f32.mrf.mxu1 }
 0xa80   :  { %v5323_v61 = vadd.f32 %v1079_v60, %v811_v58 }
 0xa81   :  { %v4551_v62 = vpop.f32.mrf.mxu1 }
 0xa83   :  { %v1082_v0 = vpop.f32.mrf.mxu1 }
 0xa84   :  { %v5327_v2 = vadd.f32 %v1082_v0, %v814_v63 }
 0xa85   :  { %v4552_v3 = vpop.f32.mrf.mxu1 }
 0xa87   :  { %v1182_v4 = vpop.f32.mrf.mxu1 }
 0xa88   :  { %v1191_v5 = vsel %vm281_vm5, %v1182_v4, -inf }
 0xa89   :  { %1192 = vmax.xlane.f32.xlu0 %v1191_v5  ;;  %v4563_v7 = vpop.f32.mrf.mxu1  ;;  %v55_v5 = vld [vmem:[#allocation2 + $0xc1] sm:$0xff] }
 0xa8a   :  { %v57_v7 = vld [vmem:[#allocation2 + $0xd1] sm:$0xff] }
 0xa8b   :  { %v1185_v8 = vpop.f32.mrf.mxu1 }
 0xa8c   :  { %v58_v8 = vld [vmem:[#allocation2 + $0xd9] sm:$0xff] }
 0xa8d   :  { %v4564_v57 = vpop.f32.mrf.mxu1  ;;  %1201 = vadd.xlane.f32.xlu0 %v1200_v40 }
 0xa8e   :  { %v1554_v57 = vpack.c.bf16 %v58_v8, %v57_v7 }
 0xaa3   :  { %1212 = vrot.lane.b32.xlu0 %v5158_v42, %s5089_s24  ;;  %v35_v42 = vld [vmem:[#allocation2 + $0x52] sm:$0xff] }
 0xaa4   :  { %v1309_v19 = vpack.c.bf16 %v35_v42, %v35_v42 }
 0xaa6   :  { %v1314_v20 = vsel %vm404_vm6, %v1309_v19, 0 }
 0xb12   :  { %v1193_v44 = vpop.xlane.xlu0 %1192 }
 0xb13   :  { %v1195_v59 = vsub.f32 %v1182_v4, %v1193_v44  ;;  %v41_v44 = vld [vmem:[#allocation2 + $0x6d] sm:$0xff] }
 0xb15   :  { %v1198_v9 = vmul.f32 1.442695, %v1195_v59  ;;  %v42_v59 = vld [vmem:[#allocation2 + $0x75] sm:$0xff] }
 0xb16   :  { %v1202_v10 = vpop.xlane.xlu0 %1201 }
 0xb17   :  { %4937 = vpow2.f32 %v1198_v9  ;;  %v39_v9 = vld [vmem:[#allocation2 + $0x5d] sm:$0xff] }
 0xb18   :  { %4939 = vrcp.f32 %v1202_v10  ;;  %v1408_v10 = vpack.c.bf16 %v42_v59, %v41_v44 }
 0xb1a   :  { %v1213_v11 = vpop.permute.xlu0 %1212 }
 0xb1b   :  { %v1218_v12 = vsel %vm404_vm6, %v1213_v11, 0  ;;  %v40_v11 = vld [vmem:[#allocation2 + $0x65] sm:$0xff] }
 0xb1c   :  { %4566 = vmatpush3.bf16.msra.mxu0 %v1218_v12  ;;  %v1407_v12 = vpack.c.bf16 %v40_v11, %v39_v9 }
 0xb1d   :  { %4577 = vmatprep.subr.bf16.mxu0 %v5081_v1 }
 0xb24   :  { %v4938_v15 = vpop.eup %4937 }
 0xb25   :  { %v4940_v16 = vpop.eup %4939  ;;  %v1203_v17 = vsel %vm281_vm5, %v4938_v15, 0.0 }
 0xb26   :  { %1204 = vadd.xlane.f32.xlu1 %v1203_v17  ;;  %v1207_v50 = vmul.f32 %v4940_v16, %v4936_v6  ;;  %v56_v6 = vld [vmem:[#allocation2 + $0xc9] sm:$0xff]  ;;  %v51_v17 = vld [vmem:[#allocation2 + $0xb6] sm:$0xff] }
 0xb27   :  { %v1553_v40 = vpack.c.bf16 %v56_v6, %v55_v5  ;;  %v50_v16 = vld [vmem:[#allocation2 + $0xae] sm:$0xff] }
 0xb28   :  { %v1210_v18 = vpack.c.bf16 %v1207_v50, %v1207_v50  ;;  %v1463_v50 = vpack.c.bf16 %v51_v17, %v50_v16 }
 0xb2a   :  { %4568 = vmatmul.mubr.msk.bf16.vlgmr.msra.gmra.mxu0 %vm281_vm5, %v1210_v18 }
 0xb2b   :  { %4579 = vmatprep.mubr.msk.bf16.mxu0 %vm5082_vm0, %v5081_v1  ;;  %4578 = vmatpush3.bf16.msra.mxu0 %v1314_v20 }
 0xb2c   :  { %4591 = vmatprep.subr.bf16.mxu0 %v5081_v1 }
 0xb37   :  { %1260 = vrot.lane.b32.xlu1 %v5162_v48, %s5089_s24 }
 0xbaf   :  { %v1205_v21 = vpop.xlane.xlu1 %1204 }
 0xbb0   :  { %4941 = vrcp.f32 %v1205_v21 }
 0xbb3   :  { %v1261_v22 = vpop.permute.xlu1 %1260 }
 0xbb4   :  { %v1266_v23 = vsel %vm404_vm6, %v1261_v22, 0 }
 0xbb5   :  { %4572 = vmatpush3.bf16.msra.mxu1 %v1266_v23 }
 0xbb6   :  { %4583 = vmatprep.subr.bf16.mxu1 %v5081_v1 }
 0xbbd   :  { %v4942_v24 = vpop.eup %4941 }
 0xbbe   :  { %v1209_v25 = vmul.f32 %v4942_v24, %v4938_v15  ;;  %v5363_v15 = vld [vmem:[#allocation2 + $0xe1] ss:$0 sm:$0xff] }
 0xbc0   :  { %v1211_v26 = vpack.c.bf16 %v1209_v25, %v1209_v25  ;;  %v4219_v25 = vld [vmem:[#allocation2 + $0x5b] ss:$0 sm:$0xff] }
 0xbc2   :  { %4574 = vmatmul.mubr.msk.bf16.vlgmr.msra.gmra.mxu1 %vm281_vm5, %v1211_v26 }
 0xbc3   :  { %4587 = vmatprep.mubr.msk.bf16.mxu1 %vm5082_vm0, %v5081_v1  ;;  %4584 = vmatpush3.bf16.msra.mxu1 %v1408_v10 }
 0xbc4   :  { %4585 = vmatprep.subr.bf16.mxu1 %v5081_v1 }
 0xbc7   :  { %4586 = vmatpush3.bf16.msra.mxu1 %v1407_v12 }
 0xbc8   :  { %4603 = vmatprep.subr.bf16.mxu1 %v5081_v1 }
 0xbea   :  { %v1254_v48 = vpop.f32.mrf.mxu0 }
 0xbec   :  { %v4569_v27 = vpop.f32.mrf.mxu0 }
 0xbee   :  { %v1257_v28 = vpop.f32.mrf.mxu0 }
 0xbef   :  { %v4220_v28 = vld [vmem:[#allocation2 + $0x5c] ss:$0 sm:$0xff] }
 0xbf0   :  { %v4570_v52 = vpop.f32.mrf.mxu0 }
 0xc82   :  { %v1302_v31 = vpop.f32.mrf.mxu1 }
 0xc83   :  { %v1308_v33 = vpack.c.bf16 %v1302_v31, %v1254_v48 }
 0xc84   :  { %v4575_v34 = vpop.f32.mrf.mxu1 }
 0xc85   :  { %4580 = vmatmul.mubr.msk.bf16.vlgmr.msra.gmra.mxu0 %vm281_vm5, %v1308_v33 }
 0xc86   :  { %v1305_v35 = vpop.f32.mrf.mxu1  ;;  %4599 = vmatprep.mubr.msk.bf16.mxu0 %vm5082_vm0, %v5081_v1  ;;  %4592 = vmatpush3.bf16.msra.mxu0 %v1463_v50 }
 0xc87   :  { %4593 = vmatprep.subr.bf16.mxu0 %v5081_v1 }
 0xc88   :  { %v4576_v36 = vpop.f32.mrf.mxu1 }
 0xd45   :  { %v1350_v38 = vpop.f32.mrf.mxu0 }
 0xd46   :  { %v1357_v39 = vadd.f32 %v1350_v38, %v5323_v61  ;;  %v49_v38 = vld [vmem:[#allocation2 + $0xa6] sm:$0xff] }
 0xd47   :  { %v4581_v41 = vpop.f32.mrf.mxu0 }
 0xd48   :  { %v1363_v43 = vadd.f32 %v4218_v37, %v1357_v39  ;;  %v46_v41 = vld [vmem:[#allocation2 + $0x8e] sm:$0xff] }
 0xd49   :  { %v1353_v45 = vpop.f32.mrf.mxu0 }
 0xd4a   :  { %v1358_v46 = vadd.f32 %v1353_v45, %v5327_v2  ;;  %v1365_v47 = vadd.f32 %v1363_v43, %v5140_v29  ;;  %v47_v43 = vld [vmem:[#allocation2 + $0x96] sm:$0xff] }
 0xd4b   :  { %v4582_v49 = vpop.f32.mrf.mxu0  ;;  %v1461_v45 = vpack.c.bf16 %v47_v43, %v46_v41 }
 0xd4c   :  { %v1364_v51 = vadd.f32 %v4218_v37, %v1358_v46  ;;  %v1367_v53 = vsel %vm179_vm4, %v1365_v47, 0.0  ;;  %v48_v37 = vld [vmem:[#allocation2 + $0x9e] sm:$0xff] }
 0xd4d   :  { %1368 = vadd.xlane.f32.xlu1 %v1367_v53  ;;  %v1462_v39 = vpack.c.bf16 %v49_v38, %v48_v37  ;;  %v44_v46 = vld [vmem:[#allocation2 + $0x7e] sm:$0xff] }
 0xd4e   :  { %v1366_v54 = vadd.f32 %v1364_v51, %v5142_v30 }
 0xd4f   :  { %4594 = vmatpush3.bf16.msra.mxu0 %v1462_v39 }
 0xd50   :  { %v1370_v55 = vsel %vm179_vm4, %v1366_v54, 0.0  ;;  %4595 = vmatprep.subr.bf16.mxu0 %v5081_v1 }
 0xd51   :  { %1371 = vadd.xlane.f32.xlu0 %v1370_v55 }
 0xd53   :  { %4596 = vmatpush3.bf16.msra.mxu0 %v1461_v45 }
 0xd54   :  { %4597 = vmatprep.subr.bf16.mxu0 %v5081_v1 }
 0xdd6   :  { %v1369_v56 = vpop.xlane.xlu1 %1368 }
 0xdd7   :  { %v1374_v58 = vmul.f32 0.03125, %v1369_v56 }
 0xdd9   :  { %v1376_v60 = vsub.f32 %v1365_v47, %v1374_v58  ;;  %v45_v47 = vld [vmem:[#allocation2 + $0x86] sm:$0xff] }
 0xdda   :  { %v1372_v61 = vpop.xlane.xlu0 %1371  ;;  %v1460_v49 = vpack.c.bf16 %v45_v47, %v44_v46 }
 0xddb   :  { %v1375_v62 = vmul.f32 0.03125, %v1372_v61  ;;  %v1378_v63 = vmul.f32 %v1376_v60, %v1376_v60 }
 0xddc   :  { %4598 = vmatpush3.bf16.msra.mxu0 %v1460_v49 }
 0xddd   :  { %v1377_v0 = vsub.f32 %v1366_v54, %v1375_v62  ;;  %v1380_v2 = vsel %vm179_vm4, %v1378_v63, 0.0  ;;  %4619 = vmatprep.subr.bf16.mxu0 %v5081_v1 }
 0xdde   :  { %1381 = vadd.xlane.f32.xlu0 %v1380_v2 }
 0xddf   :  { %v1379_v3 = vmul.f32 %v1377_v0, %v1377_v0 }
 0xde1   :  { %v1383_v4 = vsel %vm179_vm4, %v1379_v3, 0.0 }
 0xde2   :  { %1384 = vadd.xlane.f32.xlu1 %v1383_v4 }
 0xdf3   :  { %1602 = vrot.lane.b32.xlu1 %v1553_v40, %s5083_s1 }
 0xdf4   :  { %1604 = vrot.lane.b32.xlu0 %v1554_v57, %s5083_s1 }
 0xdf7   :  { %1609 = vrot.lane.b32.xlu1 %v5363_v15, %s5083_s1 }
 0xe67   :  { %v1382_v18 = vpop.xlane.xlu0 %1381 }
 0xe68   :  { %v1386_v42 = vmul.f32 0.03125, %v1382_v18 }
 0xe6a   :  { %v1388_v19 = vadd.f32 1e-05, %v1386_v42 }
 0xe6b   :  { %v1385_v20 = vpop.xlane.xlu1 %1384  ;;  %v1605_v35 = vpop.permute.xlu0 %1604 }
 0xe6c   :  { %4943 = vrsqrt.f32 %v1388_v19  ;;  %v1387_v21 = vmul.f32 0.03125, %v1385_v20 }
 0xe6e   :  { %v1389_v22 = vadd.f32 1e-05, %v1387_v21  ;;  %v169_v21 = vshrl.u32 %v97_v13, 7 }
 0xe6f   :  { %v1603_v36 = vpop.permute.xlu1 %1602 }
 0xe70   :  { %4945 = vrsqrt.f32 %v1389_v22  ;;  %vm170_vm8 = vcmp.ge.s32.totalorder %v169_v21, %v5129_v14  ;;  %v5090_v22 = vmov -1e+09  }
 0xe73   :  { %v1610_v4 = vpop.permute.xlu1 %1609 }
 0xe79   :  { %v4944_v23 = vpop.eup %4943 }
 0xe7a   :  { %v1392_v24 = vmul.f32 %v4944_v23, %v1376_v60  ;;  %v5428_v23 = vsel %vm170_vm8, 0.0, %v5090_v22 }
 0xe7c   :  { %v1398_v27 = vmul.f32 %v4219_v25, %v1392_v24 }
 0xe7d   :  { %v4946_v26 = vpop.eup %4945 }
 0xe7e   :  { %v1393_v48 = vmul.f32 %v4946_v26, %v1377_v0  ;;  %v5368_v31 = vadd.f32 %v4220_v28, %v1398_v27 }
 0xe80   :  { %v1399_v52 = vmul.f32 %v4219_v25, %v1393_v48 }
 0xe82   :  { %v5370_v33 = vadd.f32 %v4220_v28, %v1399_v52 }
 0xe84   :  { %v1406_v34 = vpack.c.bf16 %v5370_v33, %v5368_v31 }
 0xe86   :  { %4588 = vmatmul.mubr.msk.bf16.vlgmr.msra.gmra.mxu1 %vm179_vm4, %v1406_v34 }
 0xe87   :  { %4604 = vmatpush3.bf16.msra.mxu1 %v1554_v57  ;;  %4607 = vmatprep.mubr.msk.bf16.mxu1 %vm5082_vm0, %v5081_v1 }
 0xe88   :  { %4605 = vmatprep.subr.bf16.mxu1 %v5081_v1 }
 0xe8b   :  { %4606 = vmatpush3.bf16.msra.mxu1 %v1553_v40 }
 0xe8c   :  { %4611 = vmatprep.subr.bf16.mxu1 %v5081_v1 }
 0xe8e   :  { %4608 = vmatmul.mubr.msk.bf16.vlgmr.msra.gmra.mxu1 %vm179_vm4, %v5146_v32 }
 0xe8f   :  { %4612 = vmatpush3.bf16.msra.mxu1 %v1605_v35  ;;  %4615 = vmatprep.mubr.msk.bf16.mxu1 %vm5082_vm0, %v5081_v1 }
 0xe90   :  { %4613 = vmatprep.subr.bf16.mxu1 %v5081_v1 }
 0xe93   :  { %4614 = vmatpush3.bf16.msra.mxu1 %v1603_v36 }
 0xe94   :  { %4625 = vmatprep.subr.bf16.mxu1 %v5081_v1 }
 0xe96   :  { %4616 = vmatmul.mubr.msk.bf16.vlgmr.msra.gmra.mxu1 %vm179_vm4, %v5146_v32  ;;  %v4221_v32 = vld [vmem:[#allocation2 + $0x7d] ss:$0 sm:$0xff] }
 0xe97   :  { %4627 = vmatprep.mubr.msk.bf16.mxu1 %vm5082_vm0, %v5081_v1 }
 0xf46   :  { %v1450_v51 = vpop.f32.mrf.mxu1 }
 0xf47   :  { %v1451_v54 = vadd.f32 %v4221_v32, %v1450_v51 }
 0xf48   :  { %v4589_v53 = vpop.f32.mrf.mxu1 }
 0xf49   :  { %v1457_v60 = vmax.f32 %v1451_v54, 0.0 }
 0xf4a   :  { %v1453_v55 = vpop.f32.mrf.mxu1 }
 0xf4b   :  { %v1454_v56 = vadd.f32 %v4221_v32, %v1453_v55 }
 0xf4c   :  { %v4590_v58 = vpop.f32.mrf.mxu1 }
 0xf4d   :  { %v1458_v61 = vmax.f32 %v1454_v56, 0.0 }
 0xf4e   :  { %v1593_v62 = vpop.f32.mrf.mxu1 }
 0xf4f   :  { %v1459_v63 = vpack.c.bf16 %v1458_v61, %v1457_v60  ;;  %v1594_v9 = vadd.f32 %v5363_v15, %v1593_v62 }
 0xf50   :  { %v4609_v0 = vpop.f32.mrf.mxu1 }
 0xf51   :  { %4600 = vmatmul.mubr.msk.bf16.vlgmr.msra.gmra.mxu0 %vm1468_vm7, %v1459_v63  ;;  %v5405_v12 = vpack.c.bf16 %v1594_v9, %v1594_v9 }
 0xf52   :  { %v1596_v2 = vpop.f32.mrf.mxu1  ;;  %4621 = vmatprep.mubr.msk.bf16.mxu0 %vm5082_vm0, %v5081_v1 }
 0xf53   :  { %v1597_v16 = vadd.f32 %v5363_v15, %v1596_v2  ;;  %v5421_v15 = vld [vmem:[#allocation2 + $0xbe] ss:$0 sm:$0xff] }
 0xf54   :  { %v4610_v3 = vpop.f32.mrf.mxu1 }
 0xf55   :  { %v5413_v17 = vpack.c.bf16 %v1597_v16, %v1597_v16 }
 0xf56   :  { %v1646_v5 = vpop.f32.mrf.mxu1 }
 0xf57   :  { %v1647_v6 = vadd.f32 %v1646_v5, %v1610_v4 }
 0xf58   :  { %v4617_v7 = vpop.f32.mrf.mxu1 }
 0xf59   :  { %v5395_v8 = vpack.c.bf16 %v1647_v6, %v1647_v6 }
 0xf5a   :  { %v1649_v40 = vpop.f32.mrf.mxu1 }
 0xf5b   :  { %v1650_v57 = vadd.f32 %v1649_v40, %v1610_v4  ;;  %v1661_v44 = vsel %vm281_vm5, %v5395_v8, 0 }
 0xf5c   :  { %v4618_v59 = vpop.f32.mrf.mxu1  ;;  %4620 = vmatpush3.bf16.xpose.msra.mxu0 %v1661_v44 }
 0xf5d   :  { %v5400_v10 = vpack.c.bf16 %v1650_v57, %v1650_v57  ;;  %4631 = vmatprep.subr.bf16.mxu0 %v5081_v1 }
 0xf5f   :  { %v1707_v11 = vsel %vm281_vm5, %v5400_v10, 0 }
 0xf60   :  { %4626 = vmatpush3.bf16.xpose.msra.mxu1 %v1707_v11 }
 0xf61   :  { %4637 = vmatprep.subr.bf16.mxu1 %v5081_v1 }
 0xf63   :  { %4622 = vmatmul.mubr.msk.bf16.vlgmr.msra.gmra.mxu0 %vm281_vm5, %v5405_v12 }
 0xf64   :  { %4633 = vmatprep.mubr.msk.bf16.mxu0 %vm5082_vm0, %v5081_v1 }
 0xf67   :  { %4628 = vmatmul.mubr.msk.bf16.vlgmr.msra.gmra.mxu1 %vm281_vm5, %v5413_v17 }
 0xf68   :  { %4639 = vmatprep.mubr.msk.bf16.mxu1 %vm5082_vm0, %v5081_v1 }
0x1011   :  { %v5419_v50 = vpop.f32.mrf.mxu0 }
0x1013   :  { %v4601_v18 = vpop.f32.mrf.mxu0 }
0x1015   :  { %v1509_v42 = vpop.f32.mrf.mxu0 }
0x1016   :  { %v5424_v19 = vadd.f32 %v5421_v15, %v1509_v42 }
0x1017   :  { %v4602_v20 = vpop.f32.mrf.mxu0 }
0x1023   :  { %v1697_v24 = vpop.f32.mrf.mxu0 }
0x1024   :  { %v1698_v25 = vadd.f32 %v1697_v24, %v5428_v23 }
0x1025   :  { %v4623_v26 = vpop.f32.mrf.mxu0 }
0x1026   :  { %v1749_v48 = vsel %vm281_vm5, %v1698_v25, -inf }
0x1027   :  { %v1743_v27 = vpop.f32.mrf.mxu1  ;;  %1750 = vmax.xlane.f32.xlu0 %v1749_v48  ;;  %v1700_v28 = vpop.f32.mrf.mxu0 }
0x1028   :  { %v1744_v52 = vadd.f32 %v1743_v27, %v5428_v23 }
0x1029   :  { %v4624_v34 = vpop.f32.mrf.mxu0  ;;  %v4629_v35 = vpop.f32.mrf.mxu1 }
0x102a   :  { %v1752_v13 = vsel %vm281_vm5, %v1744_v52, -inf }
0x102b   :  { %1753 = vmax.xlane.f32.xlu1 %v1752_v13  ;;  %v1746_v14 = vpop.f32.mrf.mxu1 }
0x102d   :  { %v4630_v36 = vpop.f32.mrf.mxu1 }
0x103c   :  { %1774 = vrot.lane.b32.xlu1 %v5395_v8, %s5083_s1 }
0x1040   :  { %1876 = vrot.lane.b32.xlu1 %v5395_v8, %s5084_s0 }
0x1044   :  { %1927 = vrot.lane.b32.xlu1 %v5400_v10, %s5084_s0 }
0x1048   :  { %1925 = vrot.lane.b32.xlu1 %v5413_v17, %s5084_s0 }
0x10b0   :  { %v1751_v37 = vpop.xlane.xlu0 %1750 }
0x10b1   :  { %v1755_v38 = vsub.f32 %v1698_v25, %v1751_v37 }
0x10b3   :  { %v1757_v39 = vmul.f32 1.442695, %v1755_v38 }
0x10b4   :  { %v1754_v41 = vpop.xlane.xlu1 %1753 }
0x10b5   :  { %4947 = vpow2.f32 %v1757_v39  ;;  %v1756_v43 = vsub.f32 %v1744_v52, %v1754_v41 }
0x10b7   :  { %v1759_v45 = vmul.f32 1.442695, %v1756_v43 }
0x10b8   :  { %v1775_v46 = vpop.permute.xlu1 %1774 }
0x10b9   :  { %4949 = vpow2.f32 %v1759_v45  ;;  %v1780_v47 = vsel %vm404_vm6, %v1775_v46, 0 }
0x10ba   :  { %4632 = vmatpush3.bf16.msra.mxu0 %v1780_v47 }
0x10bb   :  { %4643 = vmatprep.subr.bf16.mxu0 %v5081_v1 }
0x10bc   :  { %v1877_v61 = vpop.permute.xlu1 %1876 }
0x10bd   :  { %v1882_v2 = vsel %vm281_vm5, %v1877_v61, 0 }
0x10c0   :  { %v1928_v4 = vpop.permute.xlu1 %1927 }
0x10c1   :  { %v1933_v6 = vsel %vm281_vm5, %v1928_v4, 0 }
0x10c2   :  { %v4948_v49 = vpop.eup %4947 }
0x10c3   :  { %v1761_v32 = vsel %vm281_vm5, %v4948_v49, 0.0 }
0x10c4   :  { %1762 = vadd.xlane.f32.xlu0 %v1761_v32  ;;  %v1926_v40 = vpop.permute.xlu1 %1925 }
0x10c6   :  { %v4950_v51 = vpop.eup %4949 }
0x10c7   :  { %v1764_v53 = vsel %vm281_vm5, %v4950_v51, 0.0 }
0x10c8   :  { %1765 = vadd.xlane.f32.xlu0 %v1764_v53 }
0x10de   :  { %1823 = vrot.lane.b32.xlu0 %v5400_v10, %s5083_s1 }
0x10e2   :  { %1874 = vrot.lane.b32.xlu0 %v5405_v12, %s5084_s0 }
0x114d   :  { %v1763_v54 = vpop.xlane.xlu0 %1762 }
0x114e   :  { %4951 = vrcp.f32 %v1763_v54 }
0x1151   :  { %v1766_v55 = vpop.xlane.xlu0 %1765 }
0x1152   :  { %4953 = vrcp.f32 %v1766_v55 }
0x1155   :  { %v1824_v56 = vpop.permute.xlu0 %1823 }
0x1156   :  { %v1829_v58 = vsel %vm404_vm6, %v1824_v56, 0 }
0x1157   :  { %4638 = vmatpush3.bf16.msra.mxu1 %v1829_v58  ;;  %v60_v58 = vld [vmem:[#allocation2 + $0xe2] sm:$0xff] }
0x1158   :  { %4649 = vmatprep.subr.bf16.mxu1 %v5081_v1 }
0x1159   :  { %v1875_v7 = vpop.permute.xlu0 %1874 }
0x115b   :  { %v4952_v60 = vpop.eup %4951 }
0x115c   :  { %v1768_v62 = vmul.f32 %v4952_v60, %v4948_v49 }
0x115e   :  { %v1771_v63 = vpack.c.bf16 %v1768_v62, %v1768_v62  ;;  %v1872_v62 = vpack.c.bf16 %v60_v58, %v60_v58 }
0x115f   :  { %v4954_v0 = vpop.eup %4953 }
0x1160   :  { %4634 = vmatmul.mubr.msk.bf16.vlgmr.msra.gmra.mxu0 %vm281_vm5, %v1771_v63  ;;  %v1770_v3 = vmul.f32 %v4954_v0, %v4950_v51 }
0x1161   :  { %4644 = vmatpush3.bf16.xpose.msra.mxu0 %v1882_v2  ;;  %4645 = vmatprep.mubr.msk.bf16.mxu0 %vm5082_vm0, %v5081_v1 }
0x1162   :  { %v1772_v5 = vpack.c.bf16 %v1770_v3, %v1770_v3  ;;  %4655 = vmatprep.subr.bf16.mxu0 %v5081_v1  ;;  %v2148_v3 = vsel %vm404_vm6, %v1872_v62, 0 }
0x1164   :  { %4640 = vmatmul.mubr.msk.bf16.vlgmr.msra.gmra.mxu1 %vm281_vm5, %v1772_v5 }
0x1165   :  { %4650 = vmatpush3.bf16.xpose.msra.mxu1 %v1933_v6  ;;  %4651 = vmatprep.mubr.msk.bf16.mxu1 %vm5082_vm0, %v5081_v1 }
0x1166   :  { %4661 = vmatprep.subr.bf16.mxu1 %v5081_v1 }
0x1168   :  { %4646 = vmatmul.mubr.msk.bf16.vlgmr.msra.gmra.mxu0 %vm281_vm5, %v1875_v7 }
0x1169   :  { %4657 = vmatprep.mubr.msk.bf16.mxu0 %vm5082_vm0, %v5081_v1 }
0x116c   :  { %4652 = vmatmul.mubr.msk.bf16.vlgmr.msra.gmra.mxu1 %vm281_vm5, %v1926_v40  ;;  %v61_v40 = vld [vmem:[#allocation2 + $0xea] sm:$0xff] }
0x116d   :  { %4663 = vmatprep.mubr.msk.bf16.mxu1 %vm5082_vm0, %v5081_v1 }
0x1220   :  { %v5468_v57 = vpop.f32.mrf.mxu0 }
0x1222   :  { %v4635_v44 = vpop.f32.mrf.mxu0 }
0x1223   :  { %v2096_v44 = vpack.c.bf16 %v61_v40, %v61_v40 }
0x1224   :  { %v1819_v59 = vpop.f32.mrf.mxu0  ;;  %v5470_v9 = vpop.f32.mrf.mxu1 }
0x1225   :  { %v1871_v11 = vpack.c.bf16 %v5470_v9, %v5468_v57  ;;  %v2101_v59 = vsel %vm404_vm6, %v2096_v44, 0 }
0x1226   :  { %v4636_v16 = vpop.f32.mrf.mxu0  ;;  %v4641_v18 = vpop.f32.mrf.mxu1 }
0x1228   :  { %v1868_v42 = vpop.f32.mrf.mxu1  ;;  %v1918_v20 = vpop.f32.mrf.mxu0 }
0x1229   :  { %v1919_v21 = vadd.f32 %v1918_v20, %v5428_v23 }
0x122a   :  { %v4642_v22 = vpop.f32.mrf.mxu1  ;;  %v4647_v24 = vpop.f32.mrf.mxu0 }
0x122b   :  { %v1975_v25 = vsel %vm281_vm5, %v1919_v21, -inf }
0x122c   :  { %v1969_v26 = vpop.f32.mrf.mxu1  ;;  %1976 = vmax.xlane.f32.xlu0 %v1975_v25  ;;  %v1921_v48 = vpop.f32.mrf.mxu0 }
0x122d   :  { %v1970_v27 = vadd.f32 %v1969_v26, %v5428_v23 }
0x122e   :  { %v4648_v28 = vpop.f32.mrf.mxu0  ;;  %v4653_v52 = vpop.f32.mrf.mxu1 }
0x122f   :  { %v1978_v34 = vsel %vm281_vm5, %v1970_v27, -inf }
0x1230   :  { %1979 = vmax.xlane.f32.xlu1 %v1978_v34  ;;  %v1972_v35 = vpop.f32.mrf.mxu1 }
0x1232   :  { %v4654_v13 = vpop.f32.mrf.mxu1 }
0x1241   :  { %1999 = vrot.lane.b32.xlu1 %v5395_v8, %s5085_s20 }
0x1245   :  { %2193 = vrot.lane.b32.xlu1 %v5395_v8, %s5086_s21 }
0x1249   :  { %2243 = vrot.lane.b32.xlu1 %v5400_v10, %s5086_s21 }
0x124d   :  { %2241 = vrot.lane.b32.xlu1 %v5413_v17, %s5086_s21 }
0x12b5   :  { %v1977_v14 = vpop.xlane.xlu0 %1976 }
0x12b6   :  { %v1981_v36 = vsub.f32 %v1919_v21, %v1977_v14 }
0x12b8   :  { %v1983_v37 = vmul.f32 1.442695, %v1981_v36 }
0x12b9   :  { %v1980_v38 = vpop.xlane.xlu1 %1979 }
0x12ba   :  { %4955 = vpow2.f32 %v1983_v37  ;;  %v1982_v39 = vsub.f32 %v1970_v27, %v1980_v38 }
0x12bc   :  { %v1985_v41 = vmul.f32 1.442695, %v1982_v39 }
0x12bd   :  { %v2000_v43 = vpop.permute.xlu1 %1999 }
0x12be   :  { %4957 = vpow2.f32 %v1985_v41  ;;  %v2005_v45 = vsel %vm404_vm6, %v2000_v43, 0 }
0x12bf   :  { %4656 = vmatpush3.bf16.msra.mxu0 %v2005_v45 }
0x12c0   :  { %4667 = vmatprep.subr.bf16.mxu0 %v5081_v1 }
0x12c1   :  { %v2194_v4 = vpop.permute.xlu1 %2193 }
0x12c2   :  { %v2199_v21 = vsel %vm281_vm5, %v2194_v4, 0 }
0x12c5   :  { %v2244_v5 = vpop.permute.xlu1 %2243 }
0x12c6   :  { %v2249_v6 = vsel %vm281_vm5, %v2244_v5, 0 }
0x12c7   :  { %v4956_v46 = vpop.eup %4955 }
0x12c8   :  { %v1987_v47 = vsel %vm281_vm5, %v4956_v46, 0.0 }
0x12c9   :  { %1988 = vadd.xlane.f32.xlu0 %v1987_v47  ;;  %v2242_v7 = vpop.permute.xlu1 %2241 }
0x12cb   :  { %v4958_v49 = vpop.eup %4957 }
0x12cc   :  { %v1990_v32 = vsel %vm281_vm5, %v4958_v49, 0.0 }
0x12cd   :  { %1991 = vadd.xlane.f32.xlu0 %v1990_v32 }
0x12e3   :  { %2047 = vrot.lane.b32.xlu0 %v5400_v10, %s5085_s20 }
0x12e7   :  { %2191 = vrot.lane.b32.xlu0 %v5405_v12, %s5086_s21 }
0x1352   :  { %v1989_v51 = vpop.xlane.xlu0 %1988 }
0x1353   :  { %4959 = vrcp.f32 %v1989_v51 }
0x1356   :  { %v1992_v53 = vpop.xlane.xlu0 %1991 }
0x1357   :  { %4961 = vrcp.f32 %v1992_v53 }
0x135a   :  { %v2048_v54 = vpop.permute.xlu0 %2047 }
0x135b   :  { %v2053_v55 = vsel %vm404_vm6, %v2048_v54, 0 }
0x135c   :  { %4662 = vmatpush3.bf16.msra.mxu1 %v2053_v55 }
0x135d   :  { %4673 = vmatprep.subr.bf16.mxu1 %v5081_v1 }
0x135e   :  { %v2192_v26 = vpop.permute.xlu0 %2191 }
0x1360   :  { %v4960_v56 = vpop.eup %4959 }
0x1361   :  { %v1994_v60 = vmul.f32 %v4960_v56, %v4956_v46 }
0x1363   :  { %v1997_v61 = vpack.c.bf16 %v1994_v60, %v1994_v60 }
0x1364   :  { %v4962_v63 = vpop.eup %4961 }
0x1365   :  { %4658 = vmatmul.mubr.msk.bf16.vlgmr.msra.gmra.mxu0 %vm281_vm5, %v1997_v61  ;;  %v1996_v0 = vmul.f32 %v4962_v63, %v4958_v49 }
0x1366   :  { %4669 = vmatprep.mubr.msk.bf16.mxu0 %vm5082_vm0, %v5081_v1  ;;  %4668 = vmatpush3.bf16.msra.mxu0 %v2101_v59 }
0x1367   :  { %v1998_v2 = vpack.c.bf16 %v1996_v0, %v1996_v0  ;;  %4679 = vmatprep.subr.bf16.mxu0 %v5081_v1 }
0x1369   :  { %4664 = vmatmul.mubr.msk.bf16.vlgmr.msra.gmra.mxu1 %vm281_vm5, %v1998_v2 }
0x136a   :  { %4674 = vmatpush3.bf16.msra.mxu1 %v2148_v3  ;;  %4675 = vmatprep.mubr.msk.bf16.mxu1 %vm5082_vm0, %v5081_v1 }
0x136b   :  { %4685 = vmatprep.subr.bf16.mxu1 %v5081_v1 }
0x1371   :  { %4676 = vmatmul.mubr.msk.bf16.vlgmr.msra.gmra.mxu1 %vm281_vm5, %v1871_v11 }
0x1372   :  { %4686 = vmatpush3.bf16.xpose.msra.mxu1 %v2249_v6  ;;  %4687 = vmatprep.mubr.msk.bf16.mxu1 %vm5082_vm0, %v5081_v1 }
0x1373   :  { %4697 = vmatprep.subr.bf16.mxu1 %v5081_v1 }
0x1379   :  { %4688 = vmatmul.mubr.msk.bf16.vlgmr.msra.gmra.mxu1 %vm281_vm5, %v2242_v7 }
0x137a   :  { %4699 = vmatprep.mubr.msk.bf16.mxu1 %vm5082_vm0, %v5081_v1 }
0x1425   :  { %v2041_v57 = vpop.f32.mrf.mxu0 }
0x1427   :  { %v4659_v9 = vpop.f32.mrf.mxu0 }
0x1429   :  { %v2044_v11 = vpop.f32.mrf.mxu0  ;;  %v2089_v16 = vpop.f32.mrf.mxu1 }
0x142a   :  { %v2095_v18 = vpack.c.bf16 %v2089_v16, %v2041_v57  ;;  %v62_v16 = vld [vmem:[#allocation2 + $0xf2] sm:$0xff] }
0x142b   :  { %v4660_v42 = vpop.f32.mrf.mxu0  ;;  %v4665_v20 = vpop.f32.mrf.mxu1 }
0x142c   :  { %4670 = vmatmul.mubr.msk.bf16.vlgmr.msra.gmra.mxu0 %vm281_vm5, %v2095_v18  ;;  %v2412_v18 = vpack.c.bf16 %v62_v16, %v62_v16 }
0x142d   :  { %4680 = vmatpush3.bf16.xpose.msra.mxu0 %v2199_v21  ;;  %v2092_v22 = vpop.f32.mrf.mxu1  ;;  %4681 = vmatprep.mubr.msk.bf16.mxu0 %vm5082_vm0, %v5081_v1 }
0x142e   :  { %4691 = vmatprep.subr.bf16.mxu0 %v5081_v1  ;;  %v2417_v42 = vsel %vm404_vm6, %v2412_v18, 0 }
0x142f   :  { %v4666_v24 = vpop.f32.mrf.mxu1 }
0x1431   :  { %v5522_v25 = vpop.f32.mrf.mxu1 }
0x1433   :  { %v4677_v48 = vpop.f32.mrf.mxu1 }
0x1434   :  { %4682 = vmatmul.mubr.msk.bf16.vlgmr.msra.gmra.mxu0 %vm281_vm5, %v2192_v26 }
0x1435   :  { %v5525_v27 = vpop.f32.mrf.mxu1  ;;  %4693 = vmatprep.mubr.msk.bf16.mxu0 %vm5082_vm0, %v5081_v1 }
0x1437   :  { %v4678_v28 = vpop.f32.mrf.mxu1 }
0x1439   :  { %v2285_v52 = vpop.f32.mrf.mxu1 }
0x143a   :  { %v2286_v34 = vadd.f32 %v2285_v52, %v5428_v23 }
0x143b   :  { %v4689_v35 = vpop.f32.mrf.mxu1 }
0x143c   :  { %v2294_v13 = vsel %vm281_vm5, %v2286_v34, -inf }
0x143d   :  { %2295 = vmax.xlane.f32.xlu1 %v2294_v13  ;;  %v2288_v14 = vpop.f32.mrf.mxu1 }
0x143f   :  { %v4690_v36 = vpop.f32.mrf.mxu1 }
0x144e   :  { %2315 = vrot.lane.b32.xlu1 %v5395_v8, %s5087_s22 }
0x1452   :  { %2464 = vrot.lane.b32.xlu1 %v5395_v8, %s5088_s23 }
0x1456   :  { %2514 = vrot.lane.b32.xlu1 %v5400_v10, %s5088_s23 }
0x145a   :  { %2512 = vrot.lane.b32.xlu1 %v5413_v17, %s5088_s23 }
0x14c6   :  { %v2296_v37 = vpop.xlane.xlu1 %2295 }
0x14c7   :  { %v2298_v41 = vsub.f32 %v2286_v34, %v2296_v37 }
0x14c9   :  { %v2301_v43 = vmul.f32 1.442695, %v2298_v41 }
0x14ca   :  { %v2316_v38 = vpop.permute.xlu1 %2315 }
0x14cb   :  { %v2321_v39 = vsel %vm404_vm6, %v2316_v38, 0  ;;  %4963 = vpow2.f32 %v2301_v43 }
0x14cc   :  { %4692 = vmatpush3.bf16.msra.mxu0 %v2321_v39 }
0x14cd   :  { %4703 = vmatprep.subr.bf16.mxu0 %v5081_v1 }
0x14ce   :  { %v2465_v40 = vpop.permute.xlu1 %2464 }
0x14cf   :  { %v2470_v59 = vsel %vm281_vm5, %v2465_v40, 0 }
0x14d2   :  { %v2515_v48 = vpop.permute.xlu1 %2514 }
0x14d3   :  { %v2520_v37 = vsel %vm281_vm5, %v2515_v48, 0 }
0x14d6   :  { %v2513_v43 = vpop.permute.xlu1 %2512 }
0x14d8   :  { %v4964_v54 = vpop.eup %4963 }
0x14d9   :  { %v2306_v58 = vsel %vm281_vm5, %v4964_v54, 0.0 }
0x14ec   :  { %v5541_v45 = vpop.f32.mrf.mxu0 }
0x14ee   :  { %v4671_v46 = vpop.f32.mrf.mxu0 }
0x14f0   :  { %v5543_v47 = vpop.f32.mrf.mxu0 }
0x14f2   :  { %v4672_v49 = vpop.f32.mrf.mxu0 }
0x14f4   :  { %v2235_v32 = vpop.f32.mrf.mxu0 }
0x14f5   :  { %v2236_v51 = vadd.f32 %v2235_v32, %v5428_v23 }
0x14f6   :  { %v4683_v17 = vpop.f32.mrf.mxu0 }
0x14f7   :  { %v2291_v53 = vsel %vm281_vm5, %v2236_v51, -inf }
0x14f8   :  { %2292 = vmax.xlane.f32.xlu0 %v2291_v53  ;;  %v2238_v55 = vpop.f32.mrf.mxu0  ;;  %v2185_v53 = vadd.f32 %v5522_v25, %v5541_v45  ;;  %v1507_v45 = vadd.f32 %v5421_v15, %v5419_v50  ;;  %v1514_v15 = vadd.f32 %v5424_v19, %v5370_v33 }
0x14fa   :  { %v4684_v56 = vpop.f32.mrf.mxu0 }
0x14fc   :  { %2307 = vadd.xlane.f32.xlu0 %v2306_v58  ;;  %v2188_v58 = vadd.f32 %v5525_v27, %v5543_v47  ;;  %v1513_v27 = vadd.f32 %v1507_v45, %v5368_v31 }
0x14fe   :  { %v1515_v47 = vsel %vm179_vm4, %v1513_v27, 0.0 }
0x1581   :  { %v2293_v60 = vpop.xlane.xlu0 %2292 }
0x1582   :  { %v2297_v61 = vsub.f32 %v2236_v51, %v2293_v60 }
0x1584   :  { %v2299_v62 = vmul.f32 1.442695, %v2297_v61 }
0x1585   :  { %v2308_v2 = vpop.xlane.xlu0 %2307 }
0x1586   :  { %4965 = vpow2.f32 %v2299_v62 }
0x1587   :  { %4967 = vrcp.f32 %v2308_v2 }
0x1593   :  { %v4966_v63 = vpop.eup %4965 }
0x1594   :  { %v2303_v0 = vsel %vm281_vm5, %v4966_v63, 0.0  ;;  %v4968_v3 = vpop.eup %4967 }
0x1595   :  { %2304 = vadd.xlane.f32.xlu0 %v2303_v0  ;;  %v2312_v5 = vmul.f32 %v4968_v3, %v4964_v54 }
0x1597   :  { %v2314_v44 = vpack.c.bf16 %v2312_v5, %v2312_v5 }
0x15ab   :  { %2363 = vrot.lane.b32.xlu0 %v5400_v10, %s5087_s22 }
0x15af   :  { %2462 = vrot.lane.b32.xlu0 %v5405_v12, %s5088_s23 }
0x161e   :  { %v2305_v4 = vpop.xlane.xlu0 %2304 }
0x161f   :  { %4969 = vrcp.f32 %v2305_v4 }
0x1622   :  { %v2364_v6 = vpop.permute.xlu0 %2363 }
0x1623   :  { %v2369_v7 = vsel %vm404_vm6, %v2364_v6, 0 }
0x1624   :  { %4698 = vmatpush3.bf16.msra.mxu1 %v2369_v7 }
0x1625   :  { %4709 = vmatprep.subr.bf16.mxu1 %v5081_v1 }
0x1626   :  { %v2463_v9 = vpop.permute.xlu0 %2462 }
0x1627   :  { %4700 = vmatmul.mubr.msk.bf16.vlgmr.msra.gmra.mxu1 %vm281_vm5, %v2314_v44 }
0x1628   :  { %4710 = vmatpush3.bf16.xpose.msra.mxu1 %v2470_v59  ;;  %4711 = vmatprep.mubr.msk.bf16.mxu1 %vm5082_vm0, %v5081_v1 }
0x1629   :  { %4721 = vmatprep.subr.bf16.mxu1 %v5081_v1 }
0x162c   :  { %v4970_v12 = vpop.eup %4969 }
0x162d   :  { %v2310_v57 = vmul.f32 %v4970_v12, %v4966_v63 }
0x162f   :  { %4712 = vmatmul.mubr.msk.bf16.vlgmr.msra.gmra.mxu1 %vm281_vm5, %v2463_v9  ;;  %v2313_v11 = vpack.c.bf16 %v2310_v57, %v2310_v57  ;;  %v1518_v57 = vsel %vm179_vm4, %v1514_v15, 0.0  ;;  %v63_v9 = vld [vmem:[#allocation2 + $0xfa] sm:$0xff] }
0x1630   :  { %4723 = vmatprep.mubr.msk.bf16.mxu1 %vm5082_vm0, %v5081_v1 }
0x1631   :  { %4694 = vmatmul.mubr.msk.bf16.vlgmr.msra.gmra.mxu0 %vm281_vm5, %v2313_v11  ;;  %v2683_v11 = vpack.c.bf16 %v63_v9, %v63_v9 }
0x1632   :  { %4705 = vmatprep.mubr.msk.bf16.mxu0 %vm5082_vm0, %v5081_v1  ;;  %4704 = vmatpush3.bf16.msra.mxu0 %v2417_v42 }
0x1633   :  { %4715 = vmatprep.subr.bf16.mxu0 %v5081_v1  ;;  %v2688_v16 = vsel %vm404_vm6, %v2683_v11, 0 }
0x16e7   :  { %v2405_v20 = vpop.f32.mrf.mxu1 }
0x16e9   :  { %v4701_v21 = vpop.f32.mrf.mxu1 }
0x16eb   :  { %v2408_v22 = vpop.f32.mrf.mxu1 }
0x16ed   :  { %v4702_v24 = vpop.f32.mrf.mxu1 }
0x16ef   :  { %v2506_v26 = vpop.f32.mrf.mxu1 }
0x16f0   :  { %v2507_v28 = vadd.f32 %v2506_v26, %v5428_v23 }
0x16f1   :  { %v2357_v52 = vpop.f32.mrf.mxu0  ;;  %v4713_v34 = vpop.f32.mrf.mxu1 }
0x16f2   :  { %v2411_v35 = vpack.c.bf16 %v2405_v20, %v2357_v52  ;;  %v2562_v13 = vsel %vm281_vm5, %v2507_v28, -inf }
0x16f3   :  { %2563 = vmax.xlane.f32.xlu0 %v2562_v13  ;;  %v4695_v14 = vpop.f32.mrf.mxu0  ;;  %v2509_v36 = vpop.f32.mrf.mxu1 }
0x16f4   :  { %4706 = vmatmul.mubr.msk.bf16.vlgmr.msra.gmra.mxu0 %vm281_vm5, %v2411_v35 }
0x16f5   :  { %4716 = vmatpush3.bf16.xpose.msra.mxu0 %v2520_v37  ;;  %v2360_v38 = vpop.f32.mrf.mxu0  ;;  %v4714_v39 = vpop.f32.mrf.mxu1  ;;  %4717 = vmatprep.mubr.msk.bf16.mxu0 %vm5082_vm0, %v5081_v1  ;;  %v4250_v37 = vld [vmem:[#allocation2 + $0x102] ss:$0 sm:$0xff] }
0x16f6   :  { %4727 = vmatprep.subr.bf16.mxu0 %v5081_v1 }
0x16f7   :  { %v4696_v41 = vpop.f32.mrf.mxu0 }
0x16fc   :  { %4718 = vmatmul.mubr.msk.bf16.vlgmr.msra.gmra.mxu0 %vm281_vm5, %v2513_v43 }
0x16fd   :  { %4729 = vmatprep.mubr.msk.bf16.mxu0 %vm5082_vm0, %v5081_v1 }
0x177c   :  { %v2564_v46 = vpop.xlane.xlu0 %2563 }
0x177d   :  { %v2568_v49 = vsub.f32 %v2507_v28, %v2564_v46 }
0x177f   :  { %v2570_v32 = vmul.f32 1.442695, %v2568_v49 }
0x1781   :  { %4971 = vpow2.f32 %v2570_v32 }
0x178e   :  { %v4972_v51 = vpop.eup %4971 }
0x178f   :  { %v2574_v17 = vsel %vm281_vm5, %v4972_v51, 0.0 }
0x1790   :  { %2575 = vadd.xlane.f32.xlu0 %v2574_v17 }
0x17b4   :  { %v2453_v54 = vpop.f32.mrf.mxu0 }
0x17b5   :  { %v5581_v55 = vadd.f32 %v2453_v54, %v2185_v53 }
0x17b6   :  { %v4707_v56 = vpop.f32.mrf.mxu0 }
0x17b8   :  { %v2456_v60 = vpop.f32.mrf.mxu0 }
0x17b9   :  { %v5585_v61 = vadd.f32 %v2456_v60, %v2188_v58 }
0x17ba   :  { %v4708_v62 = vpop.f32.mrf.mxu0 }
0x17bc   :  { %v2556_v63 = vpop.f32.mrf.mxu0 }
0x17bd   :  { %v2557_v0 = vadd.f32 %v2556_v63, %v5428_v23 }
0x17be   :  { %v4719_v2 = vpop.f32.mrf.mxu0 }
0x17bf   :  { %v2565_v3 = vsel %vm281_vm5, %v2557_v0, -inf  ;;  %v70_v2 = vld [vmem:[#allocation2 + $0x11d] sm:$0xff] }
0x17c0   :  { %2566 = vmax.xlane.f32.xlu1 %v2565_v3  ;;  %v2559_v4 = vpop.f32.mrf.mxu0 }
0x17c1   :  { %v67_v4 = vld [vmem:[#allocation2 + $0x105] sm:$0xff] }
0x17c2   :  { %v4720_v25 = vpop.f32.mrf.mxu0 }
0x17c3   :  { %v68_v25 = vld [vmem:[#allocation2 + $0x10d] sm:$0xff] }
0x17c4   :  { %v2780_v45 = vpack.c.bf16 %v68_v25, %v67_v4 }
0x17d1   :  { %2586 = vrot.lane.b32.xlu1 %v5395_v8, %s5089_s24 }
0x17f5   :  { %1516 = vadd.xlane.f32.xlu1 %v1515_v47 }
0x1819   :  { %v2576_v5 = vpop.xlane.xlu0 %2575 }
0x181a   :  { %4973 = vrcp.f32 %v2576_v5 }
0x1827   :  { %v4974_v23 = vpop.eup %4973 }
0x1828   :  { %v2581_v44 = vmul.f32 %v4974_v23, %v4972_v51 }
0x182a   :  { %v2584_v8 = vpack.c.bf16 %v2581_v44, %v2581_v44 }
0x1849   :  { %v2567_v6 = vpop.xlane.xlu1 %2566 }
0x184a   :  { %v2569_v7 = vsub.f32 %v2557_v0, %v2567_v6 }
0x184c   :  { %v2572_v40 = vmul.f32 1.442695, %v2569_v7 }
0x184d   :  { %v2587_v59 = vpop.permute.xlu1 %2586 }
0x184e   :  { %4975 = vpow2.f32 %v2572_v40  ;;  %v2592_v12 = vsel %vm404_vm6, %v2587_v59, 0 }
0x184f   :  { %4722 = vmatpush3.bf16.msra.mxu1 %v2592_v12  ;;  %v5630_v12 = vld [vmem:[#allocation2 + $0x125] ss:$0 sm:$0xff] }
0x1850   :  { %4733 = vmatprep.subr.bf16.mxu1 %v5081_v1 }
0x1852   :  { %4724 = vmatmul.mubr.msk.bf16.vlgmr.msra.gmra.mxu1 %vm281_vm5, %v2584_v8 }
0x1853   :  { %4735 = vmatprep.mubr.msk.bf16.mxu1 %vm5082_vm0, %v5081_v1  ;;  %4734 = vmatpush3.bf16.msra.mxu1 %v2688_v16 }
0x1854   :  { %4747 = vmatprep.subr.bf16.mxu1 %v5081_v1 }
0x185b   :  { %v4976_v31 = vpop.eup %4975 }
0x185c   :  { %v2577_v50 = vsel %vm281_vm5, %v4976_v31, 0.0 }
0x185d   :  { %2578 = vadd.xlane.f32.xlu0 %v2577_v50 }
0x1873   :  { %2634 = vrot.lane.b32.xlu0 %v5400_v10, %s5089_s24 }
0x187e   :  { %v1517_v13 = vpop.xlane.xlu1 %1516 }
0x187f   :  { %v1521_v14 = vmul.f32 0.03125, %v1517_v13 }
0x1881   :  { %v1523_v43 = vsub.f32 %v1513_v27, %v1521_v14 }
0x1883   :  { %v1525_v60 = vmul.f32 %v1523_v43, %v1523_v43 }
0x1892   :  { %1519 = vadd.xlane.f32.xlu0 %v1518_v57 }
0x18e6   :  { %v2579_v18 = vpop.xlane.xlu0 %2578 }
0x18e7   :  { %4977 = vrcp.f32 %v2579_v18 }
0x18ea   :  { %v2635_v42 = vpop.permute.xlu0 %2634 }
0x18eb   :  { %v2640_v20 = vsel %vm404_vm6, %v2635_v42, 0 }
0x18ec   :  { %4728 = vmatpush3.bf16.msra.mxu0 %v2640_v20 }
0x18ed   :  { %4739 = vmatprep.subr.bf16.mxu0 %v5081_v1 }
0x18f4   :  { %v4978_v10 = vpop.eup %4977 }
0x18f5   :  { %v2583_v33 = vmul.f32 %v4978_v10, %v4976_v31 }
0x18f7   :  { %v2585_v19 = vpack.c.bf16 %v2583_v33, %v2583_v33  ;;  %v4225_v33 = vld [vmem:[#allocation2 + $0xbf] ss:$0 sm:$0xff] }
0x18f9   :  { %4730 = vmatmul.mubr.msk.bf16.vlgmr.msra.gmra.mxu0 %vm281_vm5, %v2585_v19 }
0x18fa   :  { %4743 = vmatprep.mubr.msk.bf16.mxu0 %vm5082_vm0, %v5081_v1 }
0x1912   :  { %v2628_v21 = vpop.f32.mrf.mxu1 }
0x1914   :  { %v4725_v22 = vpop.f32.mrf.mxu1 }
0x1916   :  { %v2631_v24 = vpop.f32.mrf.mxu1 }
0x1918   :  { %v4726_v26 = vpop.f32.mrf.mxu1 }
0x191b   :  { %v1520_v36 = vpop.xlane.xlu0 %1519 }
0x191c   :  { %v1522_v46 = vmul.f32 0.03125, %v1520_v36 }
0x191e   :  { %v1524_v54 = vsub.f32 %v1514_v15, %v1522_v46  ;;  %v4252_v46 = vld [vmem:[#allocation2 + $0x104] ss:$0 sm:$0xff] }
0x1920   :  { %v1526_v0 = vmul.f32 %v1524_v54, %v1524_v54 }
0x19b9   :  { %v2676_v48 = vpop.f32.mrf.mxu0 }
0x19ba   :  { %v2682_v28 = vpack.c.bf16 %v2676_v48, %v2628_v21 }
0x19bb   :  { %v4731_v52 = vpop.f32.mrf.mxu0 }
0x19bc   :  { %4736 = vmatmul.mubr.msk.bf16.vlgmr.msra.gmra.mxu1 %vm281_vm5, %v2682_v28  ;;  %v4226_v28 = vld [vmem:[#allocation2 + $0xc0] ss:$0 sm:$0xff] }
0x19bd   :  { %v2679_v34 = vpop.f32.mrf.mxu0  ;;  %4751 = vmatprep.mubr.msk.bf16.mxu1 %vm5082_vm0, %v5081_v1 }
0x19bf   :  { %v4732_v35 = vpop.f32.mrf.mxu0 }
0x1a7c   :  { %v2724_v38 = vpop.f32.mrf.mxu1 }
0x1a7d   :  { %v2731_v39 = vadd.f32 %v2724_v38, %v5581_v55  ;;  %v1527_v55 = vsel %vm179_vm4, %v1525_v60, 0.0  ;;  %v4251_v38 = vld [vmem:[#allocation2 + $0x103] ss:$0 sm:$0xff] }
0x1a7e   :  { %v4737_v41 = vpop.f32.mrf.mxu1 }
0x1a7f   :  { %v2737_v49 = vadd.f32 %v4250_v37, %v2731_v39 }
0x1a80   :  { %v2727_v32 = vpop.f32.mrf.mxu1 }
0x1a81   :  { %v2732_v51 = vadd.f32 %v2727_v32, %v5585_v61  ;;  %v2739_v17 = vadd.f32 %v2737_v49, %v5140_v29  ;;  %v1530_v61 = vsel %vm179_vm4, %v1526_v0, 0.0  ;;  %v69_v29 = vld [vmem:[#allocation2 + $0x115] sm:$0xff] }
0x1a82   :  { %v4738_v53 = vpop.f32.mrf.mxu1  ;;  %v2781_v3 = vpack.c.bf16 %v70_v2, %v69_v29 }
0x1a83   :  { %v2738_v56 = vadd.f32 %v4250_v37, %v2732_v51  ;;  %v2741_v58 = vsel %vm179_vm4, %v2739_v17, 0.0 }
0x1a84   :  { %2742 = vadd.xlane.f32.xlu1 %v2741_v58  ;;  %4740 = vmatpush3.bf16.msra.mxu0 %v2781_v3 }
0x1a85   :  { %v2740_v62 = vadd.f32 %v2738_v56, %v5142_v30  ;;  %4741 = vmatprep.subr.bf16.mxu0 %v5081_v1 }
0x1a87   :  { %v2744_v63 = vsel %vm179_vm4, %v2740_v62, 0.0 }
0x1a88   :  { %1528 = vadd.xlane.f32.xlu1 %v1527_v55  ;;  %2745 = vadd.xlane.f32.xlu0 %v2744_v63 }
0x1a89   :  { %4742 = vmatpush3.bf16.msra.mxu0 %v2780_v45 }
0x1a8a   :  { %4755 = vmatprep.subr.bf16.mxu0 %v5081_v1 }
0x1a8c   :  { %1531 = vadd.xlane.f32.xlu0 %v1530_v61 }
0x1b0d   :  { %v2743_v30 = vpop.xlane.xlu1 %2742 }
0x1b0e   :  { %v2747_v27 = vmul.f32 0.03125, %v2743_v30 }
0x1b10   :  { %v2749_v47 = vsub.f32 %v2739_v17, %v2747_v27 }
0x1b11   :  { %v2746_v5 = vpop.xlane.xlu0 %2745  ;;  %v1529_v31 = vpop.xlane.xlu1 %1528 }
0x1b12   :  { %v2748_v23 = vmul.f32 0.03125, %v2746_v5  ;;  %v2751_v6 = vmul.f32 %v2749_v47, %v2749_v47  ;;  %v1533_v15 = vmul.f32 0.03125, %v1529_v31 }
0x1b14   :  { %v2750_v7 = vsub.f32 %v2740_v62, %v2748_v23  ;;  %v2753_v40 = vsel %vm179_vm4, %v2751_v6, 0.0  ;;  %v1535_v9 = vadd.f32 1e-05, %v1533_v15 }
0x1b15   :  { %2754 = vadd.xlane.f32.xlu1 %v2753_v40  ;;  %v1532_v8 = vpop.xlane.xlu0 %1531 }
0x1b16   :  { %v2752_v44 = vmul.f32 %v2750_v7, %v2750_v7  ;;  %v1534_v50 = vmul.f32 0.03125, %v1532_v8 }
0x1b18   :  { %v2756_v59 = vsel %vm179_vm4, %v2752_v44, 0.0  ;;  %v1536_v57 = vadd.f32 1e-05, %v1534_v50 }
0x1b19   :  { %2757 = vadd.xlane.f32.xlu0 %v2756_v59 }
0x1b1a   :  { %4979 = vrsqrt.f32 %v1536_v57 }
0x1b1b   :  { %4981 = vrsqrt.f32 %v1535_v9 }
0x1b26   :  { %2835 = vrot.lane.b32.xlu1 %v2781_v3, %s5083_s1 }
0x1b27   :  { %v4980_v11 = vpop.eup %4979 }
0x1b28   :  { %v4982_v16 = vpop.eup %4981  ;;  %v1540_v18 = vmul.f32 %v4980_v11, %v1524_v54 }
0x1b29   :  { %v1539_v42 = vmul.f32 %v4982_v16, %v1523_v43 }
0x1b2a   :  { %2840 = vrot.lane.b32.xlu1 %v5630_v12, %s5083_s1  ;;  %v1546_v19 = vmul.f32 %v4225_v33, %v1540_v18 }
0x1b2b   :  { %v1545_v26 = vmul.f32 %v4225_v33, %v1539_v42 }
0x1b2c   :  { %v1552_v52 = vadd.f32 %v4226_v28, %v1546_v19 }
0x1b2d   :  { %v1551_v13 = vadd.f32 %v4226_v28, %v1545_v26 }
0x1b2f   :  { %2833 = vrot.lane.b32.xlu0 %v2780_v45, %s5083_s1  ;;  %v2830_v14 = vpack.c.bf16 %v1552_v52, %v1551_v13 }
0x1b9e   :  { %v2755_v20 = vpop.xlane.xlu1 %2754 }
0x1b9f   :  { %v2759_v10 = vmul.f32 0.03125, %v2755_v20 }
0x1ba1   :  { %v2761_v21 = vadd.f32 1e-05, %v2759_v10 }
0x1ba2   :  { %v2836_v22 = vpop.permute.xlu1 %2835  ;;  %v2758_v24 = vpop.xlane.xlu0 %2757 }
0x1ba3   :  { %4983 = vrsqrt.f32 %v2761_v21  ;;  %v2760_v48 = vmul.f32 0.03125, %v2758_v24  ;;  %4748 = vmatpush3.bf16.msra.mxu1 %v2836_v22 }
0x1ba4   :  { %4749 = vmatprep.subr.bf16.mxu1 %v5081_v1 }
0x1ba5   :  { %v2762_v34 = vadd.f32 1e-05, %v2760_v48 }
0x1ba6   :  { %v2834_v35 = vpop.permute.xlu0 %2833  ;;  %v2841_v53 = vpop.permute.xlu1 %2840 }
0x1ba7   :  { %4985 = vrsqrt.f32 %v2762_v34  ;;  %4750 = vmatpush3.bf16.msra.mxu1 %v2834_v35 }
0x1ba8   :  { %4761 = vmatprep.subr.bf16.mxu1 %v5081_v1 }
0x1baa   :  { %4752 = vmatmul.mubr.msk.bf16.vlgmr.msra.gmra.mxu1 %vm179_vm4, %v2830_v14 }
0x1bab   :  { %4763 = vmatprep.mubr.msk.bf16.mxu1 %vm5082_vm0, %v5081_v1 }
0x1bb0   :  { %v4984_v36 = vpop.eup %4983 }
0x1bb1   :  { %v2765_v37 = vmul.f32 %v4984_v36, %v2749_v47 }
0x1bb3   :  { %v2771_v43 = vmul.f32 %v4251_v38, %v2765_v37 }
0x1bb4   :  { %v4986_v39 = vpop.eup %4985 }
0x1bb5   :  { %v2766_v41 = vmul.f32 %v4986_v39, %v2750_v7  ;;  %v5639_v32 = vadd.f32 %v4252_v46, %v2771_v43 }
0x1bb7   :  { %v2772_v49 = vmul.f32 %v4251_v38, %v2766_v41 }
0x1bb9   :  { %v5641_v51 = vadd.f32 %v4252_v46, %v2772_v49 }
0x1bbb   :  { %v2779_v17 = vpack.c.bf16 %v5641_v51, %v5639_v32 }
0x1bbd   :  { %4744 = vmatmul.mubr.msk.bf16.vlgmr.msra.gmra.mxu0 %vm179_vm4, %v2779_v17 }
0x1bbe   :  { %4757 = vmatprep.mubr.msk.bf16.mxu0 %vm5082_vm0, %v5081_v1 }
0x1c6a   :  { %v2880_v54 = vpop.f32.mrf.mxu1 }
0x1c6b   :  { %v2881_v56 = vadd.f32 %v2880_v54, %v2841_v53 }
0x1c6c   :  { %v4753_v58 = vpop.f32.mrf.mxu1 }
0x1c6d   :  { %v5648_v60 = vpack.c.bf16 %v2881_v56, %v2881_v56 }
0x1c6e   :  { %v2883_v62 = vpop.f32.mrf.mxu1 }
0x1c6f   :  { %v2884_v55 = vadd.f32 %v2883_v62, %v2841_v53  ;;  %v2895_v63 = vsel %vm281_vm5, %v5648_v60, 0 }
0x1c70   :  { %v4754_v0 = vpop.f32.mrf.mxu1  ;;  %4756 = vmatpush3.bf16.xpose.msra.mxu0 %v2895_v63 }
0x1c71   :  { %v5652_v61 = vpack.c.bf16 %v2884_v55, %v2884_v55  ;;  %4767 = vmatprep.subr.bf16.mxu0 %v5081_v1 }
0x1c73   :  { %v2941_v29 = vsel %vm281_vm5, %v5652_v61, 0 }
0x1c74   :  { %4762 = vmatpush3.bf16.xpose.msra.mxu1 %v2941_v29 }
0x1c75   :  { %4773 = vmatprep.subr.bf16.mxu1 %v5081_v1 }
0x1c7d   :  { %v2823_v2 = vpop.f32.mrf.mxu0 }
0x1c7e   :  { %v2824_v3 = vadd.f32 %v5630_v12, %v2823_v2 }
0x1c7f   :  { %v4745_v4 = vpop.f32.mrf.mxu0 }
0x1c80   :  { %v5659_v25 = vpack.c.bf16 %v2824_v3, %v2824_v3 }
0x1c81   :  { %v2826_v45 = vpop.f32.mrf.mxu0 }
0x1c82   :  { %v2827_v30 = vadd.f32 %v5630_v12, %v2826_v45  ;;  %4758 = vmatmul.mubr.msk.bf16.vlgmr.msra.gmra.mxu0 %vm281_vm5, %v5659_v25 }
0x1c83   :  { %v4746_v27 = vpop.f32.mrf.mxu0  ;;  %4769 = vmatprep.mubr.msk.bf16.mxu0 %vm5082_vm0, %v5081_v1 }
0x1c84   :  { %v5666_v47 = vpack.c.bf16 %v2827_v30, %v2827_v30 }
0x1c86   :  { %4764 = vmatmul.mubr.msk.bf16.vlgmr.msra.gmra.mxu1 %vm281_vm5, %v5666_v47 }
0x1c87   :  { %4775 = vmatprep.mubr.msk.bf16.mxu1 %vm5082_vm0, %v5081_v1 }
0x1d42   :  { %v2931_v5 = vpop.f32.mrf.mxu0 }
0x1d43   :  { %v2983_v23 = vsel %vm281_vm5, %v2931_v5, -inf }
0x1d44   :  { %2984 = vmax.xlane.f32.xlu1 %v2983_v23  ;;  %v4759_v6 = vpop.f32.mrf.mxu0 }
0x1d46   :  { %v2934_v7 = vpop.f32.mrf.mxu0  ;;  %v2977_v40 = vpop.f32.mrf.mxu1 }
0x1d47   :  { %v2986_v44 = vsel %vm281_vm5, %v2977_v40, -inf }
0x1d48   :  { %2987 = vmax.xlane.f32.xlu0 %v2986_v44  ;;  %v4760_v59 = vpop.f32.mrf.mxu0  ;;  %v4765_v12 = vpop.f32.mrf.mxu1 }
0x1d4a   :  { %v2980_v8 = vpop.f32.mrf.mxu1 }
0x1d4c   :  { %v4766_v31 = vpop.f32.mrf.mxu1 }
0x1d55   :  { %3057 = vrot.lane.b32.xlu1 %v5652_v61, %s5083_s1 }
0x1d5e   :  { %3008 = vrot.lane.b32.xlu0 %v5648_v60, %s5083_s1 }
0x1dcd   :  { %v2985_v50 = vpop.xlane.xlu1 %2984 }
0x1dce   :  { %v2989_v15 = vsub.f32 %v2931_v5, %v2985_v50 }
0x1dd0   :  { %v2991_v57 = vmul.f32 1.442695, %v2989_v15 }
0x1dd1   :  { %v2988_v9 = vpop.xlane.xlu0 %2987  ;;  %v3058_v11 = vpop.permute.xlu1 %3057 }
0x1dd2   :  { %4987 = vpow2.f32 %v2991_v57  ;;  %v2990_v16 = vsub.f32 %v2977_v40, %v2988_v9  ;;  %v3063_v18 = vsel %vm404_vm6, %v3058_v11, 0 }
0x1dd3   :  { %4774 = vmatpush3.bf16.msra.mxu1 %v3063_v18 }
0x1dd4   :  { %v2993_v42 = vmul.f32 1.442695, %v2990_v16  ;;  %4785 = vmatprep.subr.bf16.mxu1 %v5081_v1 }
0x1dd5   :  { %v3009_v20 = vpop.permute.xlu0 %3008 }
0x1dd6   :  { %4989 = vpow2.f32 %v2993_v42  ;;  %v3014_v10 = vsel %vm404_vm6, %v3009_v20, 0  ;;  %v72_v42 = vld [vmem:[#allocation2 + $0x126] sm:$0xff] }
0x1dd7   :  { %4768 = vmatpush3.bf16.msra.mxu0 %v3014_v10 }
0x1dd8   :  { %4779 = vmatprep.subr.bf16.mxu0 %v5081_v1 }
0x1ddf   :  { %v4988_v33 = vpop.eup %4987 }
0x1de0   :  { %v2995_v19 = vsel %vm281_vm5, %v4988_v33, 0.0 }
0x1de1   :  { %2996 = vadd.xlane.f32.xlu0 %v2995_v19 }
0x1de3   :  { %v4990_v21 = vpop.eup %4989 }
0x1de4   :  { %v2998_v22 = vsel %vm281_vm5, %v4990_v21, 0.0 }
0x1de5   :  { %2999 = vadd.xlane.f32.xlu1 %v2998_v22 }
0x1df6   :  { %3110 = vrot.lane.b32.xlu1 %v5648_v60, %s5084_s0 }
0x1df7   :  { %3161 = vrot.lane.b32.xlu0 %v5652_v61, %s5084_s0 }
0x1dfa   :  { %3108 = vrot.lane.b32.xlu1 %v5659_v25, %s5084_s0 }
0x1dfb   :  { %3159 = vrot.lane.b32.xlu0 %v5666_v47, %s5084_s0 }
0x1e6a   :  { %v2997_v24 = vpop.xlane.xlu0 %2996 }
0x1e6b   :  { %4991 = vrcp.f32 %v2997_v24 }
0x1e6e   :  { %v3000_v26 = vpop.xlane.xlu1 %2999  ;;  %v3162_v36 = vpop.permute.xlu0 %3161 }
0x1e6f   :  { %4993 = vrcp.f32 %v3000_v26  ;;  %v3167_v38 = vsel %vm281_vm5, %v3162_v36, 0 }
0x1e72   :  { %v3111_v52 = vpop.permute.xlu1 %3110  ;;  %v3160_v41 = vpop.permute.xlu0 %3159 }
0x1e73   :  { %v3116_v13 = vsel %vm281_vm5, %v3111_v52, 0  ;;  %v73_v52 = vld [vmem:[#allocation2 + $0x12e] sm:$0xff] }
0x1e76   :  { %v3109_v39 = vpop.permute.xlu1 %3108 }
0x1e78   :  { %v4992_v48 = vpop.eup %4991 }
0x1e79   :  { %v3002_v28 = vmul.f32 %v4992_v48, %v4988_v33  ;;  %v3106_v33 = vpack.c.bf16 %v72_v42, %v72_v42 }
0x1e7b   :  { %v3005_v34 = vpack.c.bf16 %v3002_v28, %v3002_v28  ;;  %v3382_v24 = vsel %vm404_vm6, %v3106_v33, 0 }
0x1e7c   :  { %v4994_v35 = vpop.eup %4993 }
0x1e7d   :  { %4770 = vmatmul.mubr.msk.bf16.vlgmr.msra.gmra.mxu0 %vm281_vm5, %v3005_v34  ;;  %v3004_v14 = vmul.f32 %v4994_v35, %v4990_v21  ;;  %v3330_v34 = vpack.c.bf16 %v73_v52, %v73_v52 }
0x1e7e   :  { %4780 = vmatpush3.bf16.xpose.msra.mxu0 %v3116_v13  ;;  %4781 = vmatprep.mubr.msk.bf16.mxu0 %vm5082_vm0, %v5081_v1 }
0x1e7f   :  { %v3006_v37 = vpack.c.bf16 %v3004_v14, %v3004_v14  ;;  %4791 = vmatprep.subr.bf16.mxu0 %v5081_v1  ;;  %v3335_v35 = vsel %vm404_vm6, %v3330_v34, 0 }
0x1e81   :  { %4776 = vmatmul.mubr.msk.bf16.vlgmr.msra.gmra.mxu1 %vm281_vm5, %v3006_v37 }
0x1e82   :  { %4786 = vmatpush3.bf16.xpose.msra.mxu1 %v3167_v38  ;;  %4787 = vmatprep.mubr.msk.bf16.mxu1 %vm5082_vm0, %v5081_v1 }
0x1e83   :  { %4797 = vmatprep.subr.bf16.mxu1 %v5081_v1 }
0x1e85   :  { %4782 = vmatmul.mubr.msk.bf16.vlgmr.msra.gmra.mxu0 %vm281_vm5, %v3109_v39 }
0x1e86   :  { %4793 = vmatprep.mubr.msk.bf16.mxu0 %vm5082_vm0, %v5081_v1 }
0x1e89   :  { %4788 = vmatmul.mubr.msk.bf16.vlgmr.msra.gmra.mxu1 %vm281_vm5, %v3160_v41 }
0x1e8a   :  { %4799 = vmatprep.mubr.msk.bf16.mxu1 %vm5082_vm0, %v5081_v1 }
0x1f3d   :  { %v5708_v43 = vpop.f32.mrf.mxu0 }
0x1f3f   :  { %v4771_v46 = vpop.f32.mrf.mxu0 }
0x1f41   :  { %v3053_v49 = vpop.f32.mrf.mxu0  ;;  %v5710_v17 = vpop.f32.mrf.mxu1 }
0x1f42   :  { %v3105_v53 = vpack.c.bf16 %v5710_v17, %v5708_v43 }
0x1f43   :  { %v4772_v54 = vpop.f32.mrf.mxu0  ;;  %v4777_v56 = vpop.f32.mrf.mxu1 }
0x1f45   :  { %v3102_v58 = vpop.f32.mrf.mxu1  ;;  %v3152_v62 = vpop.f32.mrf.mxu0 }
0x1f46   :  { %v3209_v55 = vsel %vm281_vm5, %v3152_v62, -inf }
0x1f47   :  { %v4778_v63 = vpop.f32.mrf.mxu1  ;;  %3210 = vmax.xlane.f32.xlu1 %v3209_v55  ;;  %v4783_v0 = vpop.f32.mrf.mxu0 }
0x1f49   :  { %v3155_v29 = vpop.f32.mrf.mxu0  ;;  %v3203_v2 = vpop.f32.mrf.mxu1 }
0x1f4a   :  { %v3212_v3 = vsel %vm281_vm5, %v3203_v2, -inf }
0x1f4b   :  { %3213 = vmax.xlane.f32.xlu0 %v3212_v3  ;;  %v4784_v4 = vpop.f32.mrf.mxu0  ;;  %v4789_v45 = vpop.f32.mrf.mxu1 }
0x1f4d   :  { %v3206_v30 = vpop.f32.mrf.mxu1 }
0x1f4f   :  { %v4790_v27 = vpop.f32.mrf.mxu1 }
0x1fd0   :  { %v3211_v5 = vpop.xlane.xlu1 %3210 }
0x1fd1   :  { %v3215_v23 = vsub.f32 %v3152_v62, %v3211_v5 }
0x1fd3   :  { %v3217_v6 = vmul.f32 1.442695, %v3215_v23 }
0x1fd4   :  { %v3214_v7 = vpop.xlane.xlu0 %3213 }
0x1fd5   :  { %4995 = vpow2.f32 %v3217_v6  ;;  %v3216_v40 = vsub.f32 %v3203_v2, %v3214_v7 }
0x1fd7   :  { %v3219_v44 = vmul.f32 1.442695, %v3216_v40 }
0x1fd9   :  { %4997 = vpow2.f32 %v3219_v44 }
0x1fe2   :  { %v4996_v59 = vpop.eup %4995 }
0x1fe3   :  { %v3221_v12 = vsel %vm281_vm5, %v4996_v59, 0.0 }
0x1fe4   :  { %3222 = vadd.xlane.f32.xlu0 %v3221_v12 }
0x1fe6   :  { %v4998_v8 = vpop.eup %4997 }
0x1fe7   :  { %v3224_v31 = vsel %vm281_vm5, %v4998_v8, 0.0 }
0x1fe8   :  { %3225 = vadd.xlane.f32.xlu1 %v3224_v31 }
0x1ff9   :  { %3281 = vrot.lane.b32.xlu1 %v5652_v61, %s5085_s20 }
0x1ffa   :  { %3233 = vrot.lane.b32.xlu0 %v5648_v60, %s5085_s20 }
0x1ffd   :  { %3427 = vrot.lane.b32.xlu1 %v5648_v60, %s5086_s21 }
0x1ffe   :  { %3477 = vrot.lane.b32.xlu0 %v5652_v61, %s5086_s21 }
0x2001   :  { %3425 = vrot.lane.b32.xlu1 %v5659_v25, %s5086_s21 }
0x2002   :  { %3475 = vrot.lane.b32.xlu0 %v5666_v47, %s5086_s21 }
0x206d   :  { %v3223_v50 = vpop.xlane.xlu0 %3222 }
0x206e   :  { %4999 = vrcp.f32 %v3223_v50 }
0x2071   :  { %v3234_v15 = vpop.permute.xlu0 %3233  ;;  %v3226_v57 = vpop.xlane.xlu1 %3225 }
0x2072   :  { %v3239_v9 = vsel %vm404_vm6, %v3234_v15, 0  ;;  %5001 = vrcp.f32 %v3226_v57 }
0x2073   :  { %4792 = vmatpush3.bf16.msra.mxu0 %v3239_v9 }
0x2074   :  { %4803 = vmatprep.subr.bf16.mxu0 %v5081_v1 }
0x2075   :  { %v3282_v11 = vpop.permute.xlu1 %3281  ;;  %v3478_v26 = vpop.permute.xlu0 %3477 }
0x2076   :  { %v3287_v16 = vsel %vm404_vm6, %v3282_v11, 0  ;;  %v3483_v48 = vsel %vm281_vm5, %v3478_v26, 0 }
0x2077   :  { %4798 = vmatpush3.bf16.msra.mxu1 %v3287_v16 }
0x2078   :  { %4809 = vmatprep.subr.bf16.mxu1 %v5081_v1 }
0x2079   :  { %v3476_v28 = vpop.permute.xlu0 %3475  ;;  %v3428_v36 = vpop.permute.xlu1 %3427 }
0x207a   :  { %v3433_v46 = vsel %vm281_vm5, %v3428_v36, 0 }
0x207b   :  { %v5000_v18 = vpop.eup %4999 }
0x207c   :  { %v3228_v20 = vmul.f32 %v5000_v18, %v4996_v59 }
0x207d   :  { %v3426_v54 = vpop.permute.xlu1 %3425 }
0x207e   :  { %v3231_v10 = vpack.c.bf16 %v3228_v20, %v3228_v20 }
0x207f   :  { %v5002_v19 = vpop.eup %5001 }
0x2080   :  { %4794 = vmatmul.mubr.msk.bf16.vlgmr.msra.gmra.mxu0 %vm281_vm5, %v3231_v10  ;;  %v3230_v21 = vmul.f32 %v5002_v19, %v4998_v8 }
0x2081   :  { %4805 = vmatprep.mubr.msk.bf16.mxu0 %vm5082_vm0, %v5081_v1  ;;  %4804 = vmatpush3.bf16.msra.mxu0 %v3335_v35 }
0x2082   :  { %v3232_v22 = vpack.c.bf16 %v3230_v21, %v3230_v21  ;;  %4815 = vmatprep.subr.bf16.mxu0 %v5081_v1 }
0x2084   :  { %4800 = vmatmul.mubr.msk.bf16.vlgmr.msra.gmra.mxu1 %vm281_vm5, %v3232_v22 }
0x2085   :  { %4810 = vmatpush3.bf16.msra.mxu1 %v3382_v24  ;;  %4811 = vmatprep.mubr.msk.bf16.mxu1 %vm5082_vm0, %v5081_v1 }
0x2086   :  { %4821 = vmatprep.subr.bf16.mxu1 %v5081_v1 }
0x208c   :  { %4812 = vmatmul.mubr.msk.bf16.vlgmr.msra.gmra.mxu1 %vm281_vm5, %v3105_v53 }
0x208d   :  { %4822 = vmatpush3.bf16.xpose.msra.mxu1 %v3483_v48  ;;  %4823 = vmatprep.mubr.msk.bf16.mxu1 %vm5082_vm0, %v5081_v1 }
0x208e   :  { %4833 = vmatprep.subr.bf16.mxu1 %v5081_v1 }
0x2094   :  { %4824 = vmatmul.mubr.msk.bf16.vlgmr.msra.gmra.mxu1 %vm281_vm5, %v3476_v28 }
0x2095   :  { %4835 = vmatprep.mubr.msk.bf16.mxu1 %vm5082_vm0, %v5081_v1 }
0x2140   :  { %v3275_v13 = vpop.f32.mrf.mxu0 }
0x2142   :  { %v4795_v14 = vpop.f32.mrf.mxu0 }
0x2144   :  { %v3278_v37 = vpop.f32.mrf.mxu0  ;;  %v3323_v38 = vpop.f32.mrf.mxu1 }
0x2145   :  { %v3329_v39 = vpack.c.bf16 %v3323_v38, %v3275_v13 }
0x2146   :  { %v4796_v41 = vpop.f32.mrf.mxu0  ;;  %v4801_v43 = vpop.f32.mrf.mxu1 }
0x2147   :  { %4806 = vmatmul.mubr.msk.bf16.vlgmr.msra.gmra.mxu0 %vm281_vm5, %v3329_v39  ;;  %v74_v39 = vld [vmem:[#allocation2 + $0x136] sm:$0xff] }
0x2148   :  { %4816 = vmatpush3.bf16.xpose.msra.mxu0 %v3433_v46  ;;  %v3326_v49 = vpop.f32.mrf.mxu1  ;;  %4817 = vmatprep.mubr.msk.bf16.mxu0 %vm5082_vm0, %v5081_v1  ;;  %v3646_v41 = vpack.c.bf16 %v74_v39, %v74_v39 }
0x2149   :  { %4827 = vmatprep.subr.bf16.mxu0 %v5081_v1 }
0x214a   :  { %v4802_v17 = vpop.f32.mrf.mxu1  ;;  %v3651_v43 = vsel %vm404_vm6, %v3646_v41, 0 }
0x214c   :  { %v5760_v53 = vpop.f32.mrf.mxu1 }
0x214e   :  { %v4813_v56 = vpop.f32.mrf.mxu1 }
0x214f   :  { %4818 = vmatmul.mubr.msk.bf16.vlgmr.msra.gmra.mxu0 %vm281_vm5, %v3426_v54 }
0x2150   :  { %v5763_v58 = vpop.f32.mrf.mxu1  ;;  %4829 = vmatprep.mubr.msk.bf16.mxu0 %vm5082_vm0, %v5081_v1 }
0x2152   :  { %v4814_v62 = vpop.f32.mrf.mxu1 }
0x2154   :  { %v3519_v55 = vpop.f32.mrf.mxu1 }
0x2155   :  { %v3528_v63 = vsel %vm281_vm5, %v3519_v55, -inf }
0x2156   :  { %3529 = vmax.xlane.f32.xlu0 %v3528_v63  ;;  %v4825_v0 = vpop.f32.mrf.mxu1 }
0x2158   :  { %v3522_v29 = vpop.f32.mrf.mxu1 }
0x215a   :  { %v4826_v2 = vpop.f32.mrf.mxu1 }
0x21df   :  { %v3530_v3 = vpop.xlane.xlu0 %3529 }
0x21e0   :  { %v3532_v4 = vsub.f32 %v3519_v55, %v3530_v3 }
0x21e2   :  { %v3535_v45 = vmul.f32 1.442695, %v3532_v4 }
0x21e4   :  { %5003 = vpow2.f32 %v3535_v45 }
0x21f1   :  { %v5004_v40 = vpop.eup %5003 }
0x21f2   :  { %v3540_v12 = vsel %vm281_vm5, %v5004_v40, 0.0 }
0x2207   :  { %v5768_v30 = vpop.f32.mrf.mxu0 }
0x2208   :  { %v3419_v3 = vadd.f32 %v5760_v53, %v5768_v30 }
0x2209   :  { %v4807_v27 = vpop.f32.mrf.mxu0 }
0x220b   :  { %v5770_v5 = vpop.f32.mrf.mxu0 }
0x220d   :  { %v4808_v23 = vpop.f32.mrf.mxu0 }
0x220e   :  { %v3422_v23 = vadd.f32 %v5763_v58, %v5770_v5 }
0x220f   :  { %v3469_v6 = vpop.f32.mrf.mxu0 }
0x2210   :  { %v3525_v7 = vsel %vm281_vm5, %v3469_v6, -inf }
0x2211   :  { %3526 = vmax.xlane.f32.xlu1 %v3525_v7  ;;  %v4819_v44 = vpop.f32.mrf.mxu0 }
0x2213   :  { %v3472_v59 = vpop.f32.mrf.mxu0 }
0x2215   :  { %3541 = vadd.xlane.f32.xlu1 %v3540_v12  ;;  %v4820_v8 = vpop.f32.mrf.mxu0 }
0x2226   :  { %3597 = vrot.lane.b32.xlu1 %v5652_v61, %s5087_s22 }
0x222a   :  { %3698 = vrot.lane.b32.xlu1 %v5648_v60, %s5088_s23 }
0x222e   :  { %3696 = vrot.lane.b32.xlu1 %v5659_v25, %s5088_s23 }
0x229a   :  { %v3527_v31 = vpop.xlane.xlu1 %3526 }
0x229b   :  { %v3531_v50 = vsub.f32 %v3469_v6, %v3527_v31 }
0x229d   :  { %v3533_v15 = vmul.f32 1.442695, %v3531_v50 }
0x229e   :  { %v3542_v57 = vpop.xlane.xlu1 %3541 }
0x229f   :  { %5005 = vpow2.f32 %v3533_v15 }
0x22a0   :  { %5007 = vrcp.f32 %v3542_v57 }
0x22a2   :  { %v3598_v9 = vpop.permute.xlu1 %3597 }
0x22a3   :  { %v3603_v11 = vsel %vm404_vm6, %v3598_v9, 0 }
0x22a4   :  { %4834 = vmatpush3.bf16.msra.mxu1 %v3603_v11 }
0x22a5   :  { %4845 = vmatprep.subr.bf16.mxu1 %v5081_v1 }
0x22a6   :  { %v3699_v10 = vpop.permute.xlu1 %3698 }
0x22a7   :  { %v3704_v33 = vsel %vm281_vm5, %v3699_v10, 0 }
0x22aa   :  { %v3697_v19 = vpop.permute.xlu1 %3696 }
0x22ac   :  { %v5006_v16 = vpop.eup %5005 }
0x22ad   :  { %v5008_v18 = vpop.eup %5007  ;;  %v3537_v42 = vsel %vm281_vm5, %v5006_v16, 0.0 }
0x22ae   :  { %v3546_v20 = vmul.f32 %v5008_v18, %v5004_v40  ;;  %3538 = vadd.xlane.f32.xlu0 %v3537_v42 }
0x22b0   :  { %v3548_v25 = vpack.c.bf16 %v3546_v20, %v3546_v20 }
0x22b2   :  { %4836 = vmatmul.mubr.msk.bf16.vlgmr.msra.gmra.mxu1 %vm281_vm5, %v3548_v25 }
0x22b3   :  { %4846 = vmatpush3.bf16.xpose.msra.mxu1 %v3704_v33  ;;  %4847 = vmatprep.mubr.msk.bf16.mxu1 %vm5082_vm0, %v5081_v1 }
0x22b4   :  { %4857 = vmatprep.subr.bf16.mxu1 %v5081_v1 }
0x22ba   :  { %4848 = vmatmul.mubr.msk.bf16.vlgmr.msra.gmra.mxu1 %vm281_vm5, %v3697_v19 }
0x22bb   :  { %4859 = vmatprep.mubr.msk.bf16.mxu1 %vm5082_vm0, %v5081_v1 }
0x22c4   :  { %3549 = vrot.lane.b32.xlu0 %v5648_v60, %s5087_s22 }
0x22c8   :  { %3748 = vrot.lane.b32.xlu0 %v5652_v61, %s5088_s23 }
0x22cc   :  { %3746 = vrot.lane.b32.xlu0 %v5666_v47, %s5088_s23 }
0x2337   :  { %v3539_v21 = vpop.xlane.xlu0 %3538 }
0x2338   :  { %5009 = vrcp.f32 %v3539_v21 }
0x233b   :  { %v3550_v22 = vpop.permute.xlu0 %3549 }
0x233c   :  { %v3555_v24 = vsel %vm404_vm6, %v3550_v22, 0 }
0x233d   :  { %4828 = vmatpush3.bf16.msra.mxu0 %v3555_v24 }
0x233e   :  { %4839 = vmatprep.subr.bf16.mxu0 %v5081_v1 }
0x233f   :  { %v3749_v46 = vpop.permute.xlu0 %3748 }
0x2340   :  { %v3754_v56 = vsel %vm281_vm5, %v3749_v46, 0 }
0x2343   :  { %v3747_v63 = vpop.permute.xlu0 %3746 }
0x2345   :  { %v5010_v26 = vpop.eup %5009 }
0x2346   :  { %v3544_v48 = vmul.f32 %v5010_v26, %v5006_v16 }
0x2348   :  { %v3547_v28 = vpack.c.bf16 %v3544_v48, %v3544_v48 }
0x234a   :  { %4830 = vmatmul.mubr.msk.bf16.vlgmr.msra.gmra.mxu0 %vm281_vm5, %v3547_v28 }
0x234b   :  { %4841 = vmatprep.mubr.msk.bf16.mxu0 %vm5082_vm0, %v5081_v1  ;;  %4840 = vmatpush3.bf16.msra.mxu0 %v3651_v43 }
0x234c   :  { %4851 = vmatprep.subr.bf16.mxu0 %v5081_v1 }
0x2372   :  { %v3639_v52 = vpop.f32.mrf.mxu1 }
0x2374   :  { %v4837_v34 = vpop.f32.mrf.mxu1 }
0x2376   :  { %v3642_v35 = vpop.f32.mrf.mxu1 }
0x2378   :  { %v4838_v47 = vpop.f32.mrf.mxu1 }
0x237a   :  { %v3740_v13 = vpop.f32.mrf.mxu1 }
0x237b   :  { %v3796_v14 = vsel %vm281_vm5, %v3740_v13, -inf }
0x237c   :  { %3797 = vmax.xlane.f32.xlu1 %v3796_v14  ;;  %v4849_v36 = vpop.f32.mrf.mxu1 }
0x237d   :  { %v4276_v36 = vld [vmem:[#allocation2 + $0x146] ss:$0 sm:$0xff] }
0x237e   :  { %v3743_v37 = vpop.f32.mrf.mxu1 }
0x2380   :  { %v4850_v38 = vpop.f32.mrf.mxu1 }
0x2405   :  { %v3798_v0 = vpop.xlane.xlu1 %3797 }
0x2406   :  { %v3802_v29 = vsub.f32 %v3740_v13, %v3798_v0 }
0x2408   :  { %v3804_v2 = vmul.f32 1.442695, %v3802_v29 }
0x240a   :  { %v3591_v49 = vpop.f32.mrf.mxu0  ;;  %5011 = vpow2.f32 %v3804_v2 }
0x240b   :  { %v3645_v17 = vpack.c.bf16 %v3639_v52, %v3591_v49 }
0x240c   :  { %v4831_v54 = vpop.f32.mrf.mxu0 }
0x240d   :  { %4842 = vmatmul.mubr.msk.bf16.vlgmr.msra.gmra.mxu0 %vm281_vm5, %v3645_v17 }
0x240e   :  { %4852 = vmatpush3.bf16.xpose.msra.mxu0 %v3754_v56  ;;  %v3594_v62 = vpop.f32.mrf.mxu0  ;;  %4853 = vmatprep.mubr.msk.bf16.mxu0 %vm5082_vm0, %v5081_v1 }
0x240f   :  { %4863 = vmatprep.subr.bf16.mxu0 %v5081_v1 }
0x2410   :  { %v4832_v55 = vpop.f32.mrf.mxu0 }
0x2415   :  { %4854 = vmatmul.mubr.msk.bf16.vlgmr.msra.gmra.mxu0 %vm281_vm5, %v3747_v63 }
0x2416   :  { %4865 = vmatprep.mubr.msk.bf16.mxu0 %vm5082_vm0, %v5081_v1 }
0x2417   :  { %v5012_v12 = vpop.eup %5011 }
0x2418   :  { %v3808_v53 = vsel %vm281_vm5, %v5012_v12, 0.0 }
0x24cd   :  { %v3687_v4 = vpop.f32.mrf.mxu0 }
0x24ce   :  { %v5815_v45 = vadd.f32 %v3687_v4, %v3419_v3 }
0x24cf   :  { %v4843_v27 = vpop.f32.mrf.mxu0 }
0x24d1   :  { %v3690_v6 = vpop.f32.mrf.mxu0 }
0x24d2   :  { %v5819_v7 = vadd.f32 %v3690_v6, %v3422_v23  ;;  %v81_v6 = vld [vmem:[#allocation2 + $0x159] sm:$0xff] }
0x24d3   :  { %v4844_v40 = vpop.f32.mrf.mxu0 }
0x24d4   :  { %v79_v40 = vld [vmem:[#allocation2 + $0x149] sm:$0xff] }
0x24d5   :  { %v3790_v44 = vpop.f32.mrf.mxu0 }
0x24d6   :  { %v3799_v59 = vsel %vm281_vm5, %v3790_v44, -inf }
0x24d7   :  { %3800 = vmax.xlane.f32.xlu0 %v3799_v59  ;;  %v4855_v8 = vpop.f32.mrf.mxu0 }
0x24d8   :  { %v91_v8 = vld [vmem:[#allocation2 + $0x1a2] sm:$0xff] }
0x24d9   :  { %v3793_v31 = vpop.f32.mrf.mxu0 }
0x24db   :  { %3809 = vadd.xlane.f32.xlu0 %v3808_v53  ;;  %v4856_v30 = vpop.f32.mrf.mxu0 }
0x24f1   :  { %3820 = vrot.lane.b32.xlu0 %v5648_v60, %s5089_s24  ;;  %v75_v60 = vld [vmem:[#allocation2 + $0x13e] sm:$0xff] }
0x24f2   :  { %v3917_v10 = vpack.c.bf16 %v75_v60, %v75_v60 }
0x24f4   :  { %v3922_v25 = vsel %vm404_vm6, %v3917_v10, 0 }
0x2560   :  { %v3801_v50 = vpop.xlane.xlu0 %3800 }
0x2561   :  { %v3803_v58 = vsub.f32 %v3790_v44, %v3801_v50  ;;  %v80_v44 = vld [vmem:[#allocation2 + $0x151] sm:$0xff] }
0x2562   :  { %v4014_v59 = vpack.c.bf16 %v80_v44, %v79_v40 }
0x2563   :  { %v3806_v5 = vmul.f32 1.442695, %v3803_v58 }
0x2564   :  { %v3810_v15 = vpop.xlane.xlu0 %3809 }
0x2565   :  { %5013 = vpow2.f32 %v3806_v5 }
0x2566   :  { %5015 = vrcp.f32 %v3810_v15 }
0x2568   :  { %v3821_v57 = vpop.permute.xlu0 %3820 }
0x2569   :  { %v3826_v9 = vsel %vm404_vm6, %v3821_v57, 0 }
0x256a   :  { %4858 = vmatpush3.bf16.msra.mxu1 %v3826_v9 }
0x256b   :  { %4869 = vmatprep.subr.bf16.mxu1 %v5081_v1 }
0x2572   :  { %v5014_v11 = vpop.eup %5013 }
0x2573   :  { %v5016_v16 = vpop.eup %5015  ;;  %v3811_v18 = vsel %vm281_vm5, %v5014_v11, 0.0 }
0x2574   :  { %v3815_v42 = vmul.f32 %v5016_v16, %v5012_v12  ;;  %3812 = vadd.xlane.f32.xlu1 %v3811_v18  ;;  %v90_v12 = vld [vmem:[#allocation2 + $0x19a] sm:$0xff] }
0x2575   :  { %v4070_v31 = vpack.c.bf16 %v91_v8, %v90_v12 }
0x2576   :  { %v3818_v20 = vpack.c.bf16 %v3815_v42, %v3815_v42 }
0x2578   :  { %4860 = vmatmul.mubr.msk.bf16.vlgmr.msra.gmra.mxu1 %vm281_vm5, %v3818_v20  ;;  %v4278_v20 = vld [vmem:[#allocation2 + $0x148] ss:$0 sm:$0xff] }
0x2579   :  { %4871 = vmatprep.mubr.msk.bf16.mxu1 %vm5082_vm0, %v5081_v1  ;;  %4870 = vmatpush3.bf16.msra.mxu1 %v3922_v25 }
0x257a   :  { %4883 = vmatprep.subr.bf16.mxu1 %v5081_v1 }
0x2585   :  { %3868 = vrot.lane.b32.xlu1 %v5652_v61, %s5089_s24 }
0x25fd   :  { %v3813_v33 = vpop.xlane.xlu1 %3812 }
0x25fe   :  { %5017 = vrcp.f32 %v3813_v33 }
0x2601   :  { %v3869_v19 = vpop.permute.xlu1 %3868 }
0x2602   :  { %v3874_v21 = vsel %vm404_vm6, %v3869_v19, 0  ;;  %v88_v19 = vld [vmem:[#allocation2 + $0x18a] sm:$0xff] }
0x2603   :  { %4864 = vmatpush3.bf16.msra.mxu0 %v3874_v21  ;;  %v89_v21 = vld [vmem:[#allocation2 + $0x192] sm:$0xff] }
0x2604   :  { %4875 = vmatprep.subr.bf16.mxu0 %v5081_v1 }
0x260b   :  { %v5018_v22 = vpop.eup %5017 }
0x260c   :  { %v3817_v24 = vmul.f32 %v5018_v22, %v5014_v11  ;;  %v4277_v11 = vld [vmem:[#allocation2 + $0x147] ss:$0 sm:$0xff]  ;;  %v4069_v22 = vpack.c.bf16 %v89_v21, %v88_v19 }
0x260e   :  { %v3819_v26 = vpack.c.bf16 %v3817_v24, %v3817_v24  ;;  %v86_v24 = vld [vmem:[#allocation2 + $0x17a] sm:$0xff] }
0x2610   :  { %4866 = vmatmul.mubr.msk.bf16.vlgmr.msra.gmra.mxu0 %vm281_vm5, %v3819_v26  ;;  %v87_v26 = vld [vmem:[#allocation2 + $0x182] sm:$0xff] }
0x2611   :  { %4879 = vmatprep.mubr.msk.bf16.mxu0 %vm5082_vm0, %v5081_v1 }
0x2638   :  { %v3862_v61 = vpop.f32.mrf.mxu1 }
0x263a   :  { %v4861_v48 = vpop.f32.mrf.mxu1 }
0x263b   :  { %v84_v48 = vld [vmem:[#allocation2 + $0x16a] sm:$0xff] }
0x263c   :  { %v3865_v28 = vpop.f32.mrf.mxu1 }
0x263d   :  { %v85_v28 = vld [vmem:[#allocation2 + $0x172] sm:$0xff] }
0x263e   :  { %v4862_v52 = vpop.f32.mrf.mxu1 }
0x263f   :  { %v4067_v52 = vpack.c.bf16 %v85_v28, %v84_v48 }
0x26d0   :  { %v3910_v34 = vpop.f32.mrf.mxu0 }
0x26d1   :  { %v3916_v35 = vpack.c.bf16 %v3910_v34, %v3862_v61  ;;  %v4068_v61 = vpack.c.bf16 %v87_v26, %v86_v24  ;;  %v4279_v34 = vld [vmem:[#allocation2 + $0x169] ss:$0 sm:$0xff] }
0x26d2   :  { %v4867_v47 = vpop.f32.mrf.mxu0 }
0x26d3   :  { %4872 = vmatmul.mubr.msk.bf16.vlgmr.msra.gmra.mxu1 %vm281_vm5, %v3916_v35 }
0x26d4   :  { %v3913_v13 = vpop.f32.mrf.mxu0  ;;  %4891 = vmatprep.mubr.msk.bf16.mxu1 %vm5082_vm0, %v5081_v1  ;;  %4884 = vmatpush3.bf16.msra.mxu1 %v4070_v31 }
0x26d5   :  { %4885 = vmatprep.subr.bf16.mxu1 %v5081_v1 }
0x26d6   :  { %v4868_v14 = vpop.f32.mrf.mxu0 }
0x26d8   :  { %4886 = vmatpush3.bf16.msra.mxu1 %v4069_v22 }
0x26d9   :  { %4887 = vmatprep.subr.bf16.mxu1 %v5081_v1 }
0x26dc   :  { %4888 = vmatpush3.bf16.msra.mxu1 %v4068_v61 }
0x26dd   :  { %4889 = vmatprep.subr.bf16.mxu1 %v5081_v1 }
0x26e0   :  { %4890 = vmatpush3.bf16.msra.mxu1 %v4067_v52 }
0x2793   :  { %v3958_v37 = vpop.f32.mrf.mxu1 }
0x2794   :  { %v3965_v38 = vadd.f32 %v3958_v37, %v5815_v45 }
0x2795   :  { %v4873_v39 = vpop.f32.mrf.mxu1 }
0x2796   :  { %v3971_v41 = vadd.f32 %v4276_v36, %v3965_v38 }
0x2797   :  { %v3961_v43 = vpop.f32.mrf.mxu1 }
0x2798   :  { %v3966_v46 = vadd.f32 %v3961_v43, %v5819_v7  ;;  %v3973_v49 = vadd.f32 %v3971_v41, %v5639_v32  ;;  %v82_v7 = vld [vmem:[#allocation2 + $0x161] sm:$0xff]  ;;  %v4281_v43 = vld [vmem:[#allocation2 + $0x1aa] ss:$0 sm:$0xff] }
0x2799   :  { %v4874_v17 = vpop.f32.mrf.mxu1 }
0x279a   :  { %v3972_v54 = vadd.f32 %v4276_v36, %v3966_v46  ;;  %v3975_v56 = vsel %vm179_vm4, %v3973_v49, 0.0 }
0x279b   :  { %3976 = vadd.xlane.f32.xlu1 %v3975_v56 }
0x279c   :  { %v3974_v62 = vadd.f32 %v3972_v54, %v5641_v51  ;;  %v4015_v51 = vpack.c.bf16 %v82_v7, %v81_v6 }
0x279e   :  { %v3978_v55 = vsel %vm179_vm4, %v3974_v62, 0.0  ;;  %4876 = vmatpush3.bf16.msra.mxu0 %v4015_v51 }
0x279f   :  { %3979 = vadd.xlane.f32.xlu0 %v3978_v55  ;;  %4877 = vmatprep.subr.bf16.mxu0 %v5081_v1 }
0x27a2   :  { %4878 = vmatpush3.bf16.msra.mxu0 %v4014_v59 }
0x2824   :  { %v3977_v63 = vpop.xlane.xlu1 %3976 }
0x2825   :  { %v3981_v0 = vmul.f32 0.03125, %v3977_v63 }
0x2827   :  { %v3983_v29 = vsub.f32 %v3973_v49, %v3981_v0 }
0x2828   :  { %v3980_v2 = vpop.xlane.xlu0 %3979 }
0x2829   :  { %v3982_v3 = vmul.f32 0.03125, %v3980_v2  ;;  %v3985_v4 = vmul.f32 %v3983_v29, %v3983_v29 }
0x282b   :  { %v3984_v45 = vsub.f32 %v3974_v62, %v3982_v3  ;;  %v3987_v27 = vsel %vm179_vm4, %v3985_v4, 0.0 }
0x282c   :  { %3988 = vadd.xlane.f32.xlu0 %v3987_v27 }
0x282d   :  { %v3986_v32 = vmul.f32 %v3984_v45, %v3984_v45 }
0x282f   :  { %v3990_v23 = vsel %vm179_vm4, %v3986_v32, 0.0 }
0x2830   :  { %3991 = vadd.xlane.f32.xlu1 %v3990_v23 }
0x28b5   :  { %v3989_v53 = vpop.xlane.xlu0 %3988 }
0x28b6   :  { %v3993_v30 = vmul.f32 0.03125, %v3989_v53 }
0x28b8   :  { %v3995_v50 = vadd.f32 1e-05, %v3993_v30  ;;  %v4283_v30 = vld [vmem:[#allocation2 + $0x1ab] ss:$0 sm:$0xff] }
0x28b9   :  { %v3992_v58 = vpop.xlane.xlu1 %3991 }
0x28ba   :  { %5019 = vrsqrt.f32 %v3995_v50  ;;  %v3994_v5 = vmul.f32 0.03125, %v3992_v58 }
0x28bc   :  { %v3996_v15 = vadd.f32 1e-05, %v3994_v5 }
0x28be   :  { %5021 = vrsqrt.f32 %v3996_v15  ;;  %v4284_v15 = vld [vmem:[#allocation2 + $0x1ac] ss:$0 sm:$0xff] }
0x28c7   :  { %v5020_v57 = vpop.eup %5019 }
0x28c8   :  { %v3999_v9 = vmul.f32 %v5020_v57, %v3983_v29 }
0x28ca   :  { %v4005_v18 = vmul.f32 %v4277_v11, %v3999_v9 }
0x28cb   :  { %v5022_v16 = vpop.eup %5021 }
0x28cc   :  { %v4000_v42 = vmul.f32 %v5022_v16, %v3984_v45  ;;  %v4011_v10 = vadd.f32 %v4278_v20, %v4005_v18 }
0x28ce   :  { %v4006_v60 = vmul.f32 %v4277_v11, %v4000_v42 }
0x28d0   :  { %v4012_v25 = vadd.f32 %v4278_v20, %v4006_v60 }
0x28d2   :  { %v4013_v33 = vpack.c.bf16 %v4012_v25, %v4011_v10 }
0x28d4   :  { %4880 = vmatmul.mubr.msk.bf16.vlgmr.msra.gmra.mxu0 %vm179_vm4, %v4013_v33 }
0x2994   :  { %v4057_v35 = vpop.f32.mrf.mxu0 }
0x2995   :  { %v4058_v13 = vadd.f32 %v4279_v34, %v4057_v35 }
0x2996   :  { %v4881_v47 = vpop.f32.mrf.mxu0 }
0x2997   :  { %v4064_v38 = vmax.f32 %v4058_v13, 0.0 }
0x2998   :  { %v4060_v14 = vpop.f32.mrf.mxu0 }
0x2999   :  { %v4061_v36 = vadd.f32 %v4279_v34, %v4060_v14 }
0x299a   :  { %v4882_v37 = vpop.f32.mrf.mxu0 }
0x299b   :  { %v4065_v39 = vmax.f32 %v4061_v36, 0.0 }
0x299d   :  { %v4066_v41 = vpack.c.bf16 %v4065_v39, %v4064_v38 }
0x299f   :  { %4892 = vmatmul.mubr.msk.bf16.vlgmr.msra.gmra.mxu1 %vm1468_vm7, %v4066_v41 }
0x2a5f   :  { %v4112_v46 = vpop.f32.mrf.mxu1 }
0x2a60   :  { %v4113_v49 = vadd.f32 %v4281_v43, %v4112_v46 }
0x2a61   :  { %v4893_v1 = vpop.f32.mrf.mxu1 }
0x2a62   :  { %v4119_v17 = vadd.f32 %v4113_v49, %v4011_v10 }
0x2a63   :  { %v4115_v54 = vpop.f32.mrf.mxu1 }
0x2a64   :  { %v4116_v56 = vadd.f32 %v4281_v43, %v4115_v54  ;;  %v4121_v62 = vsel %vm179_vm4, %v4119_v17, 0.0 }
0x2a65   :  { %4122 = vadd.xlane.f32.xlu0 %v4121_v62  ;;  %v4894_v55 = vpop.f32.mrf.mxu1 }
0x2a66   :  { %v4120_v63 = vadd.f32 %v4116_v56, %v4012_v25 }
0x2a68   :  { %v4124_v0 = vsel %vm179_vm4, %v4120_v63, 0.0 }
0x2a69   :  { %4125 = vadd.xlane.f32.xlu1 %v4124_v0 }
0x2aee   :  { %v4123_v29 = vpop.xlane.xlu0 %4122 }
0x2aef   :  { %v4127_v2 = vmul.f32 0.03125, %v4123_v29 }
0x2af1   :  { %v4129_v3 = vsub.f32 %v4119_v17, %v4127_v2 }
0x2af2   :  { %v4126_v4 = vpop.xlane.xlu1 %4125 }
0x2af3   :  { %v4128_v45 = vmul.f32 0.03125, %v4126_v4  ;;  %v4131_v27 = vmul.f32 %v4129_v3, %v4129_v3 }
0x2af5   :  { %v4130_v32 = vsub.f32 %v4120_v63, %v4128_v45  ;;  %v4133_v23 = vsel %vm179_vm4, %v4131_v27, 0.0 }
0x2af6   :  { %4134 = vadd.xlane.f32.xlu0 %v4133_v23 }
0x2af7   :  { %v4132_v6 = vmul.f32 %v4130_v32, %v4130_v32 }
0x2af9   :  { %v4136_v7 = vsel %vm179_vm4, %v4132_v6, 0.0 }
0x2afa   :  { %4137 = vadd.xlane.f32.xlu1 %v4136_v7 }
0x2b7f   :  { %v4135_v51 = vpop.xlane.xlu0 %4134 }
0x2b80   :  { %v4139_v40 = vmul.f32 0.03125, %v4135_v51 }
0x2b82   :  { %v4141_v44 = vadd.f32 1e-05, %v4139_v40 }
0x2b83   :  { %v4138_v59 = vpop.xlane.xlu1 %4137 }
0x2b84   :  { %5023 = vrsqrt.f32 %v4141_v44  ;;  %v4140_v12 = vmul.f32 0.03125, %v4138_v59 }
0x2b86   :  { %v4142_v8 = vadd.f32 1e-05, %v4140_v12 }
0x2b88   :  { %5025 = vrsqrt.f32 %v4142_v8 }
0x2b91   :  { %v5024_v31 = vpop.eup %5023 }
0x2b92   :  { %v4145_v53 = vmul.f32 %v5024_v31, %v4129_v3 }
0x2b94   :  { %v4151_v5 = vmul.f32 %v4283_v30, %v4145_v53 }
0x2b95   :  { %v5026_v50 = vpop.eup %5025 }
0x2b96   :  { %v4146_v58 = vmul.f32 %v5026_v50, %v4130_v32  ;;  %v4157_v9 = vadd.f32 %v4284_v15, %v4151_v5 }
0x2b98   :  { %v4152_v57 = vmul.f32 %v4283_v30, %v4146_v58 }
0x2b9a   :  { %v4158_v11 = vadd.f32 %v4284_v15, %v4152_v57 }
0x2b9c   :  { %v4159_v16 = vmax.f32 %v4157_v9, %v4158_v11 }
0x2b9e   :  { %v4160_v18 = vsub.f32 %v4157_v9, %v4159_v16  ;;  %v4161_v42 = vsub.f32 %v4158_v11, %v4159_v16 }
0x2ba0   :  { %v4162_v20 = vmul.f32 1.442695, %v4160_v18  ;;  %v4164_v60 = vmul.f32 1.442695, %v4161_v42 }
0x2ba2   :  { %5027 = vpow2.f32 %v4162_v20 }
0x2ba3   :  { %5029 = vpow2.f32 %v4164_v60 }
0x2baf   :  { %v5028_v10 = vpop.eup %5027 }
0x2bb0   :  { %v5030_v25 = vpop.eup %5029 }
0x2bb1   :  { %v4166_v33 = vadd.f32 %v5030_v25, %v5028_v10 }
0x2bb3   :  { %5031 = vlog2.f32 %v4166_v33 }
0x2bc0   :  { %v5032_v19 = vpop.eup %5031 }
0x2bc1   :  { %v4168_v21 = vmul.f32 0.6931472, %v5032_v19 }
0x2bc3   :  { %v4169_v22 = vsub.f32 %v4160_v18, %v4168_v21  ;;  %v4171_v24 = vsub.f32 %v4161_v42, %v4168_v21 }
0x2bc5   :  { %4170 = vst.msk [vmem:[#allocation5] sm:$0xff] %vm179_vm4, %v4169_v22  ;;  %4173 = vst.msk [vmem:[#allocation5 + $0x8] sm:$0xff] %vm179_vm4, %v4171_v24 }
0x2bc6   :  { %5064 = shalt.err (!%p5061_p9)
}
0x2bc7   :  { %4185 = dma.vmem_to_hbm [thread:$0]  %s4180_s26, 256, %s5871_s2, [#allocation4], %s5078_s12, %s5078_s12, %s5079_s13  }
0x2bc8   :  { %5075 = dma.done.wait [#allocation4], 256  }
0x2bc9   :  { %5076 = vsyncadd [#allocation4], 4294967040 }
0x2bca   :  { %4189 = vsyncpa [#allocation3], 1 }
0x2bcb   :  { %4190 = vsyncpa [#allocation4], 1 }

</bundles_post_ra>
